<compile_context>
chip_gen: v7x
topology: tpu7x:2x2x1
jax: 0.10.0
libtpu: 0.0.40
codegen_flags: <defaults>
</compile_context>

<pallas_src>
import functools

import numpy as np
import jax
import jax.numpy as jnp
from jax.experimental import pallas as pl
from jax.experimental.pallas import tpu as pltpu


# ----------------------------- Fused encoder kernel -----------------------------

def _encoder_kernel(
    x_ref,                                   # (N, L, 1) f32 input (lane = channel)
    wi_ref, ai_ref, bi_ref,                  # init conv   (3, C1) f32, (1, C1) f32
    w11_ref, a11_ref, b11_ref,               # ODE block 1, conv1  (3*C1, C1) bf16
    w12_ref, a12_ref, b12_ref,               # ODE block 1, conv2
    wd_ref, ad_ref, bd_ref,                  # down conv           (3*C1, C2) bf16
    w21_ref, a21_ref, b21_ref,               # ODE block 2, conv1  (3*C2, C2) bf16
    w22_ref, a22_ref, b22_ref,               # ODE block 2, conv2
    f1w_ref, f1b_ref, f2w_ref, f2b_ref,      # FC head (bf16 weights, f32 biases)
    o_ref,                                   # (N, d_model) f32
    dbuf_ref,                                # (N, L+1, C1) halo rows for stride-2
    abuf_ref,                                # (N*L/2, C2) stage-2 rows for pooling
    *, L):
  N = x_ref.shape[0]
  L2 = L // 2
  window = L2 // 4
  C1 = ai_ref.shape[-1]
  C2 = ad_ref.shape[-1]

  def taps(h):
    # h: (N, Lp, C) f32. +-1 row shifts with zero boundary rows, entirely in
    # registers (no VMEM halo store->load round trip on the critical path).
    z = jnp.zeros_like(h[:, :1, :])
    hm = jnp.concatenate([z, h[:, :-1, :]], axis=1)       # h[l-1]
    hp = jnp.concatenate([h[:, 1:, :], z], axis=1)        # h[l+1]
    return hm, hp

  def conv_bn(h, w_ref, a_ref, b_ref, relu):
    # Conv1d(k=3, pad=1) as 3 accumulating K=C MXU dots against sublane slices
    # of the stacked (3*C, Cout) weight; bf16 operands, f32 accumulation,
    # folded BN (+conv bias) and ReLU in f32 on the VPU.
    n_, lp, c = h.shape
    hm, hp = taps(h)

    def tap_dot(a, k):
      return jnp.dot(a.reshape(n_ * lp, c).astype(jnp.bfloat16),
                     w_ref[k * c:(k + 1) * c, :],
                     preferred_element_type=jnp.float32)

    y = tap_dot(hm, 0) + tap_dot(h, 1) + tap_dot(hp, 2)
    y = y * a_ref[...] + b_ref[...]
    if relu:
      y = jnp.maximum(y, 0.0)
    return y.reshape(n_, lp, -1)

  def ode_func(y, p1, p2):
    # ODEFunc.forward (eval): conv1 -> bn1 -> relu -> conv2 -> bn2 (dropout = id).
    return conv_bn(conv_bn(y, *p1, relu=True), *p2, relu=False)

  def rk4_block(y0, p1, p2):
    # odeint(f, x, linspace(0,1,2), method='rk4') == one RK4 3/8-rule step, dt=1.
    f = lambda y: ode_func(y, p1, p2)
    k1 = f(y0)
    k2 = f(y0 + k1 / 3.0)
    k3 = f(y0 + (k2 - k1 / 3.0))
    k4 = f(y0 + (k1 - k2 + k3))
    return y0 + (k1 + 3.0 * (k2 + k3) + k4) * 0.125

  # ---- initial conv (Cin=1, k=3, pad=1) + BN + ReLU: pure-VPU broadcast MAC.
  x = x_ref[...]                                          # (N, L, 1) f32
  zc = jnp.zeros_like(x[:, :1, :])
  xm = jnp.concatenate([zc, x[:, :-1, :]], axis=1)
  xp = jnp.concatenate([x[:, 1:, :], zc], axis=1)
  h = xm * wi_ref[0:1, :] + x * wi_ref[1:2, :] + xp * wi_ref[2:3, :]
  h = jnp.maximum(h * ai_ref[...] + bi_ref[...], 0.0)     # (N, L, C1)

  # ---- Neural ODE block 1 (channels C1)
  h = rk4_block(h, (w11_ref, a11_ref, b11_ref), (w12_ref, a12_ref, b12_ref))

  # ---- down conv: k=3, stride 2, pad 1. Only the even output rows are
  #      computed; their taps are strided slices of a zero-topped halo scratch.
  dbuf_ref[:, :1, :] = jnp.zeros((N, 1, C1), jnp.float32)  # h[-1] = 0 boundary
  dbuf_ref[:, 1:, :] = h
  left = dbuf_ref[:, pl.ds(0, L2, 2), :]                   # h[2j-1]
  center = dbuf_ref[:, pl.ds(1, L2, 2), :]                 # h[2j]
  right = dbuf_ref[:, pl.ds(2, L2, 2), :]                  # h[2j+1]

  def down_dot(a, k):
    return jnp.dot(a.reshape(N * L2, C1).astype(jnp.bfloat16),
                   wd_ref[k * C1:(k + 1) * C1, :],
                   preferred_element_type=jnp.float32)

  h = down_dot(left, 0) + down_dot(center, 1) + down_dot(right, 2)
  h = jnp.maximum(h * ad_ref[...] + bd_ref[...], 0.0)      # (N*L2, C2)
  h = h.reshape(N, L2, C2)

  # ---- Neural ODE block 2 (channels C2)
  h = rk4_block(h, (w21_ref, a21_ref, b21_ref), (w22_ref, a22_ref, b22_ref))

  # ---- AdaptiveMaxPool1d(4) (VPU max over strided row reads) fused with
  #      split-K fc1 (+ReLU) and fc2. PyTorch's channel-major flatten is
  #      handled by the pre-permuted fc1 weight slices.
  abuf_ref[...] = h.reshape(N * L2, C2)
  z = f1b_ref[...]                                         # (1, D1) f32
  for p in range(4):
    seg = abuf_ref[pl.ds(p * window, N, L2), :]            # (N, C2), pool col p
    for o in range(1, window):
      seg = jnp.maximum(seg, abuf_ref[pl.ds(p * window + o, N, L2), :])
    z = z + jnp.dot(seg.astype(jnp.bfloat16),
                    f1w_ref[p * C2:(p + 1) * C2, :],
                    preferred_element_type=jnp.float32)
  z = jnp.maximum(z, 0.0)
  z = jnp.dot(z.astype(jnp.bfloat16), f2w_ref[...],
              preferred_element_type=jnp.float32) + f2b_ref[...]
  o_ref[...] = z


# ----------------------------- Wrapper -----------------------------

def _const_index(g, *, ndim):
  return (0,) * ndim


def _default_grid_blocks(n):
  # v7x has 2 TensorCores per chip: keep a 2-way "parallel" grid there so both
  # cores run (n/2 samples folded into rows per step). On single-TC v5e/v6e
  # fold everything into ONE grid step (grid iteration is just a serial loop).
  try:
    kind = jax.devices()[0].device_kind.lower()
  except Exception:
    kind = ""
  if n >= 2 and n % 2 == 0 and "v7" in kind:
    return 2
  return 1


def _build_operands(params):
  """Kernel-ready operands: stacked bf16 conv weights + folded-BN scale/shift."""
  def conv_ops(p, matmul):
    w = p['w']                                             # (3, Cin, Cout) f32
    k, cin, cout = w.shape
    if matmul:
      w = w.reshape(k * cin, cout).astype(jnp.bfloat16)    # MXU operand
    else:
      w = w.reshape(k, cout)                               # init conv (Cin=1), VPU, f32
    return [w, p['scale'], p['shift']]

  ops = conv_ops(params['init'], matmul=False)
  for name in ('ode1_c1', 'ode1_c2', 'down', 'ode2_c1', 'ode2_c2'):
    ops += conv_ops(params[name], matmul=True)

  # PyTorch flattens the pooled (B, C2, 4) tensor channel-major (index c*4+p);
  # the kernel consumes pool-major slices, so pre-permute fc1's input rows.
  c2 = params['ode2_c1']['w'].shape[2]
  f1 = (params['fc1_w'].reshape(c2, 4, -1).transpose(1, 0, 2)
        .reshape(4 * c2, -1).astype(jnp.bfloat16))
  ops += [f1, params['fc1_b'].reshape(1, -1),
          params['fc2_w'].astype(jnp.bfloat16), params['fc2_b'].reshape(1, -1)]
  return ops


def encoder_batched(params, xs, grid_blocks=None):
  """Encoder on a stack of inputs: xs (n, B, L) -> (n, B, d_model)."""
  xs = jnp.asarray(xs, jnp.float32)
  n, B, L = xs.shape
  assert L % 16 == 0, "L must be a multiple of 16"
  L2 = L // 2
  C1 = params['ode1_c1']['w'].shape[2]
  C2 = params['ode2_c1']['w'].shape[2]
  d_model = params['fc2_w'].shape[-1]

  G = grid_blocks if grid_blocks is not None else _default_grid_blocks(n)
  assert n % G == 0
  rows = (n * B) // G                      # samples per grid step (matmul rows)

  ops = _build_operands(params)
  x_flat = xs.reshape(n * B, L, 1)         # trailing unit dim: lanes = channels

  in_specs = [pl.BlockSpec((rows, L, 1), lambda g: (g, 0, 0))]
  for a in ops:
    in_specs.append(
        pl.BlockSpec(tuple(a.shape), functools.partial(_const_index, ndim=a.ndim)))

  out = pl.pallas_call(
      functools.partial(_encoder_kernel, L=L),
      out_shape=jax.ShapeDtypeStruct((G, rows, d_model), jnp.float32),
      grid=(G,),
      in_specs=in_specs,
      out_specs=pl.BlockSpec((None, rows, d_model), lambda g: (g, 0, 0)),
      scratch_shapes=[
          pltpu.VMEM((rows, L + 1, C1), jnp.float32),   # halo rows, stride-2 down conv
          pltpu.VMEM((rows * L2, C2), jnp.float32),     # stage-2 rows for pooling
      ],
      compiler_params=pltpu.CompilerParams(
          dimension_semantics=("parallel",)),
  )(x_flat, *ops)
  return out.reshape(n, B, d_model)


def encoder(params, x):
  return encoder_batched(params, x[None])[0]


def contrastive_neural_ode_forward(params, x1, x2=None):
  if x2 is None:
    return encoder(params, x1)
  z = encoder_batched(params, jnp.stack([x1, x2], axis=0))
  return z[0], z[1]


# ----------------------------- Pure-JAX reference -----------------------------

def _reference_forward(params, x, matmul_dtype=jnp.float32):
  """Non-Pallas reference. matmul_dtype=bfloat16 mirrors the kernel's MXU
  operand precision (tight self-check); float32 is the exact reference."""
  def conv(h, p, relu, dtype):                             # h: (B, L, Cin)
    w = p['w'].astype(dtype)                               # (3, Cin, Cout)
    hp = jnp.pad(h, ((0, 0), (1, 1), (0, 0))).astype(dtype)
    y = (jnp.einsum('blc,cd->bld', hp[:, :-2, :], w[0],
                    preferred_element_type=jnp.float32)
         + jnp.einsum('blc,cd->bld', hp[:, 1:-1, :], w[1],
                      preferred_element_type=jnp.float32)
         + jnp.einsum('blc,cd->bld', hp[:, 2:, :], w[2],
                      preferred_element_type=jnp.float32))
    y = y * p['scale'] + p['shift']
    return jnp.maximum(y, 0.0) if relu else y

  def ode_func(y, p1, p2):
    return conv(conv(y, p1, True, matmul_dtype), p2, False, matmul_dtype)

  def rk4(y, p1, p2):
    f = lambda v: ode_func(v, p1, p2)
    k1 = f(y)
    k2 = f(y + k1 / 3.0)
    k3 = f(y + (k2 - k1 / 3.0))
    k4 = f(y + (k1 - k2 + k3))
    return y + (k1 + 3.0 * (k2 + k3) + k4) * 0.125

  h = conv(x[:, :, None], params['init'], True, jnp.float32)  # kernel keeps init conv f32
  h = rk4(h, params['ode1_c1'], params['ode1_c2'])
  h = conv(h, params['down'], True, matmul_dtype)[:, 0::2, :]
  h = rk4(h, params['ode2_c1'], params['ode2_c2'])
  Bh, L2, C = h.shape
  h = jnp.max(h.reshape(Bh, 4, L2 // 4, C), axis=2)            # adaptive max pool
  f = jnp.transpose(h, (0, 2, 1)).reshape(Bh, -1)              # channel-major flatten
  z = jnp.einsum('bi,io->bo', f.astype(matmul_dtype),
                 params['fc1_w'].astype(matmul_dtype),
                 preferred_element_type=jnp.float32) + params['fc1_b']
  z = jnp.maximum(z, 0.0)
  return jnp.einsum('bi,io->bo', z.astype(matmul_dtype),
                    params['fc2_w'].astype(matmul_dtype),
                    preferred_element_type=jnp.float32) + params['fc2_b']


# ----------------------------- Parameter init -----------------------------

def _fold_bn(bias, gamma, beta, mean, var, eps=1e-5):
  scale = gamma / jnp.sqrt(var + eps)
  shift = beta + scale * (bias - mean)
  return (scale.reshape(1, -1).astype(jnp.float32),
          shift.reshape(1, -1).astype(jnp.float32))


def _make_conv_bn(key, cin, cout):
  kw, kb, kg, kbe = jax.random.split(key, 4)
  w = jax.random.normal(kw, (3, cin, cout), jnp.float32) / np.sqrt(3.0 * cin)
  b = 0.1 * jax.random.normal(kb, (cout,), jnp.float32)
  gamma = 1.0 + 0.1 * jax.random.normal(kg, (cout,), jnp.float32)
  beta = 0.1 * jax.random.normal(kbe, (cout,), jnp.float32)
  mean = jnp.zeros((cout,), jnp.float32)                   # BN running stats (eval)
  var = jnp.ones((cout,), jnp.float32)
  scale, shift = _fold_bn(b, gamma, beta, mean, var)
  return {'w': w, 'scale': scale, 'shift': shift}


def init_params(key, d_model):
  ks = jax.random.split(key, 10)
  return {
      'init': _make_conv_bn(ks[0], 1, 32),
      'ode1_c1': _make_conv_bn(ks[1], 32, 32),
      'ode1_c2': _make_conv_bn(ks[2], 32, 32),
      'down': _make_conv_bn(ks[3], 32, 64),
      'ode2_c1': _make_conv_bn(ks[4], 64, 64),
      'ode2_c2': _make_conv_bn(ks[5], 64, 64),
      'fc1_w': jax.random.normal(ks[6], (256, 64), jnp.float32) / np.sqrt(256.0),
      'fc1_b': 0.1 * jax.random.normal(ks[7], (64,), jnp.float32),
      'fc2_w': jax.random.normal(ks[8], (64, d_model), jnp.float32) / np.sqrt(64.0),
      'fc2_b': 0.1 * jax.random.normal(ks[9], (d_model,), jnp.float32),
  }


# ----------------------------- Main -----------------------------

if __name__ == "__main__":
  key = jax.random.PRNGKey(0)
  kp, kx1, kx2 = jax.random.split(key, 3)

  d_model = 32
  B, L = 2, 16
  params = init_params(kp, d_model)

  x1 = jax.random.normal(kx1, (B, L), jnp.float32)
  x2 = jax.random.normal(kx2, (B, L), jnp.float32)

  fwd = jax.jit(functools.partial(contrastive_neural_ode_forward, params))
  z1, z2 = fwd(x1, x2)
  jax.block_until_ready((z1, z2))

  assert z1.shape == (B, d_model) and z2.shape == (B, d_model)
  assert z1.dtype == jnp.float32 and z2.dtype == jnp.float32

  # Tight check vs. a reference that mirrors the kernel's bf16 MXU operands.
  ref_bf16 = jax.jit(functools.partial(_reference_forward, params,
                                       matmul_dtype=jnp.bfloat16))
  np.testing.assert_allclose(np.asarray(z1), np.asarray(ref_bf16(x1)),
                             rtol=2e-3, atol=2e-3)
  np.testing.assert_allclose(np.asarray(z2), np.asarray(ref_bf16(x2)),
                             rtol=2e-3, atol=2e-3)

  # Structural check vs. the full-f32 reference (bf16 operand rounding only).
  ref_f32 = jax.jit(functools.partial(_reference_forward, params,
                                      matmul_dtype=jnp.float32))
  np.testing.assert_allclose(np.asarray(z1), np.asarray(ref_f32(x1)),
                             rtol=5e-2, atol=5e-2)
  np.testing.assert_allclose(np.asarray(z2), np.asarray(ref_f32(x2)),
                             rtol=5e-2, atol=5e-2)

  print("KERNEL_OK")
</pallas_src>

<mosaic_0001>
module attributes {stable_mosaic.version = 11 : i64} {
  func.func @_encoder_kernel(%arg0: i32, %arg1: memref<4x16x1xf32, #tpu.memory_space<vmem>>, %arg2: memref<3x32xf32, #tpu.memory_space<vmem>>, %arg3: memref<1x32xf32, #tpu.memory_space<vmem>>, %arg4: memref<1x32xf32, #tpu.memory_space<vmem>>, %arg5: memref<96x32xbf16, #tpu.memory_space<vmem>>, %arg6: memref<1x32xf32, #tpu.memory_space<vmem>>, %arg7: memref<1x32xf32, #tpu.memory_space<vmem>>, %arg8: memref<96x32xbf16, #tpu.memory_space<vmem>>, %arg9: memref<1x32xf32, #tpu.memory_space<vmem>>, %arg10: memref<1x32xf32, #tpu.memory_space<vmem>>, %arg11: memref<96x64xbf16, #tpu.memory_space<vmem>>, %arg12: memref<1x64xf32, #tpu.memory_space<vmem>>, %arg13: memref<1x64xf32, #tpu.memory_space<vmem>>, %arg14: memref<192x64xbf16, #tpu.memory_space<vmem>>, %arg15: memref<1x64xf32, #tpu.memory_space<vmem>>, %arg16: memref<1x64xf32, #tpu.memory_space<vmem>>, %arg17: memref<192x64xbf16, #tpu.memory_space<vmem>>, %arg18: memref<1x64xf32, #tpu.memory_space<vmem>>, %arg19: memref<1x64xf32, #tpu.memory_space<vmem>>, %arg20: memref<256x64xbf16, #tpu.memory_space<vmem>>, %arg21: memref<1x64xf32, #tpu.memory_space<vmem>>, %arg22: memref<64x32xbf16, #tpu.memory_space<vmem>>, %arg23: memref<1x32xf32, #tpu.memory_space<vmem>>, %arg24: memref<1x4x32xf32, #tpu.memory_space<vmem>>, %arg25: memref<4x17x32xf32, #tpu.memory_space<vmem>>, %arg26: memref<32x64xf32, #tpu.memory_space<vmem>>) attributes {dimension_semantics = [#tpu.dimension_semantics<parallel>], iteration_bounds = array<i64: 1>, scalar_prefetch = 0 : i64, scratch_operands = 2 : i64, tpu.core_type = #tpu.core_type<tc>, window_params = [{transform_indices = @transform_0, window_bounds = array<i64: 4, 16, 1>}, {pipeline_mode = #tpu.pipeline_mode<synchronous>, transform_indices = @transform_1, window_bounds = array<i64: 3, 32>}, {pipeline_mode = #tpu.pipeline_mode<synchronous>, transform_indices = @transform_2, window_bounds = array<i64: 1, 32>}, {pipeline_mode = #tpu.pipeline_mode<synchronous>, transform_indices = @transform_3, window_bounds = array<i64: 1, 32>}, {pipeline_mode = #tpu.pipeline_mode<synchronous>, transform_indices = @transform_4, window_bounds = array<i64: 96, 32>}, {pipeline_mode = #tpu.pipeline_mode<synchronous>, transform_indices = @transform_5, window_bounds = array<i64: 1, 32>}, {pipeline_mode = #tpu.pipeline_mode<synchronous>, transform_indices = @transform_6, window_bounds = array<i64: 1, 32>}, {pipeline_mode = #tpu.pipeline_mode<synchronous>, transform_indices = @transform_7, window_bounds = array<i64: 96, 32>}, {pipeline_mode = #tpu.pipeline_mode<synchronous>, transform_indices = @transform_8, window_bounds = array<i64: 1, 32>}, {pipeline_mode = #tpu.pipeline_mode<synchronous>, transform_indices = @transform_9, window_bounds = array<i64: 1, 32>}, {pipeline_mode = #tpu.pipeline_mode<synchronous>, transform_indices = @transform_10, window_bounds = array<i64: 96, 64>}, {pipeline_mode = #tpu.pipeline_mode<synchronous>, transform_indices = @transform_11, window_bounds = array<i64: 1, 64>}, {pipeline_mode = #tpu.pipeline_mode<synchronous>, transform_indices = @transform_12, window_bounds = array<i64: 1, 64>}, {pipeline_mode = #tpu.pipeline_mode<synchronous>, transform_indices = @transform_13, window_bounds = array<i64: 192, 64>}, {pipeline_mode = #tpu.pipeline_mode<synchronous>, transform_indices = @transform_14, window_bounds = array<i64: 1, 64>}, {pipeline_mode = #tpu.pipeline_mode<synchronous>, transform_indices = @transform_15, window_bounds = array<i64: 1, 64>}, {pipeline_mode = #tpu.pipeline_mode<synchronous>, transform_indices = @transform_16, window_bounds = array<i64: 192, 64>}, {pipeline_mode = #tpu.pipeline_mode<synchronous>, transform_indices = @transform_17, window_bounds = array<i64: 1, 64>}, {pipeline_mode = #tpu.pipeline_mode<synchronous>, transform_indices = @transform_18, window_bounds = array<i64: 1, 64>}, {pipeline_mode = #tpu.pipeline_mode<synchronous>, transform_indices = @transform_19, window_bounds = array<i64: 256, 64>}, {pipeline_mode = #tpu.pipeline_mode<synchronous>, transform_indices = @transform_20, window_bounds = array<i64: 1, 64>}, {pipeline_mode = #tpu.pipeline_mode<synchronous>, transform_indices = @transform_21, window_bounds = array<i64: 64, 32>}, {pipeline_mode = #tpu.pipeline_mode<synchronous>, transform_indices = @transform_22, window_bounds = array<i64: 1, 32>}, {transform_indices = @transform_23, window_bounds = array<i64: 1, 4, 32>}]} {
    %c0 = arith.constant 0 : index
    %c0_0 = arith.constant 0 : index
    %c0_1 = arith.constant 0 : index
    %0 = vector.load %arg1[%c0, %c0_0, %c0_1] : memref<4x16x1xf32, #tpu.memory_space<vmem>>, vector<4x16x1xf32>
    %cst = arith.constant 0.000000e+00 : f32
    %1 = vector.broadcast %cst : f32 to vector<4x1x1xf32>
    %2 = vector.extract_strided_slice %0 {offsets = [0, 0, 0], sizes = [4, 15, 1], strides = [1, 1, 1]} : vector<4x16x1xf32> to vector<4x15x1xf32>
    %3 = tpu.concatenate %1, %2 in 1 : vector<4x1x1xf32>, vector<4x15x1xf32> -> vector<4x16x1xf32>
    %4 = vector.extract_strided_slice %0 {offsets = [0, 1, 0], sizes = [4, 15, 1], strides = [1, 1, 1]} : vector<4x16x1xf32> to vector<4x15x1xf32>
    %5 = tpu.concatenate %4, %1 in 1 : vector<4x15x1xf32>, vector<4x1x1xf32> -> vector<4x16x1xf32>
    %c0_2 = arith.constant 0 : index
    %c0_3 = arith.constant 0 : index
    %6 = vector.load %arg2[%c0_2, %c0_3] : memref<3x32xf32, #tpu.memory_space<vmem>>, vector<1x32xf32>
    %7 = vector.shape_cast %6 : vector<1x32xf32> to vector<1x1x32xf32>
    %8 = vector.broadcast %3 : vector<4x16x1xf32> to vector<4x16x32xf32>
    %9 = vector.broadcast %7 : vector<1x1x32xf32> to vector<4x16x32xf32>
    %10 = arith.mulf %8, %9 : vector<4x16x32xf32>
    %c1 = arith.constant 1 : index
    %c0_4 = arith.constant 0 : index
    %11 = vector.load %arg2[%c1, %c0_4] : memref<3x32xf32, #tpu.memory_space<vmem>>, vector<1x32xf32>
    %12 = vector.shape_cast %11 : vector<1x32xf32> to vector<1x1x32xf32>
    %13 = vector.broadcast %0 : vector<4x16x1xf32> to vector<4x16x32xf32>
    %14 = vector.broadcast %12 : vector<1x1x32xf32> to vector<4x16x32xf32>
    %15 = arith.mulf %13, %14 : vector<4x16x32xf32>
    %16 = arith.addf %10, %15 : vector<4x16x32xf32>
    %c2 = arith.constant 2 : index
    %c0_5 = arith.constant 0 : index
    %17 = vector.load %arg2[%c2, %c0_5] : memref<3x32xf32, #tpu.memory_space<vmem>>, vector<1x32xf32>
    %18 = vector.shape_cast %17 : vector<1x32xf32> to vector<1x1x32xf32>
    %19 = vector.broadcast %5 : vector<4x16x1xf32> to vector<4x16x32xf32>
    %20 = vector.broadcast %18 : vector<1x1x32xf32> to vector<4x16x32xf32>
    %21 = arith.mulf %19, %20 : vector<4x16x32xf32>
    %22 = arith.addf %16, %21 : vector<4x16x32xf32>
    %c0_6 = arith.constant 0 : index
    %c0_7 = arith.constant 0 : index
    %23 = vector.load %arg3[%c0_6, %c0_7] : memref<1x32xf32, #tpu.memory_space<vmem>>, vector<1x32xf32>
    %24 = vector.shape_cast %23 : vector<1x32xf32> to vector<1x1x32xf32>
    %25 = vector.broadcast %24 : vector<1x1x32xf32> to vector<4x16x32xf32>
    %26 = arith.mulf %22, %25 : vector<4x16x32xf32>
    %c0_8 = arith.constant 0 : index
    %c0_9 = arith.constant 0 : index
    %27 = vector.load %arg4[%c0_8, %c0_9] : memref<1x32xf32, #tpu.memory_space<vmem>>, vector<1x32xf32>
    %28 = vector.shape_cast %27 : vector<1x32xf32> to vector<1x1x32xf32>
    %29 = vector.broadcast %28 : vector<1x1x32xf32> to vector<4x16x32xf32>
    %30 = arith.addf %26, %29 : vector<4x16x32xf32>
    %cst_10 = arith.constant 0.000000e+00 : f32
    %31 = vector.broadcast %cst_10 : f32 to vector<4x16x32xf32>
    %32 = arith.maximumf %30, %31 : vector<4x16x32xf32>
    %cst_11 = arith.constant 0.000000e+00 : f32
    %33 = vector.broadcast %cst_11 : f32 to vector<4x1x32xf32>
    %34 = vector.extract_strided_slice %32 {offsets = [0, 0, 0], sizes = [4, 15, 32], strides = [1, 1, 1]} : vector<4x16x32xf32> to vector<4x15x32xf32>
    %35 = tpu.concatenate %33, %34 in 1 : vector<4x1x32xf32>, vector<4x15x32xf32> -> vector<4x16x32xf32>
    %36 = vector.extract_strided_slice %32 {offsets = [0, 1, 0], sizes = [4, 15, 32], strides = [1, 1, 1]} : vector<4x16x32xf32> to vector<4x15x32xf32>
    %37 = tpu.concatenate %36, %33 in 1 : vector<4x15x32xf32>, vector<4x1x32xf32> -> vector<4x16x32xf32>
    %38 = vector.shape_cast %35 : vector<4x16x32xf32> to vector<64x32xf32>
    %39 = arith.truncf %38 : vector<64x32xf32> to vector<64x32xbf16>
    %c0_12 = arith.constant 0 : index
    %c0_13 = arith.constant 0 : index
    %40 = vector.load %arg5[%c0_12, %c0_13] : memref<96x32xbf16, #tpu.memory_space<vmem>>, vector<32x32xbf16>
    %cst_14 = arith.constant dense<0.000000e+00> : vector<64x32xf32>
    %41 = tpu.matmul %39, %40, %cst_14 {dimension_numbers = #tpu.dot_dimension_numbers<[1], [0], [0], [1], [0, 0, 1, 1], [], []>} : vector<64x32xbf16>, vector<32x32xbf16>, vector<64x32xf32> -> vector<64x32xf32>
    %42 = vector.shape_cast %32 : vector<4x16x32xf32> to vector<64x32xf32>
    %43 = arith.truncf %42 : vector<64x32xf32> to vector<64x32xbf16>
    %c32 = arith.constant 32 : index
    %c0_15 = arith.constant 0 : index
    %44 = vector.load %arg5[%c32, %c0_15] : memref<96x32xbf16, #tpu.memory_space<vmem>>, vector<32x32xbf16>
    %cst_16 = arith.constant dense<0.000000e+00> : vector<64x32xf32>
    %45 = tpu.matmul %43, %44, %cst_16 {dimension_numbers = #tpu.dot_dimension_numbers<[1], [0], [0], [1], [0, 0, 1, 1], [], []>} : vector<64x32xbf16>, vector<32x32xbf16>, vector<64x32xf32> -> vector<64x32xf32>
    %46 = arith.addf %41, %45 : vector<64x32xf32>
    %47 = vector.shape_cast %37 : vector<4x16x32xf32> to vector<64x32xf32>
    %48 = arith.truncf %47 : vector<64x32xf32> to vector<64x32xbf16>
    %c64 = arith.constant 64 : index
    %c0_17 = arith.constant 0 : index
    %49 = vector.load %arg5[%c64, %c0_17] : memref<96x32xbf16, #tpu.memory_space<vmem>>, vector<32x32xbf16>
    %cst_18 = arith.constant dense<0.000000e+00> : vector<64x32xf32>
    %50 = tpu.matmul %48, %49, %cst_18 {dimension_numbers = #tpu.dot_dimension_numbers<[1], [0], [0], [1], [0, 0, 1, 1], [], []>} : vector<64x32xbf16>, vector<32x32xbf16>, vector<64x32xf32> -> vector<64x32xf32>
    %51 = arith.addf %46, %50 : vector<64x32xf32>
    %c0_19 = arith.constant 0 : index
    %c0_20 = arith.constant 0 : index
    %52 = vector.load %arg6[%c0_19, %c0_20] : memref<1x32xf32, #tpu.memory_space<vmem>>, vector<1x32xf32>
    %53 = vector.broadcast %52 : vector<1x32xf32> to vector<64x32xf32>
    %54 = arith.mulf %51, %53 : vector<64x32xf32>
    %c0_21 = arith.constant 0 : index
    %c0_22 = arith.constant 0 : index
    %55 = vector.load %arg7[%c0_21, %c0_22] : memref<1x32xf32, #tpu.memory_space<vmem>>, vector<1x32xf32>
    %56 = vector.broadcast %55 : vector<1x32xf32> to vector<64x32xf32>
    %57 = arith.addf %54, %56 : vector<64x32xf32>
    %cst_23 = arith.constant 0.000000e+00 : f32
    %58 = vector.broadcast %cst_23 : f32 to vector<64x32xf32>
    %59 = arith.maximumf %57, %58 : vector<64x32xf32>
    %60 = vector.shape_cast %59 : vector<64x32xf32> to vector<4x16x32xf32>
    %cst_24 = arith.constant 0.000000e+00 : f32
    %61 = vector.broadcast %cst_24 : f32 to vector<4x1x32xf32>
    %62 = vector.extract_strided_slice %60 {offsets = [0, 0, 0], sizes = [4, 15, 32], strides = [1, 1, 1]} : vector<4x16x32xf32> to vector<4x15x32xf32>
    %63 = tpu.concatenate %61, %62 in 1 : vector<4x1x32xf32>, vector<4x15x32xf32> -> vector<4x16x32xf32>
    %64 = vector.extract_strided_slice %60 {offsets = [0, 1, 0], sizes = [4, 15, 32], strides = [1, 1, 1]} : vector<4x16x32xf32> to vector<4x15x32xf32>
    %65 = tpu.concatenate %64, %61 in 1 : vector<4x15x32xf32>, vector<4x1x32xf32> -> vector<4x16x32xf32>
    %66 = vector.shape_cast %63 : vector<4x16x32xf32> to vector<64x32xf32>
    %67 = arith.truncf %66 : vector<64x32xf32> to vector<64x32xbf16>
    %c0_25 = arith.constant 0 : index
    %c0_26 = arith.constant 0 : index
    %68 = vector.load %arg8[%c0_25, %c0_26] : memref<96x32xbf16, #tpu.memory_space<vmem>>, vector<32x32xbf16>
    %cst_27 = arith.constant dense<0.000000e+00> : vector<64x32xf32>
    %69 = tpu.matmul %67, %68, %cst_27 {dimension_numbers = #tpu.dot_dimension_numbers<[1], [0], [0], [1], [0, 0, 1, 1], [], []>} : vector<64x32xbf16>, vector<32x32xbf16>, vector<64x32xf32> -> vector<64x32xf32>
    %70 = vector.shape_cast %60 : vector<4x16x32xf32> to vector<64x32xf32>
    %71 = arith.truncf %70 : vector<64x32xf32> to vector<64x32xbf16>
    %c32_28 = arith.constant 32 : index
    %c0_29 = arith.constant 0 : index
    %72 = vector.load %arg8[%c32_28, %c0_29] : memref<96x32xbf16, #tpu.memory_space<vmem>>, vector<32x32xbf16>
    %cst_30 = arith.constant dense<0.000000e+00> : vector<64x32xf32>
    %73 = tpu.matmul %71, %72, %cst_30 {dimension_numbers = #tpu.dot_dimension_numbers<[1], [0], [0], [1], [0, 0, 1, 1], [], []>} : vector<64x32xbf16>, vector<32x32xbf16>, vector<64x32xf32> -> vector<64x32xf32>
    %74 = arith.addf %69, %73 : vector<64x32xf32>
    %75 = vector.shape_cast %65 : vector<4x16x32xf32> to vector<64x32xf32>
    %76 = arith.truncf %75 : vector<64x32xf32> to vector<64x32xbf16>
    %c64_31 = arith.constant 64 : index
    %c0_32 = arith.constant 0 : index
    %77 = vector.load %arg8[%c64_31, %c0_32] : memref<96x32xbf16, #tpu.memory_space<vmem>>, vector<32x32xbf16>
    %cst_33 = arith.constant dense<0.000000e+00> : vector<64x32xf32>
    %78 = tpu.matmul %76, %77, %cst_33 {dimension_numbers = #tpu.dot_dimension_numbers<[1], [0], [0], [1], [0, 0, 1, 1], [], []>} : vector<64x32xbf16>, vector<32x32xbf16>, vector<64x32xf32> -> vector<64x32xf32>
    %79 = arith.addf %74, %78 : vector<64x32xf32>
    %c0_34 = arith.constant 0 : index
    %c0_35 = arith.constant 0 : index
    %80 = vector.load %arg9[%c0_34, %c0_35] : memref<1x32xf32, #tpu.memory_space<vmem>>, vector<1x32xf32>
    %81 = vector.broadcast %80 : vector<1x32xf32> to vector<64x32xf32>
    %82 = arith.mulf %79, %81 : vector<64x32xf32>
    %c0_36 = arith.constant 0 : index
    %c0_37 = arith.constant 0 : index
    %83 = vector.load %arg10[%c0_36, %c0_37] : memref<1x32xf32, #tpu.memory_space<vmem>>, vector<1x32xf32>
    %84 = vector.broadcast %83 : vector<1x32xf32> to vector<64x32xf32>
    %85 = arith.addf %82, %84 : vector<64x32xf32>
    %86 = vector.shape_cast %85 : vector<64x32xf32> to vector<4x16x32xf32>
    %cst_38 = arith.constant 3.000000e+00 : f32
    %87 = vector.broadcast %cst_38 : f32 to vector<4x16x32xf32>
    %88 = arith.divf %86, %87 : vector<4x16x32xf32>
    %89 = arith.addf %32, %88 : vector<4x16x32xf32>
    %cst_39 = arith.constant 0.000000e+00 : f32
    %90 = vector.broadcast %cst_39 : f32 to vector<4x1x32xf32>
    %91 = vector.extract_strided_slice %89 {offsets = [0, 0, 0], sizes = [4, 15, 32], strides = [1, 1, 1]} : vector<4x16x32xf32> to vector<4x15x32xf32>
    %92 = tpu.concatenate %90, %91 in 1 : vector<4x1x32xf32>, vector<4x15x32xf32> -> vector<4x16x32xf32>
    %93 = vector.extract_strided_slice %89 {offsets = [0, 1, 0], sizes = [4, 15, 32], strides = [1, 1, 1]} : vector<4x16x32xf32> to vector<4x15x32xf32>
    %94 = tpu.concatenate %93, %90 in 1 : vector<4x15x32xf32>, vector<4x1x32xf32> -> vector<4x16x32xf32>
    %95 = vector.shape_cast %92 : vector<4x16x32xf32> to vector<64x32xf32>
    %96 = arith.truncf %95 : vector<64x32xf32> to vector<64x32xbf16>
    %c0_40 = arith.constant 0 : index
    %c0_41 = arith.constant 0 : index
    %97 = vector.load %arg5[%c0_40, %c0_41] : memref<96x32xbf16, #tpu.memory_space<vmem>>, vector<32x32xbf16>
    %cst_42 = arith.constant dense<0.000000e+00> : vector<64x32xf32>
    %98 = tpu.matmul %96, %97, %cst_42 {dimension_numbers = #tpu.dot_dimension_numbers<[1], [0], [0], [1], [0, 0, 1, 1], [], []>} : vector<64x32xbf16>, vector<32x32xbf16>, vector<64x32xf32> -> vector<64x32xf32>
    %99 = vector.shape_cast %89 : vector<4x16x32xf32> to vector<64x32xf32>
    %100 = arith.truncf %99 : vector<64x32xf32> to vector<64x32xbf16>
    %c32_43 = arith.constant 32 : index
    %c0_44 = arith.constant 0 : index
    %101 = vector.load %arg5[%c32_43, %c0_44] : memref<96x32xbf16, #tpu.memory_space<vmem>>, vector<32x32xbf16>
    %cst_45 = arith.constant dense<0.000000e+00> : vector<64x32xf32>
    %102 = tpu.matmul %100, %101, %cst_45 {dimension_numbers = #tpu.dot_dimension_numbers<[1], [0], [0], [1], [0, 0, 1, 1], [], []>} : vector<64x32xbf16>, vector<32x32xbf16>, vector<64x32xf32> -> vector<64x32xf32>
    %103 = arith.addf %98, %102 : vector<64x32xf32>
    %104 = vector.shape_cast %94 : vector<4x16x32xf32> to vector<64x32xf32>
    %105 = arith.truncf %104 : vector<64x32xf32> to vector<64x32xbf16>
    %c64_46 = arith.constant 64 : index
    %c0_47 = arith.constant 0 : index
    %106 = vector.load %arg5[%c64_46, %c0_47] : memref<96x32xbf16, #tpu.memory_space<vmem>>, vector<32x32xbf16>
    %cst_48 = arith.constant dense<0.000000e+00> : vector<64x32xf32>
    %107 = tpu.matmul %105, %106, %cst_48 {dimension_numbers = #tpu.dot_dimension_numbers<[1], [0], [0], [1], [0, 0, 1, 1], [], []>} : vector<64x32xbf16>, vector<32x32xbf16>, vector<64x32xf32> -> vector<64x32xf32>
    %108 = arith.addf %103, %107 : vector<64x32xf32>
    %c0_49 = arith.constant 0 : index
    %c0_50 = arith.constant 0 : index
    %109 = vector.load %arg6[%c0_49, %c0_50] : memref<1x32xf32, #tpu.memory_space<vmem>>, vector<1x32xf32>
    %110 = vector.broadcast %109 : vector<1x32xf32> to vector<64x32xf32>
    %111 = arith.mulf %108, %110 : vector<64x32xf32>
    %c0_51 = arith.constant 0 : index
    %c0_52 = arith.constant 0 : index
    %112 = vector.load %arg7[%c0_51, %c0_52] : memref<1x32xf32, #tpu.memory_space<vmem>>, vector<1x32xf32>
    %113 = vector.broadcast %112 : vector<1x32xf32> to vector<64x32xf32>
    %114 = arith.addf %111, %113 : vector<64x32xf32>
    %cst_53 = arith.constant 0.000000e+00 : f32
    %115 = vector.broadcast %cst_53 : f32 to vector<64x32xf32>
    %116 = arith.maximumf %114, %115 : vector<64x32xf32>
    %117 = vector.shape_cast %116 : vector<64x32xf32> to vector<4x16x32xf32>
    %cst_54 = arith.constant 0.000000e+00 : f32
    %118 = vector.broadcast %cst_54 : f32 to vector<4x1x32xf32>
    %119 = vector.extract_strided_slice %117 {offsets = [0, 0, 0], sizes = [4, 15, 32], strides = [1, 1, 1]} : vector<4x16x32xf32> to vector<4x15x32xf32>
    %120 = tpu.concatenate %118, %119 in 1 : vector<4x1x32xf32>, vector<4x15x32xf32> -> vector<4x16x32xf32>
    %121 = vector.extract_strided_slice %117 {offsets = [0, 1, 0], sizes = [4, 15, 32], strides = [1, 1, 1]} : vector<4x16x32xf32> to vector<4x15x32xf32>
    %122 = tpu.concatenate %121, %118 in 1 : vector<4x15x32xf32>, vector<4x1x32xf32> -> vector<4x16x32xf32>
    %123 = vector.shape_cast %120 : vector<4x16x32xf32> to vector<64x32xf32>
    %124 = arith.truncf %123 : vector<64x32xf32> to vector<64x32xbf16>
    %c0_55 = arith.constant 0 : index
    %c0_56 = arith.constant 0 : index
    %125 = vector.load %arg8[%c0_55, %c0_56] : memref<96x32xbf16, #tpu.memory_space<vmem>>, vector<32x32xbf16>
    %cst_57 = arith.constant dense<0.000000e+00> : vector<64x32xf32>
    %126 = tpu.matmul %124, %125, %cst_57 {dimension_numbers = #tpu.dot_dimension_numbers<[1], [0], [0], [1], [0, 0, 1, 1], [], []>} : vector<64x32xbf16>, vector<32x32xbf16>, vector<64x32xf32> -> vector<64x32xf32>
    %127 = vector.shape_cast %117 : vector<4x16x32xf32> to vector<64x32xf32>
    %128 = arith.truncf %127 : vector<64x32xf32> to vector<64x32xbf16>
    %c32_58 = arith.constant 32 : index
    %c0_59 = arith.constant 0 : index
    %129 = vector.load %arg8[%c32_58, %c0_59] : memref<96x32xbf16, #tpu.memory_space<vmem>>, vector<32x32xbf16>
    %cst_60 = arith.constant dense<0.000000e+00> : vector<64x32xf32>
    %130 = tpu.matmul %128, %129, %cst_60 {dimension_numbers = #tpu.dot_dimension_numbers<[1], [0], [0], [1], [0, 0, 1, 1], [], []>} : vector<64x32xbf16>, vector<32x32xbf16>, vector<64x32xf32> -> vector<64x32xf32>
    %131 = arith.addf %126, %130 : vector<64x32xf32>
    %132 = vector.shape_cast %122 : vector<4x16x32xf32> to vector<64x32xf32>
    %133 = arith.truncf %132 : vector<64x32xf32> to vector<64x32xbf16>
    %c64_61 = arith.constant 64 : index
    %c0_62 = arith.constant 0 : index
    %134 = vector.load %arg8[%c64_61, %c0_62] : memref<96x32xbf16, #tpu.memory_space<vmem>>, vector<32x32xbf16>
    %cst_63 = arith.constant dense<0.000000e+00> : vector<64x32xf32>
    %135 = tpu.matmul %133, %134, %cst_63 {dimension_numbers = #tpu.dot_dimension_numbers<[1], [0], [0], [1], [0, 0, 1, 1], [], []>} : vector<64x32xbf16>, vector<32x32xbf16>, vector<64x32xf32> -> vector<64x32xf32>
    %136 = arith.addf %131, %135 : vector<64x32xf32>
    %c0_64 = arith.constant 0 : index
    %c0_65 = arith.constant 0 : index
    %137 = vector.load %arg9[%c0_64, %c0_65] : memref<1x32xf32, #tpu.memory_space<vmem>>, vector<1x32xf32>
    %138 = vector.broadcast %137 : vector<1x32xf32> to vector<64x32xf32>
    %139 = arith.mulf %136, %138 : vector<64x32xf32>
    %c0_66 = arith.constant 0 : index
    %c0_67 = arith.constant 0 : index
    %140 = vector.load %arg10[%c0_66, %c0_67] : memref<1x32xf32, #tpu.memory_space<vmem>>, vector<1x32xf32>
    %141 = vector.broadcast %140 : vector<1x32xf32> to vector<64x32xf32>
    %142 = arith.addf %139, %141 : vector<64x32xf32>
    %143 = vector.shape_cast %142 : vector<64x32xf32> to vector<4x16x32xf32>
    %cst_68 = arith.constant 3.000000e+00 : f32
    %144 = vector.broadcast %cst_68 : f32 to vector<4x16x32xf32>
    %145 = arith.divf %86, %144 : vector<4x16x32xf32>
    %146 = arith.subf %143, %145 : vector<4x16x32xf32>
    %147 = arith.addf %32, %146 : vector<4x16x32xf32>
    %cst_69 = arith.constant 0.000000e+00 : f32
    %148 = vector.broadcast %cst_69 : f32 to vector<4x1x32xf32>
    %149 = vector.extract_strided_slice %147 {offsets = [0, 0, 0], sizes = [4, 15, 32], strides = [1, 1, 1]} : vector<4x16x32xf32> to vector<4x15x32xf32>
    %150 = tpu.concatenate %148, %149 in 1 : vector<4x1x32xf32>, vector<4x15x32xf32> -> vector<4x16x32xf32>
    %151 = vector.extract_strided_slice %147 {offsets = [0, 1, 0], sizes = [4, 15, 32], strides = [1, 1, 1]} : vector<4x16x32xf32> to vector<4x15x32xf32>
    %152 = tpu.concatenate %151, %148 in 1 : vector<4x15x32xf32>, vector<4x1x32xf32> -> vector<4x16x32xf32>
    %153 = vector.shape_cast %150 : vector<4x16x32xf32> to vector<64x32xf32>
    %154 = arith.truncf %153 : vector<64x32xf32> to vector<64x32xbf16>
    %c0_70 = arith.constant 0 : index
    %c0_71 = arith.constant 0 : index
    %155 = vector.load %arg5[%c0_70, %c0_71] : memref<96x32xbf16, #tpu.memory_space<vmem>>, vector<32x32xbf16>
    %cst_72 = arith.constant dense<0.000000e+00> : vector<64x32xf32>
    %156 = tpu.matmul %154, %155, %cst_72 {dimension_numbers = #tpu.dot_dimension_numbers<[1], [0], [0], [1], [0, 0, 1, 1], [], []>} : vector<64x32xbf16>, vector<32x32xbf16>, vector<64x32xf32> -> vector<64x32xf32>
    %157 = vector.shape_cast %147 : vector<4x16x32xf32> to vector<64x32xf32>
    %158 = arith.truncf %157 : vector<64x32xf32> to vector<64x32xbf16>
    %c32_73 = arith.constant 32 : index
    %c0_74 = arith.constant 0 : index
    %159 = vector.load %arg5[%c32_73, %c0_74] : memref<96x32xbf16, #tpu.memory_space<vmem>>, vector<32x32xbf16>
    %cst_75 = arith.constant dense<0.000000e+00> : vector<64x32xf32>
    %160 = tpu.matmul %158, %159, %cst_75 {dimension_numbers = #tpu.dot_dimension_numbers<[1], [0], [0], [1], [0, 0, 1, 1], [], []>} : vector<64x32xbf16>, vector<32x32xbf16>, vector<64x32xf32> -> vector<64x32xf32>
    %161 = arith.addf %156, %160 : vector<64x32xf32>
    %162 = vector.shape_cast %152 : vector<4x16x32xf32> to vector<64x32xf32>
    %163 = arith.truncf %162 : vector<64x32xf32> to vector<64x32xbf16>
    %c64_76 = arith.constant 64 : index
    %c0_77 = arith.constant 0 : index
    %164 = vector.load %arg5[%c64_76, %c0_77] : memref<96x32xbf16, #tpu.memory_space<vmem>>, vector<32x32xbf16>
    %cst_78 = arith.constant dense<0.000000e+00> : vector<64x32xf32>
    %165 = tpu.matmul %163, %164, %cst_78 {dimension_numbers = #tpu.dot_dimension_numbers<[1], [0], [0], [1], [0, 0, 1, 1], [], []>} : vector<64x32xbf16>, vector<32x32xbf16>, vector<64x32xf32> -> vector<64x32xf32>
    %166 = arith.addf %161, %165 : vector<64x32xf32>
    %c0_79 = arith.constant 0 : index
    %c0_80 = arith.constant 0 : index
    %167 = vector.load %arg6[%c0_79, %c0_80] : memref<1x32xf32, #tpu.memory_space<vmem>>, vector<1x32xf32>
    %168 = vector.broadcast %167 : vector<1x32xf32> to vector<64x32xf32>
    %169 = arith.mulf %166, %168 : vector<64x32xf32>
    %c0_81 = arith.constant 0 : index
    %c0_82 = arith.constant 0 : index
    %170 = vector.load %arg7[%c0_81, %c0_82] : memref<1x32xf32, #tpu.memory_space<vmem>>, vector<1x32xf32>
    %171 = vector.broadcast %170 : vector<1x32xf32> to vector<64x32xf32>
    %172 = arith.addf %169, %171 : vector<64x32xf32>
    %cst_83 = arith.constant 0.000000e+00 : f32
    %173 = vector.broadcast %cst_83 : f32 to vector<64x32xf32>
    %174 = arith.maximumf %172, %173 : vector<64x32xf32>
    %175 = vector.shape_cast %174 : vector<64x32xf32> to vector<4x16x32xf32>
    %cst_84 = arith.constant 0.000000e+00 : f32
    %176 = vector.broadcast %cst_84 : f32 to vector<4x1x32xf32>
    %177 = vector.extract_strided_slice %175 {offsets = [0, 0, 0], sizes = [4, 15, 32], strides = [1, 1, 1]} : vector<4x16x32xf32> to vector<4x15x32xf32>
    %178 = tpu.concatenate %176, %177 in 1 : vector<4x1x32xf32>, vector<4x15x32xf32> -> vector<4x16x32xf32>
    %179 = vector.extract_strided_slice %175 {offsets = [0, 1, 0], sizes = [4, 15, 32], strides = [1, 1, 1]} : vector<4x16x32xf32> to vector<4x15x32xf32>
    %180 = tpu.concatenate %179, %176 in 1 : vector<4x15x32xf32>, vector<4x1x32xf32> -> vector<4x16x32xf32>
    %181 = vector.shape_cast %178 : vector<4x16x32xf32> to vector<64x32xf32>
    %182 = arith.truncf %181 : vector<64x32xf32> to vector<64x32xbf16>
    %c0_85 = arith.constant 0 : index
    %c0_86 = arith.constant 0 : index
    %183 = vector.load %arg8[%c0_85, %c0_86] : memref<96x32xbf16, #tpu.memory_space<vmem>>, vector<32x32xbf16>
    %cst_87 = arith.constant dense<0.000000e+00> : vector<64x32xf32>
    %184 = tpu.matmul %182, %183, %cst_87 {dimension_numbers = #tpu.dot_dimension_numbers<[1], [0], [0], [1], [0, 0, 1, 1], [], []>} : vector<64x32xbf16>, vector<32x32xbf16>, vector<64x32xf32> -> vector<64x32xf32>
    %185 = vector.shape_cast %175 : vector<4x16x32xf32> to vector<64x32xf32>
    %186 = arith.truncf %185 : vector<64x32xf32> to vector<64x32xbf16>
    %c32_88 = arith.constant 32 : index
    %c0_89 = arith.constant 0 : index
    %187 = vector.load %arg8[%c32_88, %c0_89] : memref<96x32xbf16, #tpu.memory_space<vmem>>, vector<32x32xbf16>
    %cst_90 = arith.constant dense<0.000000e+00> : vector<64x32xf32>
    %188 = tpu.matmul %186, %187, %cst_90 {dimension_numbers = #tpu.dot_dimension_numbers<[1], [0], [0], [1], [0, 0, 1, 1], [], []>} : vector<64x32xbf16>, vector<32x32xbf16>, vector<64x32xf32> -> vector<64x32xf32>
    %189 = arith.addf %184, %188 : vector<64x32xf32>
    %190 = vector.shape_cast %180 : vector<4x16x32xf32> to vector<64x32xf32>
    %191 = arith.truncf %190 : vector<64x32xf32> to vector<64x32xbf16>
    %c64_91 = arith.constant 64 : index
    %c0_92 = arith.constant 0 : index
    %192 = vector.load %arg8[%c64_91, %c0_92] : memref<96x32xbf16, #tpu.memory_space<vmem>>, vector<32x32xbf16>
    %cst_93 = arith.constant dense<0.000000e+00> : vector<64x32xf32>
    %193 = tpu.matmul %191, %192, %cst_93 {dimension_numbers = #tpu.dot_dimension_numbers<[1], [0], [0], [1], [0, 0, 1, 1], [], []>} : vector<64x32xbf16>, vector<32x32xbf16>, vector<64x32xf32> -> vector<64x32xf32>
    %194 = arith.addf %189, %193 : vector<64x32xf32>
    %c0_94 = arith.constant 0 : index
    %c0_95 = arith.constant 0 : index
    %195 = vector.load %arg9[%c0_94, %c0_95] : memref<1x32xf32, #tpu.memory_space<vmem>>, vector<1x32xf32>
    %196 = vector.broadcast %195 : vector<1x32xf32> to vector<64x32xf32>
    %197 = arith.mulf %194, %196 : vector<64x32xf32>
    %c0_96 = arith.constant 0 : index
    %c0_97 = arith.constant 0 : index
    %198 = vector.load %arg10[%c0_96, %c0_97] : memref<1x32xf32, #tpu.memory_space<vmem>>, vector<1x32xf32>
    %199 = vector.broadcast %198 : vector<1x32xf32> to vector<64x32xf32>
    %200 = arith.addf %197, %199 : vector<64x32xf32>
    %201 = vector.shape_cast %200 : vector<64x32xf32> to vector<4x16x32xf32>
    %202 = arith.subf %86, %143 : vector<4x16x32xf32>
    %203 = arith.addf %202, %201 : vector<4x16x32xf32>
    %204 = arith.addf %32, %203 : vector<4x16x32xf32>
    %cst_98 = arith.constant 0.000000e+00 : f32
    %205 = vector.broadcast %cst_98 : f32 to vector<4x1x32xf32>
    %206 = vector.extract_strided_slice %204 {offsets = [0, 0, 0], sizes = [4, 15, 32], strides = [1, 1, 1]} : vector<4x16x32xf32> to vector<4x15x32xf32>
    %207 = tpu.concatenate %205, %206 in 1 : vector<4x1x32xf32>, vector<4x15x32xf32> -> vector<4x16x32xf32>
    %208 = vector.extract_strided_slice %204 {offsets = [0, 1, 0], sizes = [4, 15, 32], strides = [1, 1, 1]} : vector<4x16x32xf32> to vector<4x15x32xf32>
    %209 = tpu.concatenate %208, %205 in 1 : vector<4x15x32xf32>, vector<4x1x32xf32> -> vector<4x16x32xf32>
    %210 = vector.shape_cast %207 : vector<4x16x32xf32> to vector<64x32xf32>
    %211 = arith.truncf %210 : vector<64x32xf32> to vector<64x32xbf16>
    %c0_99 = arith.constant 0 : index
    %c0_100 = arith.constant 0 : index
    %212 = vector.load %arg5[%c0_99, %c0_100] : memref<96x32xbf16, #tpu.memory_space<vmem>>, vector<32x32xbf16>
    %cst_101 = arith.constant dense<0.000000e+00> : vector<64x32xf32>
    %213 = tpu.matmul %211, %212, %cst_101 {dimension_numbers = #tpu.dot_dimension_numbers<[1], [0], [0], [1], [0, 0, 1, 1], [], []>} : vector<64x32xbf16>, vector<32x32xbf16>, vector<64x32xf32> -> vector<64x32xf32>
    %214 = vector.shape_cast %204 : vector<4x16x32xf32> to vector<64x32xf32>
    %215 = arith.truncf %214 : vector<64x32xf32> to vector<64x32xbf16>
    %c32_102 = arith.constant 32 : index
    %c0_103 = arith.constant 0 : index
    %216 = vector.load %arg5[%c32_102, %c0_103] : memref<96x32xbf16, #tpu.memory_space<vmem>>, vector<32x32xbf16>
    %cst_104 = arith.constant dense<0.000000e+00> : vector<64x32xf32>
    %217 = tpu.matmul %215, %216, %cst_104 {dimension_numbers = #tpu.dot_dimension_numbers<[1], [0], [0], [1], [0, 0, 1, 1], [], []>} : vector<64x32xbf16>, vector<32x32xbf16>, vector<64x32xf32> -> vector<64x32xf32>
    %218 = arith.addf %213, %217 : vector<64x32xf32>
    %219 = vector.shape_cast %209 : vector<4x16x32xf32> to vector<64x32xf32>
    %220 = arith.truncf %219 : vector<64x32xf32> to vector<64x32xbf16>
    %c64_105 = arith.constant 64 : index
    %c0_106 = arith.constant 0 : index
    %221 = vector.load %arg5[%c64_105, %c0_106] : memref<96x32xbf16, #tpu.memory_space<vmem>>, vector<32x32xbf16>
    %cst_107 = arith.constant dense<0.000000e+00> : vector<64x32xf32>
    %222 = tpu.matmul %220, %221, %cst_107 {dimension_numbers = #tpu.dot_dimension_numbers<[1], [0], [0], [1], [0, 0, 1, 1], [], []>} : vector<64x32xbf16>, vector<32x32xbf16>, vector<64x32xf32> -> vector<64x32xf32>
    %223 = arith.addf %218, %222 : vector<64x32xf32>
    %c0_108 = arith.constant 0 : index
    %c0_109 = arith.constant 0 : index
    %224 = vector.load %arg6[%c0_108, %c0_109] : memref<1x32xf32, #tpu.memory_space<vmem>>, vector<1x32xf32>
    %225 = vector.broadcast %224 : vector<1x32xf32> to vector<64x32xf32>
    %226 = arith.mulf %223, %225 : vector<64x32xf32>
    %c0_110 = arith.constant 0 : index
    %c0_111 = arith.constant 0 : index
    %227 = vector.load %arg7[%c0_110, %c0_111] : memref<1x32xf32, #tpu.memory_space<vmem>>, vector<1x32xf32>
    %228 = vector.broadcast %227 : vector<1x32xf32> to vector<64x32xf32>
    %229 = arith.addf %226, %228 : vector<64x32xf32>
    %cst_112 = arith.constant 0.000000e+00 : f32
    %230 = vector.broadcast %cst_112 : f32 to vector<64x32xf32>
    %231 = arith.maximumf %229, %230 : vector<64x32xf32>
    %232 = vector.shape_cast %231 : vector<64x32xf32> to vector<4x16x32xf32>
    %cst_113 = arith.constant 0.000000e+00 : f32
    %233 = vector.broadcast %cst_113 : f32 to vector<4x1x32xf32>
    %234 = vector.extract_strided_slice %232 {offsets = [0, 0, 0], sizes = [4, 15, 32], strides = [1, 1, 1]} : vector<4x16x32xf32> to vector<4x15x32xf32>
    %235 = tpu.concatenate %233, %234 in 1 : vector<4x1x32xf32>, vector<4x15x32xf32> -> vector<4x16x32xf32>
    %236 = vector.extract_strided_slice %232 {offsets = [0, 1, 0], sizes = [4, 15, 32], strides = [1, 1, 1]} : vector<4x16x32xf32> to vector<4x15x32xf32>
    %237 = tpu.concatenate %236, %233 in 1 : vector<4x15x32xf32>, vector<4x1x32xf32> -> vector<4x16x32xf32>
    %238 = vector.shape_cast %235 : vector<4x16x32xf32> to vector<64x32xf32>
    %239 = arith.truncf %238 : vector<64x32xf32> to vector<64x32xbf16>
    %c0_114 = arith.constant 0 : index
    %c0_115 = arith.constant 0 : index
    %240 = vector.load %arg8[%c0_114, %c0_115] : memref<96x32xbf16, #tpu.memory_space<vmem>>, vector<32x32xbf16>
    %cst_116 = arith.constant dense<0.000000e+00> : vector<64x32xf32>
    %241 = tpu.matmul %239, %240, %cst_116 {dimension_numbers = #tpu.dot_dimension_numbers<[1], [0], [0], [1], [0, 0, 1, 1], [], []>} : vector<64x32xbf16>, vector<32x32xbf16>, vector<64x32xf32> -> vector<64x32xf32>
    %242 = vector.shape_cast %232 : vector<4x16x32xf32> to vector<64x32xf32>
    %243 = arith.truncf %242 : vector<64x32xf32> to vector<64x32xbf16>
    %c32_117 = arith.constant 32 : index
    %c0_118 = arith.constant 0 : index
    %244 = vector.load %arg8[%c32_117, %c0_118] : memref<96x32xbf16, #tpu.memory_space<vmem>>, vector<32x32xbf16>
    %cst_119 = arith.constant dense<0.000000e+00> : vector<64x32xf32>
    %245 = tpu.matmul %243, %244, %cst_119 {dimension_numbers = #tpu.dot_dimension_numbers<[1], [0], [0], [1], [0, 0, 1, 1], [], []>} : vector<64x32xbf16>, vector<32x32xbf16>, vector<64x32xf32> -> vector<64x32xf32>
    %246 = arith.addf %241, %245 : vector<64x32xf32>
    %247 = vector.shape_cast %237 : vector<4x16x32xf32> to vector<64x32xf32>
    %248 = arith.truncf %247 : vector<64x32xf32> to vector<64x32xbf16>
    %c64_120 = arith.constant 64 : index
    %c0_121 = arith.constant 0 : index
    %249 = vector.load %arg8[%c64_120, %c0_121] : memref<96x32xbf16, #tpu.memory_space<vmem>>, vector<32x32xbf16>
    %cst_122 = arith.constant dense<0.000000e+00> : vector<64x32xf32>
    %250 = tpu.matmul %248, %249, %cst_122 {dimension_numbers = #tpu.dot_dimension_numbers<[1], [0], [0], [1], [0, 0, 1, 1], [], []>} : vector<64x32xbf16>, vector<32x32xbf16>, vector<64x32xf32> -> vector<64x32xf32>
    %251 = arith.addf %246, %250 : vector<64x32xf32>
    %c0_123 = arith.constant 0 : index
    %c0_124 = arith.constant 0 : index
    %252 = vector.load %arg9[%c0_123, %c0_124] : memref<1x32xf32, #tpu.memory_space<vmem>>, vector<1x32xf32>
    %253 = vector.broadcast %252 : vector<1x32xf32> to vector<64x32xf32>
    %254 = arith.mulf %251, %253 : vector<64x32xf32>
    %c0_125 = arith.constant 0 : index
    %c0_126 = arith.constant 0 : index
    %255 = vector.load %arg10[%c0_125, %c0_126] : memref<1x32xf32, #tpu.memory_space<vmem>>, vector<1x32xf32>
    %256 = vector.broadcast %255 : vector<1x32xf32> to vector<64x32xf32>
    %257 = arith.addf %254, %256 : vector<64x32xf32>
    %258 = vector.shape_cast %257 : vector<64x32xf32> to vector<4x16x32xf32>
    %259 = arith.addf %143, %201 : vector<4x16x32xf32>
    %cst_127 = arith.constant 3.000000e+00 : f32
    %260 = vector.broadcast %cst_127 : f32 to vector<4x16x32xf32>
    %261 = arith.mulf %260, %259 : vector<4x16x32xf32>
    %262 = arith.addf %86, %261 : vector<4x16x32xf32>
    %263 = arith.addf %262, %258 : vector<4x16x32xf32>
    %cst_128 = arith.constant 1.250000e-01 : f32
    %264 = vector.broadcast %cst_128 : f32 to vector<4x16x32xf32>
    %265 = arith.mulf %263, %264 : vector<4x16x32xf32>
    %266 = arith.addf %32, %265 : vector<4x16x32xf32>
    %cst_129 = arith.constant 0.000000e+00 : f32
    %267 = vector.broadcast %cst_129 : f32 to vector<4x1x32xf32>
    %c0_130 = arith.constant 0 : index
    %c0_131 = arith.constant 0 : index
    %c0_132 = arith.constant 0 : index
    %268 = vector.load %arg25[%c0_130, %c0_131, %c0_132] : memref<4x17x32xf32, #tpu.memory_space<vmem>>, vector<4x1x32xf32>
    tpu.vector_store %arg25[%c0_130, %c0_131, %c0_132], %267 {strides = array<i32>} : memref<4x17x32xf32, #tpu.memory_space<vmem>>, vector<4x1x32xf32>,
    %c0_133 = arith.constant 0 : index
    %c1_134 = arith.constant 1 : index
    %c0_135 = arith.constant 0 : index
    %269 = vector.load %arg25[%c0_133, %c1_134, %c0_135] : memref<4x17x32xf32, #tpu.memory_space<vmem>>, vector<4x16x32xf32>
    tpu.vector_store %arg25[%c0_133, %c1_134, %c0_135], %266 {strides = array<i32>} : memref<4x17x32xf32, #tpu.memory_space<vmem>>, vector<4x16x32xf32>,
    %c0_136 = arith.constant 0 : index
    %c0_137 = arith.constant 0 : index
    %c0_138 = arith.constant 0 : index
    %270 = tpu.strided_load %arg25[%c0_136, %c0_137, %c0_138] {strides = array<i32: 1, 2, 1>} : memref<4x17x32xf32, #tpu.memory_space<vmem>>, vector<4x8x32xf32>
    %c0_139 = arith.constant 0 : index
    %c1_140 = arith.constant 1 : index
    %c0_141 = arith.constant 0 : index
    %271 = tpu.strided_load %arg25[%c0_139, %c1_140, %c0_141] {strides = array<i32: 1, 2, 1>} : memref<4x17x32xf32, #tpu.memory_space<vmem>>, vector<4x8x32xf32>
    %c0_142 = arith.constant 0 : index
    %c2_143 = arith.constant 2 : index
    %c0_144 = arith.constant 0 : index
    %272 = tpu.strided_load %arg25[%c0_142, %c2_143, %c0_144] {strides = array<i32: 1, 2, 1>} : memref<4x17x32xf32, #tpu.memory_space<vmem>>, vector<4x8x32xf32>
    %273 = vector.shape_cast %270 : vector<4x8x32xf32> to vector<32x32xf32>
    %274 = arith.truncf %273 : vector<32x32xf32> to vector<32x32xbf16>
    %c0_145 = arith.constant 0 : index
    %c0_146 = arith.constant 0 : index
    %275 = vector.load %arg11[%c0_145, %c0_146] : memref<96x64xbf16, #tpu.memory_space<vmem>>, vector<32x64xbf16>
    %cst_147 = arith.constant dense<0.000000e+00> : vector<32x64xf32>
    %276 = tpu.matmul %274, %275, %cst_147 {dimension_numbers = #tpu.dot_dimension_numbers<[1], [0], [0], [1], [0, 0, 1, 1], [], []>} : vector<32x32xbf16>, vector<32x64xbf16>, vector<32x64xf32> -> vector<32x64xf32>
    %277 = vector.shape_cast %271 : vector<4x8x32xf32> to vector<32x32xf32>
    %278 = arith.truncf %277 : vector<32x32xf32> to vector<32x32xbf16>
    %c32_148 = arith.constant 32 : index
    %c0_149 = arith.constant 0 : index
    %279 = vector.load %arg11[%c32_148, %c0_149] : memref<96x64xbf16, #tpu.memory_space<vmem>>, vector<32x64xbf16>
    %cst_150 = arith.constant dense<0.000000e+00> : vector<32x64xf32>
    %280 = tpu.matmul %278, %279, %cst_150 {dimension_numbers = #tpu.dot_dimension_numbers<[1], [0], [0], [1], [0, 0, 1, 1], [], []>} : vector<32x32xbf16>, vector<32x64xbf16>, vector<32x64xf32> -> vector<32x64xf32>
    %281 = arith.addf %276, %280 : vector<32x64xf32>
    %282 = vector.shape_cast %272 : vector<4x8x32xf32> to vector<32x32xf32>
    %283 = arith.truncf %282 : vector<32x32xf32> to vector<32x32xbf16>
    %c64_151 = arith.constant 64 : index
    %c0_152 = arith.constant 0 : index
    %284 = vector.load %arg11[%c64_151, %c0_152] : memref<96x64xbf16, #tpu.memory_space<vmem>>, vector<32x64xbf16>
    %cst_153 = arith.constant dense<0.000000e+00> : vector<32x64xf32>
    %285 = tpu.matmul %283, %284, %cst_153 {dimension_numbers = #tpu.dot_dimension_numbers<[1], [0], [0], [1], [0, 0, 1, 1], [], []>} : vector<32x32xbf16>, vector<32x64xbf16>, vector<32x64xf32> -> vector<32x64xf32>
    %286 = arith.addf %281, %285 : vector<32x64xf32>
    %c0_154 = arith.constant 0 : index
    %c0_155 = arith.constant 0 : index
    %287 = vector.load %arg12[%c0_154, %c0_155] : memref<1x64xf32, #tpu.memory_space<vmem>>, vector<1x64xf32>
    %288 = vector.broadcast %287 : vector<1x64xf32> to vector<32x64xf32>
    %289 = arith.mulf %286, %288 : vector<32x64xf32>
    %c0_156 = arith.constant 0 : index
    %c0_157 = arith.constant 0 : index
    %290 = vector.load %arg13[%c0_156, %c0_157] : memref<1x64xf32, #tpu.memory_space<vmem>>, vector<1x64xf32>
    %291 = vector.broadcast %290 : vector<1x64xf32> to vector<32x64xf32>
    %292 = arith.addf %289, %291 : vector<32x64xf32>
    %cst_158 = arith.constant 0.000000e+00 : f32
    %293 = vector.broadcast %cst_158 : f32 to vector<32x64xf32>
    %294 = arith.maximumf %292, %293 : vector<32x64xf32>
    %295 = vector.shape_cast %294 : vector<32x64xf32> to vector<4x8x64xf32>
    %cst_159 = arith.constant 0.000000e+00 : f32
    %296 = vector.broadcast %cst_159 : f32 to vector<4x1x64xf32>
    %297 = vector.extract_strided_slice %295 {offsets = [0, 0, 0], sizes = [4, 7, 64], strides = [1, 1, 1]} : vector<4x8x64xf32> to vector<4x7x64xf32>
    %298 = tpu.concatenate %296, %297 in 1 : vector<4x1x64xf32>, vector<4x7x64xf32> -> vector<4x8x64xf32>
    %299 = vector.extract_strided_slice %295 {offsets = [0, 1, 0], sizes = [4, 7, 64], strides = [1, 1, 1]} : vector<4x8x64xf32> to vector<4x7x64xf32>
    %300 = tpu.concatenate %299, %296 in 1 : vector<4x7x64xf32>, vector<4x1x64xf32> -> vector<4x8x64xf32>
    %301 = vector.shape_cast %298 : vector<4x8x64xf32> to vector<32x64xf32>
    %302 = arith.truncf %301 : vector<32x64xf32> to vector<32x64xbf16>
    %c0_160 = arith.constant 0 : index
    %c0_161 = arith.constant 0 : index
    %303 = vector.load %arg14[%c0_160, %c0_161] : memref<192x64xbf16, #tpu.memory_space<vmem>>, vector<64x64xbf16>
    %cst_162 = arith.constant dense<0.000000e+00> : vector<32x64xf32>
    %304 = tpu.matmul %302, %303, %cst_162 {dimension_numbers = #tpu.dot_dimension_numbers<[1], [0], [0], [1], [0, 0, 1, 1], [], []>} : vector<32x64xbf16>, vector<64x64xbf16>, vector<32x64xf32> -> vector<32x64xf32>
    %305 = vector.shape_cast %295 : vector<4x8x64xf32> to vector<32x64xf32>
    %306 = arith.truncf %305 : vector<32x64xf32> to vector<32x64xbf16>
    %c64_163 = arith.constant 64 : index
    %c0_164 = arith.constant 0 : index
    %307 = vector.load %arg14[%c64_163, %c0_164] : memref<192x64xbf16, #tpu.memory_space<vmem>>, vector<64x64xbf16>
    %cst_165 = arith.constant dense<0.000000e+00> : vector<32x64xf32>
    %308 = tpu.matmul %306, %307, %cst_165 {dimension_numbers = #tpu.dot_dimension_numbers<[1], [0], [0], [1], [0, 0, 1, 1], [], []>} : vector<32x64xbf16>, vector<64x64xbf16>, vector<32x64xf32> -> vector<32x64xf32>
    %309 = arith.addf %304, %308 : vector<32x64xf32>
    %310 = vector.shape_cast %300 : vector<4x8x64xf32> to vector<32x64xf32>
    %311 = arith.truncf %310 : vector<32x64xf32> to vector<32x64xbf16>
    %c128 = arith.constant 128 : index
    %c0_166 = arith.constant 0 : index
    %312 = vector.load %arg14[%c128, %c0_166] : memref<192x64xbf16, #tpu.memory_space<vmem>>, vector<64x64xbf16>
    %cst_167 = arith.constant dense<0.000000e+00> : vector<32x64xf32>
    %313 = tpu.matmul %311, %312, %cst_167 {dimension_numbers = #tpu.dot_dimension_numbers<[1], [0], [0], [1], [0, 0, 1, 1], [], []>} : vector<32x64xbf16>, vector<64x64xbf16>, vector<32x64xf32> -> vector<32x64xf32>
    %314 = arith.addf %309, %313 : vector<32x64xf32>
    %c0_168 = arith.constant 0 : index
    %c0_169 = arith.constant 0 : index
    %315 = vector.load %arg15[%c0_168, %c0_169] : memref<1x64xf32, #tpu.memory_space<vmem>>, vector<1x64xf32>
    %316 = vector.broadcast %315 : vector<1x64xf32> to vector<32x64xf32>
    %317 = arith.mulf %314, %316 : vector<32x64xf32>
    %c0_170 = arith.constant 0 : index
    %c0_171 = arith.constant 0 : index
    %318 = vector.load %arg16[%c0_170, %c0_171] : memref<1x64xf32, #tpu.memory_space<vmem>>, vector<1x64xf32>
    %319 = vector.broadcast %318 : vector<1x64xf32> to vector<32x64xf32>
    %320 = arith.addf %317, %319 : vector<32x64xf32>
    %cst_172 = arith.constant 0.000000e+00 : f32
    %321 = vector.broadcast %cst_172 : f32 to vector<32x64xf32>
    %322 = arith.maximumf %320, %321 : vector<32x64xf32>
    %323 = vector.shape_cast %322 : vector<32x64xf32> to vector<4x8x64xf32>
    %cst_173 = arith.constant 0.000000e+00 : f32
    %324 = vector.broadcast %cst_173 : f32 to vector<4x1x64xf32>
    %325 = vector.extract_strided_slice %323 {offsets = [0, 0, 0], sizes = [4, 7, 64], strides = [1, 1, 1]} : vector<4x8x64xf32> to vector<4x7x64xf32>
    %326 = tpu.concatenate %324, %325 in 1 : vector<4x1x64xf32>, vector<4x7x64xf32> -> vector<4x8x64xf32>
    %327 = vector.extract_strided_slice %323 {offsets = [0, 1, 0], sizes = [4, 7, 64], strides = [1, 1, 1]} : vector<4x8x64xf32> to vector<4x7x64xf32>
    %328 = tpu.concatenate %327, %324 in 1 : vector<4x7x64xf32>, vector<4x1x64xf32> -> vector<4x8x64xf32>
    %329 = vector.shape_cast %326 : vector<4x8x64xf32> to vector<32x64xf32>
    %330 = arith.truncf %329 : vector<32x64xf32> to vector<32x64xbf16>
    %c0_174 = arith.constant 0 : index
    %c0_175 = arith.constant 0 : index
    %331 = vector.load %arg17[%c0_174, %c0_175] : memref<192x64xbf16, #tpu.memory_space<vmem>>, vector<64x64xbf16>
    %cst_176 = arith.constant dense<0.000000e+00> : vector<32x64xf32>
    %332 = tpu.matmul %330, %331, %cst_176 {dimension_numbers = #tpu.dot_dimension_numbers<[1], [0], [0], [1], [0, 0, 1, 1], [], []>} : vector<32x64xbf16>, vector<64x64xbf16>, vector<32x64xf32> -> vector<32x64xf32>
    %333 = vector.shape_cast %323 : vector<4x8x64xf32> to vector<32x64xf32>
    %334 = arith.truncf %333 : vector<32x64xf32> to vector<32x64xbf16>
    %c64_177 = arith.constant 64 : index
    %c0_178 = arith.constant 0 : index
    %335 = vector.load %arg17[%c64_177, %c0_178] : memref<192x64xbf16, #tpu.memory_space<vmem>>, vector<64x64xbf16>
    %cst_179 = arith.constant dense<0.000000e+00> : vector<32x64xf32>
    %336 = tpu.matmul %334, %335, %cst_179 {dimension_numbers = #tpu.dot_dimension_numbers<[1], [0], [0], [1], [0, 0, 1, 1], [], []>} : vector<32x64xbf16>, vector<64x64xbf16>, vector<32x64xf32> -> vector<32x64xf32>
    %337 = arith.addf %332, %336 : vector<32x64xf32>
    %338 = vector.shape_cast %328 : vector<4x8x64xf32> to vector<32x64xf32>
    %339 = arith.truncf %338 : vector<32x64xf32> to vector<32x64xbf16>
    %c128_180 = arith.constant 128 : index
    %c0_181 = arith.constant 0 : index
    %340 = vector.load %arg17[%c128_180, %c0_181] : memref<192x64xbf16, #tpu.memory_space<vmem>>, vector<64x64xbf16>
    %cst_182 = arith.constant dense<0.000000e+00> : vector<32x64xf32>
    %341 = tpu.matmul %339, %340, %cst_182 {dimension_numbers = #tpu.dot_dimension_numbers<[1], [0], [0], [1], [0, 0, 1, 1], [], []>} : vector<32x64xbf16>, vector<64x64xbf16>, vector<32x64xf32> -> vector<32x64xf32>
    %342 = arith.addf %337, %341 : vector<32x64xf32>
    %c0_183 = arith.constant 0 : index
    %c0_184 = arith.constant 0 : index
    %343 = vector.load %arg18[%c0_183, %c0_184] : memref<1x64xf32, #tpu.memory_space<vmem>>, vector<1x64xf32>
    %344 = vector.broadcast %343 : vector<1x64xf32> to vector<32x64xf32>
    %345 = arith.mulf %342, %344 : vector<32x64xf32>
    %c0_185 = arith.constant 0 : index
    %c0_186 = arith.constant 0 : index
    %346 = vector.load %arg19[%c0_185, %c0_186] : memref<1x64xf32, #tpu.memory_space<vmem>>, vector<1x64xf32>
    %347 = vector.broadcast %346 : vector<1x64xf32> to vector<32x64xf32>
    %348 = arith.addf %345, %347 : vector<32x64xf32>
    %349 = vector.shape_cast %348 : vector<32x64xf32> to vector<4x8x64xf32>
    %cst_187 = arith.constant 3.000000e+00 : f32
    %350 = vector.broadcast %cst_187 : f32 to vector<4x8x64xf32>
    %351 = arith.divf %349, %350 : vector<4x8x64xf32>
    %352 = arith.addf %295, %351 : vector<4x8x64xf32>
    %cst_188 = arith.constant 0.000000e+00 : f32
    %353 = vector.broadcast %cst_188 : f32 to vector<4x1x64xf32>
    %354 = vector.extract_strided_slice %352 {offsets = [0, 0, 0], sizes = [4, 7, 64], strides = [1, 1, 1]} : vector<4x8x64xf32> to vector<4x7x64xf32>
    %355 = tpu.concatenate %353, %354 in 1 : vector<4x1x64xf32>, vector<4x7x64xf32> -> vector<4x8x64xf32>
    %356 = vector.extract_strided_slice %352 {offsets = [0, 1, 0], sizes = [4, 7, 64], strides = [1, 1, 1]} : vector<4x8x64xf32> to vector<4x7x64xf32>
    %357 = tpu.concatenate %356, %353 in 1 : vector<4x7x64xf32>, vector<4x1x64xf32> -> vector<4x8x64xf32>
    %358 = vector.shape_cast %355 : vector<4x8x64xf32> to vector<32x64xf32>
    %359 = arith.truncf %358 : vector<32x64xf32> to vector<32x64xbf16>
    %c0_189 = arith.constant 0 : index
    %c0_190 = arith.constant 0 : index
    %360 = vector.load %arg14[%c0_189, %c0_190] : memref<192x64xbf16, #tpu.memory_space<vmem>>, vector<64x64xbf16>
    %cst_191 = arith.constant dense<0.000000e+00> : vector<32x64xf32>
    %361 = tpu.matmul %359, %360, %cst_191 {dimension_numbers = #tpu.dot_dimension_numbers<[1], [0], [0], [1], [0, 0, 1, 1], [], []>} : vector<32x64xbf16>, vector<64x64xbf16>, vector<32x64xf32> -> vector<32x64xf32>
    %362 = vector.shape_cast %352 : vector<4x8x64xf32> to vector<32x64xf32>
    %363 = arith.truncf %362 : vector<32x64xf32> to vector<32x64xbf16>
    %c64_192 = arith.constant 64 : index
    %c0_193 = arith.constant 0 : index
    %364 = vector.load %arg14[%c64_192, %c0_193] : memref<192x64xbf16, #tpu.memory_space<vmem>>, vector<64x64xbf16>
    %cst_194 = arith.constant dense<0.000000e+00> : vector<32x64xf32>
    %365 = tpu.matmul %363, %364, %cst_194 {dimension_numbers = #tpu.dot_dimension_numbers<[1], [0], [0], [1], [0, 0, 1, 1], [], []>} : vector<32x64xbf16>, vector<64x64xbf16>, vector<32x64xf32> -> vector<32x64xf32>
    %366 = arith.addf %361, %365 : vector<32x64xf32>
    %367 = vector.shape_cast %357 : vector<4x8x64xf32> to vector<32x64xf32>
    %368 = arith.truncf %367 : vector<32x64xf32> to vector<32x64xbf16>
    %c128_195 = arith.constant 128 : index
    %c0_196 = arith.constant 0 : index
    %369 = vector.load %arg14[%c128_195, %c0_196] : memref<192x64xbf16, #tpu.memory_space<vmem>>, vector<64x64xbf16>
    %cst_197 = arith.constant dense<0.000000e+00> : vector<32x64xf32>
    %370 = tpu.matmul %368, %369, %cst_197 {dimension_numbers = #tpu.dot_dimension_numbers<[1], [0], [0], [1], [0, 0, 1, 1], [], []>} : vector<32x64xbf16>, vector<64x64xbf16>, vector<32x64xf32> -> vector<32x64xf32>
    %371 = arith.addf %366, %370 : vector<32x64xf32>
    %c0_198 = arith.constant 0 : index
    %c0_199 = arith.constant 0 : index
    %372 = vector.load %arg15[%c0_198, %c0_199] : memref<1x64xf32, #tpu.memory_space<vmem>>, vector<1x64xf32>
    %373 = vector.broadcast %372 : vector<1x64xf32> to vector<32x64xf32>
    %374 = arith.mulf %371, %373 : vector<32x64xf32>
    %c0_200 = arith.constant 0 : index
    %c0_201 = arith.constant 0 : index
    %375 = vector.load %arg16[%c0_200, %c0_201] : memref<1x64xf32, #tpu.memory_space<vmem>>, vector<1x64xf32>
    %376 = vector.broadcast %375 : vector<1x64xf32> to vector<32x64xf32>
    %377 = arith.addf %374, %376 : vector<32x64xf32>
    %cst_202 = arith.constant 0.000000e+00 : f32
    %378 = vector.broadcast %cst_202 : f32 to vector<32x64xf32>
    %379 = arith.maximumf %377, %378 : vector<32x64xf32>
    %380 = vector.shape_cast %379 : vector<32x64xf32> to vector<4x8x64xf32>
    %cst_203 = arith.constant 0.000000e+00 : f32
    %381 = vector.broadcast %cst_203 : f32 to vector<4x1x64xf32>
    %382 = vector.extract_strided_slice %380 {offsets = [0, 0, 0], sizes = [4, 7, 64], strides = [1, 1, 1]} : vector<4x8x64xf32> to vector<4x7x64xf32>
    %383 = tpu.concatenate %381, %382 in 1 : vector<4x1x64xf32>, vector<4x7x64xf32> -> vector<4x8x64xf32>
    %384 = vector.extract_strided_slice %380 {offsets = [0, 1, 0], sizes = [4, 7, 64], strides = [1, 1, 1]} : vector<4x8x64xf32> to vector<4x7x64xf32>
    %385 = tpu.concatenate %384, %381 in 1 : vector<4x7x64xf32>, vector<4x1x64xf32> -> vector<4x8x64xf32>
    %386 = vector.shape_cast %383 : vector<4x8x64xf32> to vector<32x64xf32>
    %387 = arith.truncf %386 : vector<32x64xf32> to vector<32x64xbf16>
    %c0_204 = arith.constant 0 : index
    %c0_205 = arith.constant 0 : index
    %388 = vector.load %arg17[%c0_204, %c0_205] : memref<192x64xbf16, #tpu.memory_space<vmem>>, vector<64x64xbf16>
    %cst_206 = arith.constant dense<0.000000e+00> : vector<32x64xf32>
    %389 = tpu.matmul %387, %388, %cst_206 {dimension_numbers = #tpu.dot_dimension_numbers<[1], [0], [0], [1], [0, 0, 1, 1], [], []>} : vector<32x64xbf16>, vector<64x64xbf16>, vector<32x64xf32> -> vector<32x64xf32>
    %390 = vector.shape_cast %380 : vector<4x8x64xf32> to vector<32x64xf32>
    %391 = arith.truncf %390 : vector<32x64xf32> to vector<32x64xbf16>
    %c64_207 = arith.constant 64 : index
    %c0_208 = arith.constant 0 : index
    %392 = vector.load %arg17[%c64_207, %c0_208] : memref<192x64xbf16, #tpu.memory_space<vmem>>, vector<64x64xbf16>
    %cst_209 = arith.constant dense<0.000000e+00> : vector<32x64xf32>
    %393 = tpu.matmul %391, %392, %cst_209 {dimension_numbers = #tpu.dot_dimension_numbers<[1], [0], [0], [1], [0, 0, 1, 1], [], []>} : vector<32x64xbf16>, vector<64x64xbf16>, vector<32x64xf32> -> vector<32x64xf32>
    %394 = arith.addf %389, %393 : vector<32x64xf32>
    %395 = vector.shape_cast %385 : vector<4x8x64xf32> to vector<32x64xf32>
    %396 = arith.truncf %395 : vector<32x64xf32> to vector<32x64xbf16>
    %c128_210 = arith.constant 128 : index
    %c0_211 = arith.constant 0 : index
    %397 = vector.load %arg17[%c128_210, %c0_211] : memref<192x64xbf16, #tpu.memory_space<vmem>>, vector<64x64xbf16>
    %cst_212 = arith.constant dense<0.000000e+00> : vector<32x64xf32>
    %398 = tpu.matmul %396, %397, %cst_212 {dimension_numbers = #tpu.dot_dimension_numbers<[1], [0], [0], [1], [0, 0, 1, 1], [], []>} : vector<32x64xbf16>, vector<64x64xbf16>, vector<32x64xf32> -> vector<32x64xf32>
    %399 = arith.addf %394, %398 : vector<32x64xf32>
    %c0_213 = arith.constant 0 : index
    %c0_214 = arith.constant 0 : index
    %400 = vector.load %arg18[%c0_213, %c0_214] : memref<1x64xf32, #tpu.memory_space<vmem>>, vector<1x64xf32>
    %401 = vector.broadcast %400 : vector<1x64xf32> to vector<32x64xf32>
    %402 = arith.mulf %399, %401 : vector<32x64xf32>
    %c0_215 = arith.constant 0 : index
    %c0_216 = arith.constant 0 : index
    %403 = vector.load %arg19[%c0_215, %c0_216] : memref<1x64xf32, #tpu.memory_space<vmem>>, vector<1x64xf32>
    %404 = vector.broadcast %403 : vector<1x64xf32> to vector<32x64xf32>
    %405 = arith.addf %402, %404 : vector<32x64xf32>
    %406 = vector.shape_cast %405 : vector<32x64xf32> to vector<4x8x64xf32>
    %cst_217 = arith.constant 3.000000e+00 : f32
    %407 = vector.broadcast %cst_217 : f32 to vector<4x8x64xf32>
    %408 = arith.divf %349, %407 : vector<4x8x64xf32>
    %409 = arith.subf %406, %408 : vector<4x8x64xf32>
    %410 = arith.addf %295, %409 : vector<4x8x64xf32>
    %cst_218 = arith.constant 0.000000e+00 : f32
    %411 = vector.broadcast %cst_218 : f32 to vector<4x1x64xf32>
    %412 = vector.extract_strided_slice %410 {offsets = [0, 0, 0], sizes = [4, 7, 64], strides = [1, 1, 1]} : vector<4x8x64xf32> to vector<4x7x64xf32>
    %413 = tpu.concatenate %411, %412 in 1 : vector<4x1x64xf32>, vector<4x7x64xf32> -> vector<4x8x64xf32>
    %414 = vector.extract_strided_slice %410 {offsets = [0, 1, 0], sizes = [4, 7, 64], strides = [1, 1, 1]} : vector<4x8x64xf32> to vector<4x7x64xf32>
    %415 = tpu.concatenate %414, %411 in 1 : vector<4x7x64xf32>, vector<4x1x64xf32> -> vector<4x8x64xf32>
    %416 = vector.shape_cast %413 : vector<4x8x64xf32> to vector<32x64xf32>
    %417 = arith.truncf %416 : vector<32x64xf32> to vector<32x64xbf16>
    %c0_219 = arith.constant 0 : index
    %c0_220 = arith.constant 0 : index
    %418 = vector.load %arg14[%c0_219, %c0_220] : memref<192x64xbf16, #tpu.memory_space<vmem>>, vector<64x64xbf16>
    %cst_221 = arith.constant dense<0.000000e+00> : vector<32x64xf32>
    %419 = tpu.matmul %417, %418, %cst_221 {dimension_numbers = #tpu.dot_dimension_numbers<[1], [0], [0], [1], [0, 0, 1, 1], [], []>} : vector<32x64xbf16>, vector<64x64xbf16>, vector<32x64xf32> -> vector<32x64xf32>
    %420 = vector.shape_cast %410 : vector<4x8x64xf32> to vector<32x64xf32>
    %421 = arith.truncf %420 : vector<32x64xf32> to vector<32x64xbf16>
    %c64_222 = arith.constant 64 : index
    %c0_223 = arith.constant 0 : index
    %422 = vector.load %arg14[%c64_222, %c0_223] : memref<192x64xbf16, #tpu.memory_space<vmem>>, vector<64x64xbf16>
    %cst_224 = arith.constant dense<0.000000e+00> : vector<32x64xf32>
    %423 = tpu.matmul %421, %422, %cst_224 {dimension_numbers = #tpu.dot_dimension_numbers<[1], [0], [0], [1], [0, 0, 1, 1], [], []>} : vector<32x64xbf16>, vector<64x64xbf16>, vector<32x64xf32> -> vector<32x64xf32>
    %424 = arith.addf %419, %423 : vector<32x64xf32>
    %425 = vector.shape_cast %415 : vector<4x8x64xf32> to vector<32x64xf32>
    %426 = arith.truncf %425 : vector<32x64xf32> to vector<32x64xbf16>
    %c128_225 = arith.constant 128 : index
    %c0_226 = arith.constant 0 : index
    %427 = vector.load %arg14[%c128_225, %c0_226] : memref<192x64xbf16, #tpu.memory_space<vmem>>, vector<64x64xbf16>
    %cst_227 = arith.constant dense<0.000000e+00> : vector<32x64xf32>
    %428 = tpu.matmul %426, %427, %cst_227 {dimension_numbers = #tpu.dot_dimension_numbers<[1], [0], [0], [1], [0, 0, 1, 1], [], []>} : vector<32x64xbf16>, vector<64x64xbf16>, vector<32x64xf32> -> vector<32x64xf32>
    %429 = arith.addf %424, %428 : vector<32x64xf32>
    %c0_228 = arith.constant 0 : index
    %c0_229 = arith.constant 0 : index
    %430 = vector.load %arg15[%c0_228, %c0_229] : memref<1x64xf32, #tpu.memory_space<vmem>>, vector<1x64xf32>
    %431 = vector.broadcast %430 : vector<1x64xf32> to vector<32x64xf32>
    %432 = arith.mulf %429, %431 : vector<32x64xf32>
    %c0_230 = arith.constant 0 : index
    %c0_231 = arith.constant 0 : index
    %433 = vector.load %arg16[%c0_230, %c0_231] : memref<1x64xf32, #tpu.memory_space<vmem>>, vector<1x64xf32>
    %434 = vector.broadcast %433 : vector<1x64xf32> to vector<32x64xf32>
    %435 = arith.addf %432, %434 : vector<32x64xf32>
    %cst_232 = arith.constant 0.000000e+00 : f32
    %436 = vector.broadcast %cst_232 : f32 to vector<32x64xf32>
    %437 = arith.maximumf %435, %436 : vector<32x64xf32>
    %438 = vector.shape_cast %437 : vector<32x64xf32> to vector<4x8x64xf32>
    %cst_233 = arith.constant 0.000000e+00 : f32
    %439 = vector.broadcast %cst_233 : f32 to vector<4x1x64xf32>
    %440 = vector.extract_strided_slice %438 {offsets = [0, 0, 0], sizes = [4, 7, 64], strides = [1, 1, 1]} : vector<4x8x64xf32> to vector<4x7x64xf32>
    %441 = tpu.concatenate %439, %440 in 1 : vector<4x1x64xf32>, vector<4x7x64xf32> -> vector<4x8x64xf32>
    %442 = vector.extract_strided_slice %438 {offsets = [0, 1, 0], sizes = [4, 7, 64], strides = [1, 1, 1]} : vector<4x8x64xf32> to vector<4x7x64xf32>
    %443 = tpu.concatenate %442, %439 in 1 : vector<4x7x64xf32>, vector<4x1x64xf32> -> vector<4x8x64xf32>
    %444 = vector.shape_cast %441 : vector<4x8x64xf32> to vector<32x64xf32>
    %445 = arith.truncf %444 : vector<32x64xf32> to vector<32x64xbf16>
    %c0_234 = arith.constant 0 : index
    %c0_235 = arith.constant 0 : index
    %446 = vector.load %arg17[%c0_234, %c0_235] : memref<192x64xbf16, #tpu.memory_space<vmem>>, vector<64x64xbf16>
    %cst_236 = arith.constant dense<0.000000e+00> : vector<32x64xf32>
    %447 = tpu.matmul %445, %446, %cst_236 {dimension_numbers = #tpu.dot_dimension_numbers<[1], [0], [0], [1], [0, 0, 1, 1], [], []>} : vector<32x64xbf16>, vector<64x64xbf16>, vector<32x64xf32> -> vector<32x64xf32>
    %448 = vector.shape_cast %438 : vector<4x8x64xf32> to vector<32x64xf32>
    %449 = arith.truncf %448 : vector<32x64xf32> to vector<32x64xbf16>
    %c64_237 = arith.constant 64 : index
    %c0_238 = arith.constant 0 : index
    %450 = vector.load %arg17[%c64_237, %c0_238] : memref<192x64xbf16, #tpu.memory_space<vmem>>, vector<64x64xbf16>
    %cst_239 = arith.constant dense<0.000000e+00> : vector<32x64xf32>
    %451 = tpu.matmul %449, %450, %cst_239 {dimension_numbers = #tpu.dot_dimension_numbers<[1], [0], [0], [1], [0, 0, 1, 1], [], []>} : vector<32x64xbf16>, vector<64x64xbf16>, vector<32x64xf32> -> vector<32x64xf32>
    %452 = arith.addf %447, %451 : vector<32x64xf32>
    %453 = vector.shape_cast %443 : vector<4x8x64xf32> to vector<32x64xf32>
    %454 = arith.truncf %453 : vector<32x64xf32> to vector<32x64xbf16>
    %c128_240 = arith.constant 128 : index
    %c0_241 = arith.constant 0 : index
    %455 = vector.load %arg17[%c128_240, %c0_241] : memref<192x64xbf16, #tpu.memory_space<vmem>>, vector<64x64xbf16>
    %cst_242 = arith.constant dense<0.000000e+00> : vector<32x64xf32>
    %456 = tpu.matmul %454, %455, %cst_242 {dimension_numbers = #tpu.dot_dimension_numbers<[1], [0], [0], [1], [0, 0, 1, 1], [], []>} : vector<32x64xbf16>, vector<64x64xbf16>, vector<32x64xf32> -> vector<32x64xf32>
    %457 = arith.addf %452, %456 : vector<32x64xf32>
    %c0_243 = arith.constant 0 : index
    %c0_244 = arith.constant 0 : index
    %458 = vector.load %arg18[%c0_243, %c0_244] : memref<1x64xf32, #tpu.memory_space<vmem>>, vector<1x64xf32>
    %459 = vector.broadcast %458 : vector<1x64xf32> to vector<32x64xf32>
    %460 = arith.mulf %457, %459 : vector<32x64xf32>
    %c0_245 = arith.constant 0 : index
    %c0_246 = arith.constant 0 : index
    %461 = vector.load %arg19[%c0_245, %c0_246] : memref<1x64xf32, #tpu.memory_space<vmem>>, vector<1x64xf32>
    %462 = vector.broadcast %461 : vector<1x64xf32> to vector<32x64xf32>
    %463 = arith.addf %460, %462 : vector<32x64xf32>
    %464 = vector.shape_cast %463 : vector<32x64xf32> to vector<4x8x64xf32>
    %465 = arith.subf %349, %406 : vector<4x8x64xf32>
    %466 = arith.addf %465, %464 : vector<4x8x64xf32>
    %467 = arith.addf %295, %466 : vector<4x8x64xf32>
    %cst_247 = arith.constant 0.000000e+00 : f32
    %468 = vector.broadcast %cst_247 : f32 to vector<4x1x64xf32>
    %469 = vector.extract_strided_slice %467 {offsets = [0, 0, 0], sizes = [4, 7, 64], strides = [1, 1, 1]} : vector<4x8x64xf32> to vector<4x7x64xf32>
    %470 = tpu.concatenate %468, %469 in 1 : vector<4x1x64xf32>, vector<4x7x64xf32> -> vector<4x8x64xf32>
    %471 = vector.extract_strided_slice %467 {offsets = [0, 1, 0], sizes = [4, 7, 64], strides = [1, 1, 1]} : vector<4x8x64xf32> to vector<4x7x64xf32>
    %472 = tpu.concatenate %471, %468 in 1 : vector<4x7x64xf32>, vector<4x1x64xf32> -> vector<4x8x64xf32>
    %473 = vector.shape_cast %470 : vector<4x8x64xf32> to vector<32x64xf32>
    %474 = arith.truncf %473 : vector<32x64xf32> to vector<32x64xbf16>
    %c0_248 = arith.constant 0 : index
    %c0_249 = arith.constant 0 : index
    %475 = vector.load %arg14[%c0_248, %c0_249] : memref<192x64xbf16, #tpu.memory_space<vmem>>, vector<64x64xbf16>
    %cst_250 = arith.constant dense<0.000000e+00> : vector<32x64xf32>
    %476 = tpu.matmul %474, %475, %cst_250 {dimension_numbers = #tpu.dot_dimension_numbers<[1], [0], [0], [1], [0, 0, 1, 1], [], []>} : vector<32x64xbf16>, vector<64x64xbf16>, vector<32x64xf32> -> vector<32x64xf32>
    %477 = vector.shape_cast %467 : vector<4x8x64xf32> to vector<32x64xf32>
    %478 = arith.truncf %477 : vector<32x64xf32> to vector<32x64xbf16>
    %c64_251 = arith.constant 64 : index
    %c0_252 = arith.constant 0 : index
    %479 = vector.load %arg14[%c64_251, %c0_252] : memref<192x64xbf16, #tpu.memory_space<vmem>>, vector<64x64xbf16>
    %cst_253 = arith.constant dense<0.000000e+00> : vector<32x64xf32>
    %480 = tpu.matmul %478, %479, %cst_253 {dimension_numbers = #tpu.dot_dimension_numbers<[1], [0], [0], [1], [0, 0, 1, 1], [], []>} : vector<32x64xbf16>, vector<64x64xbf16>, vector<32x64xf32> -> vector<32x64xf32>
    %481 = arith.addf %476, %480 : vector<32x64xf32>
    %482 = vector.shape_cast %472 : vector<4x8x64xf32> to vector<32x64xf32>
    %483 = arith.truncf %482 : vector<32x64xf32> to vector<32x64xbf16>
    %c128_254 = arith.constant 128 : index
    %c0_255 = arith.constant 0 : index
    %484 = vector.load %arg14[%c128_254, %c0_255] : memref<192x64xbf16, #tpu.memory_space<vmem>>, vector<64x64xbf16>
    %cst_256 = arith.constant dense<0.000000e+00> : vector<32x64xf32>
    %485 = tpu.matmul %483, %484, %cst_256 {dimension_numbers = #tpu.dot_dimension_numbers<[1], [0], [0], [1], [0, 0, 1, 1], [], []>} : vector<32x64xbf16>, vector<64x64xbf16>, vector<32x64xf32> -> vector<32x64xf32>
    %486 = arith.addf %481, %485 : vector<32x64xf32>
    %c0_257 = arith.constant 0 : index
    %c0_258 = arith.constant 0 : index
    %487 = vector.load %arg15[%c0_257, %c0_258] : memref<1x64xf32, #tpu.memory_space<vmem>>, vector<1x64xf32>
    %488 = vector.broadcast %487 : vector<1x64xf32> to vector<32x64xf32>
    %489 = arith.mulf %486, %488 : vector<32x64xf32>
    %c0_259 = arith.constant 0 : index
    %c0_260 = arith.constant 0 : index
    %490 = vector.load %arg16[%c0_259, %c0_260] : memref<1x64xf32, #tpu.memory_space<vmem>>, vector<1x64xf32>
    %491 = vector.broadcast %490 : vector<1x64xf32> to vector<32x64xf32>
    %492 = arith.addf %489, %491 : vector<32x64xf32>
    %cst_261 = arith.constant 0.000000e+00 : f32
    %493 = vector.broadcast %cst_261 : f32 to vector<32x64xf32>
    %494 = arith.maximumf %492, %493 : vector<32x64xf32>
    %495 = vector.shape_cast %494 : vector<32x64xf32> to vector<4x8x64xf32>
    %cst_262 = arith.constant 0.000000e+00 : f32
    %496 = vector.broadcast %cst_262 : f32 to vector<4x1x64xf32>
    %497 = vector.extract_strided_slice %495 {offsets = [0, 0, 0], sizes = [4, 7, 64], strides = [1, 1, 1]} : vector<4x8x64xf32> to vector<4x7x64xf32>
    %498 = tpu.concatenate %496, %497 in 1 : vector<4x1x64xf32>, vector<4x7x64xf32> -> vector<4x8x64xf32>
    %499 = vector.extract_strided_slice %495 {offsets = [0, 1, 0], sizes = [4, 7, 64], strides = [1, 1, 1]} : vector<4x8x64xf32> to vector<4x7x64xf32>
    %500 = tpu.concatenate %499, %496 in 1 : vector<4x7x64xf32>, vector<4x1x64xf32> -> vector<4x8x64xf32>
    %501 = vector.shape_cast %498 : vector<4x8x64xf32> to vector<32x64xf32>
    %502 = arith.truncf %501 : vector<32x64xf32> to vector<32x64xbf16>
    %c0_263 = arith.constant 0 : index
    %c0_264 = arith.constant 0 : index
    %503 = vector.load %arg17[%c0_263, %c0_264] : memref<192x64xbf16, #tpu.memory_space<vmem>>, vector<64x64xbf16>
    %cst_265 = arith.constant dense<0.000000e+00> : vector<32x64xf32>
    %504 = tpu.matmul %502, %503, %cst_265 {dimension_numbers = #tpu.dot_dimension_numbers<[1], [0], [0], [1], [0, 0, 1, 1], [], []>} : vector<32x64xbf16>, vector<64x64xbf16>, vector<32x64xf32> -> vector<32x64xf32>
    %505 = vector.shape_cast %495 : vector<4x8x64xf32> to vector<32x64xf32>
    %506 = arith.truncf %505 : vector<32x64xf32> to vector<32x64xbf16>
    %c64_266 = arith.constant 64 : index
    %c0_267 = arith.constant 0 : index
    %507 = vector.load %arg17[%c64_266, %c0_267] : memref<192x64xbf16, #tpu.memory_space<vmem>>, vector<64x64xbf16>
    %cst_268 = arith.constant dense<0.000000e+00> : vector<32x64xf32>
    %508 = tpu.matmul %506, %507, %cst_268 {dimension_numbers = #tpu.dot_dimension_numbers<[1], [0], [0], [1], [0, 0, 1, 1], [], []>} : vector<32x64xbf16>, vector<64x64xbf16>, vector<32x64xf32> -> vector<32x64xf32>
    %509 = arith.addf %504, %508 : vector<32x64xf32>
    %510 = vector.shape_cast %500 : vector<4x8x64xf32> to vector<32x64xf32>
    %511 = arith.truncf %510 : vector<32x64xf32> to vector<32x64xbf16>
    %c128_269 = arith.constant 128 : index
    %c0_270 = arith.constant 0 : index
    %512 = vector.load %arg17[%c128_269, %c0_270] : memref<192x64xbf16, #tpu.memory_space<vmem>>, vector<64x64xbf16>
    %cst_271 = arith.constant dense<0.000000e+00> : vector<32x64xf32>
    %513 = tpu.matmul %511, %512, %cst_271 {dimension_numbers = #tpu.dot_dimension_numbers<[1], [0], [0], [1], [0, 0, 1, 1], [], []>} : vector<32x64xbf16>, vector<64x64xbf16>, vector<32x64xf32> -> vector<32x64xf32>
    %514 = arith.addf %509, %513 : vector<32x64xf32>
    %c0_272 = arith.constant 0 : index
    %c0_273 = arith.constant 0 : index
    %515 = vector.load %arg18[%c0_272, %c0_273] : memref<1x64xf32, #tpu.memory_space<vmem>>, vector<1x64xf32>
    %516 = vector.broadcast %515 : vector<1x64xf32> to vector<32x64xf32>
    %517 = arith.mulf %514, %516 : vector<32x64xf32>
    %c0_274 = arith.constant 0 : index
    %c0_275 = arith.constant 0 : index
    %518 = vector.load %arg19[%c0_274, %c0_275] : memref<1x64xf32, #tpu.memory_space<vmem>>, vector<1x64xf32>
    %519 = vector.broadcast %518 : vector<1x64xf32> to vector<32x64xf32>
    %520 = arith.addf %517, %519 : vector<32x64xf32>
    %521 = vector.shape_cast %520 : vector<32x64xf32> to vector<4x8x64xf32>
    %522 = arith.addf %406, %464 : vector<4x8x64xf32>
    %cst_276 = arith.constant 3.000000e+00 : f32
    %523 = vector.broadcast %cst_276 : f32 to vector<4x8x64xf32>
    %524 = arith.mulf %523, %522 : vector<4x8x64xf32>
    %525 = arith.addf %349, %524 : vector<4x8x64xf32>
    %526 = arith.addf %525, %521 : vector<4x8x64xf32>
    %cst_277 = arith.constant 1.250000e-01 : f32
    %527 = vector.broadcast %cst_277 : f32 to vector<4x8x64xf32>
    %528 = arith.mulf %526, %527 : vector<4x8x64xf32>
    %529 = arith.addf %295, %528 : vector<4x8x64xf32>
    %530 = vector.shape_cast %529 : vector<4x8x64xf32> to vector<32x64xf32>
    %c0_278 = arith.constant 0 : index
    %c0_279 = arith.constant 0 : index
    %531 = vector.load %arg26[%c0_278, %c0_279] : memref<32x64xf32, #tpu.memory_space<vmem>>, vector<32x64xf32>
    tpu.vector_store %arg26[%c0_278, %c0_279], %530 {strides = array<i32>} : memref<32x64xf32, #tpu.memory_space<vmem>>, vector<32x64xf32>,
    %c0_280 = arith.constant 0 : index
    %c0_281 = arith.constant 0 : index
    %532 = vector.load %arg21[%c0_280, %c0_281] : memref<1x64xf32, #tpu.memory_space<vmem>>, vector<1x64xf32>
    %c0_282 = arith.constant 0 : index
    %c0_283 = arith.constant 0 : index
    %533 = tpu.strided_load %arg26[%c0_282, %c0_283] {strides = array<i32: 8, 1>} : memref<32x64xf32, #tpu.memory_space<vmem>>, vector<4x64xf32>
    %c1_284 = arith.constant 1 : index
    %c0_285 = arith.constant 0 : index
    %534 = tpu.strided_load %arg26[%c1_284, %c0_285] {strides = array<i32: 8, 1>} : memref<32x64xf32, #tpu.memory_space<vmem>>, vector<4x64xf32>
    %535 = arith.maximumf %533, %534 : vector<4x64xf32>
    %536 = arith.truncf %535 : vector<4x64xf32> to vector<4x64xbf16>
    %c0_286 = arith.constant 0 : index
    %c0_287 = arith.constant 0 : index
    %537 = vector.load %arg20[%c0_286, %c0_287] : memref<256x64xbf16, #tpu.memory_space<vmem>>, vector<64x64xbf16>
    %cst_288 = arith.constant dense<0.000000e+00> : vector<4x64xf32>
    %538 = tpu.matmul %536, %537, %cst_288 {dimension_numbers = #tpu.dot_dimension_numbers<[1], [0], [0], [1], [0, 0, 1, 1], [], []>} : vector<4x64xbf16>, vector<64x64xbf16>, vector<4x64xf32> -> vector<4x64xf32>
    %539 = vector.broadcast %532 : vector<1x64xf32> to vector<4x64xf32>
    %540 = arith.addf %539, %538 : vector<4x64xf32>
    %c2_289 = arith.constant 2 : index
    %c0_290 = arith.constant 0 : index
    %541 = tpu.strided_load %arg26[%c2_289, %c0_290] {strides = array<i32: 8, 1>} : memref<32x64xf32, #tpu.memory_space<vmem>>, vector<4x64xf32>
    %c3 = arith.constant 3 : index
    %c0_291 = arith.constant 0 : index
    %542 = tpu.strided_load %arg26[%c3, %c0_291] {strides = array<i32: 8, 1>} : memref<32x64xf32, #tpu.memory_space<vmem>>, vector<4x64xf32>
    %543 = arith.maximumf %541, %542 : vector<4x64xf32>
    %544 = arith.truncf %543 : vector<4x64xf32> to vector<4x64xbf16>
    %c64_292 = arith.constant 64 : index
    %c0_293 = arith.constant 0 : index
    %545 = vector.load %arg20[%c64_292, %c0_293] : memref<256x64xbf16, #tpu.memory_space<vmem>>, vector<64x64xbf16>
    %cst_294 = arith.constant dense<0.000000e+00> : vector<4x64xf32>
    %546 = tpu.matmul %544, %545, %cst_294 {dimension_numbers = #tpu.dot_dimension_numbers<[1], [0], [0], [1], [0, 0, 1, 1], [], []>} : vector<4x64xbf16>, vector<64x64xbf16>, vector<4x64xf32> -> vector<4x64xf32>
    %547 = arith.addf %540, %546 : vector<4x64xf32>
    %c4 = arith.constant 4 : index
    %c0_295 = arith.constant 0 : index
    %548 = tpu.strided_load %arg26[%c4, %c0_295] {strides = array<i32: 8, 1>} : memref<32x64xf32, #tpu.memory_space<vmem>>, vector<4x64xf32>
    %c5 = arith.constant 5 : index
    %c0_296 = arith.constant 0 : index
    %549 = tpu.strided_load %arg26[%c5, %c0_296] {strides = array<i32: 8, 1>} : memref<32x64xf32, #tpu.memory_space<vmem>>, vector<4x64xf32>
    %550 = arith.maximumf %548, %549 : vector<4x64xf32>
    %551 = arith.truncf %550 : vector<4x64xf32> to vector<4x64xbf16>
    %c128_297 = arith.constant 128 : index
    %c0_298 = arith.constant 0 : index
    %552 = vector.load %arg20[%c128_297, %c0_298] : memref<256x64xbf16, #tpu.memory_space<vmem>>, vector<64x64xbf16>
    %cst_299 = arith.constant dense<0.000000e+00> : vector<4x64xf32>
    %553 = tpu.matmul %551, %552, %cst_299 {dimension_numbers = #tpu.dot_dimension_numbers<[1], [0], [0], [1], [0, 0, 1, 1], [], []>} : vector<4x64xbf16>, vector<64x64xbf16>, vector<4x64xf32> -> vector<4x64xf32>
    %554 = arith.addf %547, %553 : vector<4x64xf32>
    %c6 = arith.constant 6 : index
    %c0_300 = arith.constant 0 : index
    %555 = tpu.strided_load %arg26[%c6, %c0_300] {strides = array<i32: 8, 1>} : memref<32x64xf32, #tpu.memory_space<vmem>>, vector<4x64xf32>
    %c7 = arith.constant 7 : index
    %c0_301 = arith.constant 0 : index
    %556 = tpu.strided_load %arg26[%c7, %c0_301] {strides = array<i32: 8, 1>} : memref<32x64xf32, #tpu.memory_space<vmem>>, vector<4x64xf32>
    %557 = arith.maximumf %555, %556 : vector<4x64xf32>
    %558 = arith.truncf %557 : vector<4x64xf32> to vector<4x64xbf16>
    %c192 = arith.constant 192 : index
    %c0_302 = arith.constant 0 : index
    %559 = vector.load %arg20[%c192, %c0_302] : memref<256x64xbf16, #tpu.memory_space<vmem>>, vector<64x64xbf16>
    %cst_303 = arith.constant dense<0.000000e+00> : vector<4x64xf32>
    %560 = tpu.matmul %558, %559, %cst_303 {dimension_numbers = #tpu.dot_dimension_numbers<[1], [0], [0], [1], [0, 0, 1, 1], [], []>} : vector<4x64xbf16>, vector<64x64xbf16>, vector<4x64xf32> -> vector<4x64xf32>
    %561 = arith.addf %554, %560 : vector<4x64xf32>
    %cst_304 = arith.constant 0.000000e+00 : f32
    %562 = vector.broadcast %cst_304 : f32 to vector<4x64xf32>
    %563 = arith.maximumf %561, %562 : vector<4x64xf32>
    %564 = arith.truncf %563 : vector<4x64xf32> to vector<4x64xbf16>
    %c0_305 = arith.constant 0 : index
    %c0_306 = arith.constant 0 : index
    %565 = vector.load %arg22[%c0_305, %c0_306] : memref<64x32xbf16, #tpu.memory_space<vmem>>, vector<64x32xbf16>
    %cst_307 = arith.constant dense<0.000000e+00> : vector<4x32xf32>
    %566 = tpu.matmul %564, %565, %cst_307 {dimension_numbers = #tpu.dot_dimension_numbers<[1], [0], [0], [1], [0, 0, 1, 1], [], []>} : vector<4x64xbf16>, vector<64x32xbf16>, vector<4x32xf32> -> vector<4x32xf32>
    %c0_308 = arith.constant 0 : index
    %c0_309 = arith.constant 0 : index
    %567 = vector.load %arg23[%c0_308, %c0_309] : memref<1x32xf32, #tpu.memory_space<vmem>>, vector<1x32xf32>
    %568 = vector.broadcast %567 : vector<1x32xf32> to vector<4x32xf32>
    %569 = arith.addf %566, %568 : vector<4x32xf32>
    %c0_310 = arith.constant 0 : index
    %c0_311 = arith.constant 0 : index
    %c0_312 = arith.constant 0 : index
    %570 = vector.load %arg24[%c0_310, %c0_311, %c0_312] : memref<1x4x32xf32, #tpu.memory_space<vmem>>, vector<1x4x32xf32>
    %571 = vector.shape_cast %570 : vector<1x4x32xf32> to vector<4x32xf32>
    %572 = vector.shape_cast %569 : vector<4x32xf32> to vector<1x4x32xf32>
    tpu.vector_store %arg24[%c0_310, %c0_311, %c0_312], %572 {strides = array<i32>} : memref<1x4x32xf32, #tpu.memory_space<vmem>>, vector<1x4x32xf32>,
    return
  }
  func.func @transform_0(%arg0: i32) -> (i32, i32, i32) {
    %c0_i32 = arith.constant 0 : i32
    %c0_i32_0 = arith.constant 0 : i32
    %c0_i32_1 = arith.constant 0 : i32
    return %arg0, %c0_i32, %c0_i32_0 : i32, i32, i32
  }
  func.func @transform_1(%arg0: i32) -> (i32, i32) {
    %c0_i32 = arith.constant 0 : i32
    %c0_i32_0 = arith.constant 0 : i32
    %c0_i32_1 = arith.constant 0 : i32
    return %c0_i32, %c0_i32_0 : i32, i32
  }
  func.func @transform_2(%arg0: i32) -> (i32, i32) {
    %c0_i32 = arith.constant 0 : i32
    %c0_i32_0 = arith.constant 0 : i32
    %c0_i32_1 = arith.constant 0 : i32
    return %c0_i32, %c0_i32_0 : i32, i32
  }
  func.func @transform_3(%arg0: i32) -> (i32, i32) {
    %c0_i32 = arith.constant 0 : i32
    %c0_i32_0 = arith.constant 0 : i32
    %c0_i32_1 = arith.constant 0 : i32
    return %c0_i32, %c0_i32_0 : i32, i32
  }
  func.func @transform_4(%arg0: i32) -> (i32, i32) {
    %c0_i32 = arith.constant 0 : i32
    %c0_i32_0 = arith.constant 0 : i32
    %c0_i32_1 = arith.constant 0 : i32
    return %c0_i32, %c0_i32_0 : i32, i32
  }
  func.func @transform_5(%arg0: i32) -> (i32, i32) {
    %c0_i32 = arith.constant 0 : i32
    %c0_i32_0 = arith.constant 0 : i32
    %c0_i32_1 = arith.constant 0 : i32
    return %c0_i32, %c0_i32_0 : i32, i32
  }
  func.func @transform_6(%arg0: i32) -> (i32, i32) {
    %c0_i32 = arith.constant 0 : i32
    %c0_i32_0 = arith.constant 0 : i32
    %c0_i32_1 = arith.constant 0 : i32
    return %c0_i32, %c0_i32_0 : i32, i32
  }
  func.func @transform_7(%arg0: i32) -> (i32, i32) {
    %c0_i32 = arith.constant 0 : i32
    %c0_i32_0 = arith.constant 0 : i32
    %c0_i32_1 = arith.constant 0 : i32
    return %c0_i32, %c0_i32_0 : i32, i32
  }
  func.func @transform_8(%arg0: i32) -> (i32, i32) {
    %c0_i32 = arith.constant 0 : i32
    %c0_i32_0 = arith.constant 0 : i32
    %c0_i32_1 = arith.constant 0 : i32
    return %c0_i32, %c0_i32_0 : i32, i32
  }
  func.func @transform_9(%arg0: i32) -> (i32, i32) {
    %c0_i32 = arith.constant 0 : i32
    %c0_i32_0 = arith.constant 0 : i32
    %c0_i32_1 = arith.constant 0 : i32
    return %c0_i32, %c0_i32_0 : i32, i32
  }
  func.func @transform_10(%arg0: i32) -> (i32, i32) {
    %c0_i32 = arith.constant 0 : i32
    %c0_i32_0 = arith.constant 0 : i32
    %c0_i32_1 = arith.constant 0 : i32
    return %c0_i32, %c0_i32_0 : i32, i32
  }
  func.func @transform_11(%arg0: i32) -> (i32, i32) {
    %c0_i32 = arith.constant 0 : i32
    %c0_i32_0 = arith.constant 0 : i32
    %c0_i32_1 = arith.constant 0 : i32
    return %c0_i32, %c0_i32_0 : i32, i32
  }
  func.func @transform_12(%arg0: i32) -> (i32, i32) {
    %c0_i32 = arith.constant 0 : i32
    %c0_i32_0 = arith.constant 0 : i32
    %c0_i32_1 = arith.constant 0 : i32
    return %c0_i32, %c0_i32_0 : i32, i32
  }
  func.func @transform_13(%arg0: i32) -> (i32, i32) {
    %c0_i32 = arith.constant 0 : i32
    %c0_i32_0 = arith.constant 0 : i32
    %c0_i32_1 = arith.constant 0 : i32
    return %c0_i32, %c0_i32_0 : i32, i32
  }
  func.func @transform_14(%arg0: i32) -> (i32, i32) {
    %c0_i32 = arith.constant 0 : i32
    %c0_i32_0 = arith.constant 0 : i32
    %c0_i32_1 = arith.constant 0 : i32
    return %c0_i32, %c0_i32_0 : i32, i32
  }
  func.func @transform_15(%arg0: i32) -> (i32, i32) {
    %c0_i32 = arith.constant 0 : i32
    %c0_i32_0 = arith.constant 0 : i32
    %c0_i32_1 = arith.constant 0 : i32
    return %c0_i32, %c0_i32_0 : i32, i32
  }
  func.func @transform_16(%arg0: i32) -> (i32, i32) {
    %c0_i32 = arith.constant 0 : i32
    %c0_i32_0 = arith.constant 0 : i32
    %c0_i32_1 = arith.constant 0 : i32
    return %c0_i32, %c0_i32_0 : i32, i32
  }
  func.func @transform_17(%arg0: i32) -> (i32, i32) {
    %c0_i32 = arith.constant 0 : i32
    %c0_i32_0 = arith.constant 0 : i32
    %c0_i32_1 = arith.constant 0 : i32
    return %c0_i32, %c0_i32_0 : i32, i32
  }
  func.func @transform_18(%arg0: i32) -> (i32, i32) {
    %c0_i32 = arith.constant 0 : i32
    %c0_i32_0 = arith.constant 0 : i32
    %c0_i32_1 = arith.constant 0 : i32
    return %c0_i32, %c0_i32_0 : i32, i32
  }
  func.func @transform_19(%arg0: i32) -> (i32, i32) {
    %c0_i32 = arith.constant 0 : i32
    %c0_i32_0 = arith.constant 0 : i32
    %c0_i32_1 = arith.constant 0 : i32
    return %c0_i32, %c0_i32_0 : i32, i32
  }
  func.func @transform_20(%arg0: i32) -> (i32, i32) {
    %c0_i32 = arith.constant 0 : i32
    %c0_i32_0 = arith.constant 0 : i32
    %c0_i32_1 = arith.constant 0 : i32
    return %c0_i32, %c0_i32_0 : i32, i32
  }
  func.func @transform_21(%arg0: i32) -> (i32, i32) {
    %c0_i32 = arith.constant 0 : i32
    %c0_i32_0 = arith.constant 0 : i32
    %c0_i32_1 = arith.constant 0 : i32
    return %c0_i32, %c0_i32_0 : i32, i32
  }
  func.func @transform_22(%arg0: i32) -> (i32, i32) {
    %c0_i32 = arith.constant 0 : i32
    %c0_i32_0 = arith.constant 0 : i32
    %c0_i32_1 = arith.constant 0 : i32
    return %c0_i32, %c0_i32_0 : i32, i32
  }
  func.func @transform_23(%arg0: i32) -> (i32, i32, i32) {
    %c0_i32 = arith.constant 0 : i32
    %c0_i32_0 = arith.constant 0 : i32
    %c0_i32_1 = arith.constant 0 : i32
    return %arg0, %c0_i32, %c0_i32_0 : i32, i32, i32
  }
}

</mosaic_0001>

<bundles_post_ra>
// kernel: contrastive_neural_ode_forward.1
= control target key start
LH: loop header
LB: loop body
LE: loop exit
PB: predicated region body
PF: predicated region fallthrough
CT: control target
= control target key end

     0   :  { %s9927_s0 = inlined_call_operand.vmem [shape: f32[4,16,1], index: 0, kind: input, shape index: {}]   ;;  %s9928_s1 = inlined_call_operand.vmem [shape: f32[3,32], index: 1, kind: input, shape index: {}]   ;;  %s9929_s2 = inlined_call_operand.hbm [shape: f32[1,32], index: 2, kind: input, shape index: {}]   ;;  %s9930_s3 = inlined_call_operand.hbm [shape: f32[1,32], index: 3, kind: input, shape index: {}]   ;;  %s9931_s4 = inlined_call_operand.vmem [shape: bf16[96,32], index: 4, kind: input, shape index: {}]   ;;  %s9932_s5 = inlined_call_operand.hbm [shape: f32[1,32], index: 5, kind: input, shape index: {}]   ;;  %s9933_s6 = inlined_call_operand.hbm [shape: f32[1,32], index: 6, kind: input, shape index: {}]   ;;  %s9934_s7 = inlined_call_operand.hbm [shape: bf16[96,32], index: 7, kind: input, shape index: {}]   ;;  %s9935_s8 = inlined_call_operand.hbm [shape: f32[1,32], index: 8, kind: input, shape index: {}]   ;;  %s9936_s9 = inlined_call_operand.hbm [shape: f32[1,32], index: 9, kind: input, shape index: {}]   ;;  %s9937_s10 = inlined_call_operand.hbm [shape: bf16[96,64], index: 10, kind: input, shape index: {}]   ;;  %s9938_s11 = inlined_call_operand.hbm [shape: f32[1,64], index: 11, kind: input, shape index: {}]   ;;  %s9939_s12 = inlined_call_operand.hbm [shape: f32[1,64], index: 12, kind: input, shape index: {}]   ;;  %s9940_s13 = inlined_call_operand.hbm [shape: bf16[192,64], index: 13, kind: input, shape index: {}]   ;;  %s9941_s14 = inlined_call_operand.hbm [shape: f32[1,64], index: 14, kind: input, shape index: {}]   ;;  %s9942_s15 = inlined_call_operand.hbm [shape: f32[1,64], index: 15, kind: input, shape index: {}]   ;;  %s9943_s16 = inlined_call_operand.hbm [shape: bf16[192,64], index: 16, kind: input, shape index: {}]   ;;  %s9944_s17 = inlined_call_operand.hbm [shape: f32[1,64], index: 17, kind: input, shape index: {}]   ;;  %s9945_s18 = inlined_call_operand.vmem [shape: f32[1,64], index: 18, kind: input, shape index: {}]   ;;  %s9946_s19 = inlined_call_operand.vmem [shape: bf16[256,64], index: 19, kind: input, shape index: {}]   ;;  %s9947_s20 = inlined_call_operand.hbm [shape: f32[1,64], index: 20, kind: input, shape index: {}]   ;;  %s9948_s21 = inlined_call_operand.hbm [shape: bf16[64,32], index: 21, kind: input, shape index: {}]   ;;  %s9949_s22 = inlined_call_operand.hbm [shape: f32[1,32], index: 22, kind: input, shape index: {}]   ;;  %s9950_s23 = inlined_call_operand.vmem [shape: f32[1,4,32], index: 23, kind: output, shape index: {}]  }
   0x1   :  { %9961 = sst [smem:[#allocation43_spill]] %s9927_s0 }
   0x2   :  { %9962 = sst [smem:[#allocation44_spill]] %s9928_s1 }
   0x3   :  { %9963 = sst [smem:[#allocation45_spill]] %s9929_s2 }
   0x4   :  { %9964 = sst [smem:[#allocation46_spill]] %s9930_s3 }
   0x5   :  { %9965 = sst [smem:[#allocation47_spill]] %s9931_s4 }
   0x6   :  { %9966 = sst [smem:[#allocation48_spill]] %s9932_s5 }
   0x7   :  { %9967 = sst [smem:[#allocation49_spill]] %s9933_s6 }
   0x8   :  { %9968 = sst [smem:[#allocation50_spill]] %s9934_s7 }
   0x9   :  { %28 = vsyncpa [#allocation5], 0 }
   0xa   :  { %29 = vsyncpa [#allocation7], 0 }
   0xb   :  { %30 = vsyncpa [#allocation10], 0 }
   0xc   :  { %31 = vsyncpa [#allocation13], 0 }
   0xd   :  { %32 = vsyncpa [#allocation16], 0 }
   0xe   :  { %33 = vsyncpa [#allocation19], 0 }
   0xf   :  { %34 = vsyncpa [#allocation22], 0 }
  0x10   :  { %35 = vsyncpa [#allocation25], 0 }
  0x11   :  { %36 = vsyncpa [#allocation28], 0 }
  0x12   :  { %37 = vsyncpa [#allocation31], 0  ;;  %s8049_s4 = smov [#allocation6]   ;;  %s8050_s24 = smov [#allocation9]  }
  0x13   :  { %s58_s30 = sshll.u32 %s8049_s4, 4  ;;  %s80_s25 = sshll.u32 %s8050_s24, 4  ;;  %s59_s30 = int_to_ptr.vmem [resolvable:$true] %s58_s30  ;;  %s81_s25 = int_to_ptr.vmem [resolvable:$true] %s80_s25 }
  0x14   :  { %s9969_s26 = sld [smem:[#allocation46_spill]] }
  0x1a   :  { %s7633_s2 = scalar_lea.hbm %s9969_s26, 16 }
  0x1b   :  { %p7634_p0 = scmp.ne.s32.totalorder %s9969_s26, %s7633_s2  ;;  %p7637_p1 = scmp.lt.u32.totalorder %s7633_s2, %s9969_s26 }
  0x1d   :  { %p7639_p2 = pnand %p7637_p1, %p7634_p0 }
  0x1f   :  { %7642 = shalt.err (!%p7639_p2)
}
  0x20   :  { %s7643_s29 = scalar_lea.vmem %s59_s30, 16  ;;  %s7647_s3 = scalar_lea.vmem %s59_s30, 32 }
  0x21   :  { %p7644_p3 = scmp.ne.s32.totalorder %s59_s30, %s7643_s29  ;;  %p7648_p4 = scmp.lt.s32.totalorder %s59_s30, %s59_s30 }
  0x22   :  { %p7649_p5 = scmp.lt.s32.totalorder %s7647_s3, %s7643_s29 }
  0x24   :  { %p7650_p6 = por %p7649_p5, %p7648_p4 }
  0x26   :  { %p7651_p7 = pnand %p7650_p6, %p7644_p3 }
  0x28   :  { %7654 = shalt.err (!%p7651_p7)
}
  0x29   :  { %61 = dma.hbm_to_vmem [thread:$0]  %s9969_s26, 16, %s59_s30, [#allocation7]  }
  0x2a   :  { %s9970_s1 = sld [smem:[#allocation49_spill]] }
  0x30   :  { %s7655_s6 = scalar_lea.hbm %s9970_s1, 16 }
  0x31   :  { %p7656_p8 = scmp.ne.s32.totalorder %s9970_s1, %s7655_s6  ;;  %p7659_p9 = scmp.lt.u32.totalorder %s7655_s6, %s9970_s1 }
  0x33   :  { %p7661_p10 = pnand %p7659_p9, %p7656_p8 }
  0x35   :  { %7664 = shalt.err (!%p7661_p10)
}
  0x36   :  { %s7665_s29 = scalar_lea.vmem %s81_s25, 16  ;;  %s7669_s3 = scalar_lea.vmem %s81_s25, 32 }
  0x37   :  { %p7666_p11 = scmp.ne.s32.totalorder %s81_s25, %s7665_s29  ;;  %p7670_p12 = scmp.lt.s32.totalorder %s81_s25, %s81_s25 }
  0x38   :  { %p7671_p13 = scmp.lt.s32.totalorder %s7669_s3, %s7665_s29 }
  0x3a   :  { %p7672_p0 = por %p7671_p13, %p7670_p12 }
  0x3c   :  { %p7673_p1 = pnand %p7672_p0, %p7666_p11 }
  0x3e   :  { %7676 = shalt.err (!%p7673_p1)
}
  0x3f   :  { %83 = dma.hbm_to_vmem [thread:$0]  %s9970_s1, 16, %s81_s25, [#allocation10]  }
  0x40   :  { %s8051_s0 = smov [#allocation12]   ;;  %s7677_s6 = scalar_lea.hbm %s9935_s8, 16 }
  0x41   :  { %s102_s4 = sshll.u32 %s8051_s0, 4  ;;  %p7678_p2 = scmp.ne.s32.totalorder %s9935_s8, %s7677_s6  ;;  %s103_s4 = int_to_ptr.vmem [resolvable:$true] %s102_s4 }
  0x42   :  { %p7681_p3 = scmp.lt.u32.totalorder %s7677_s6, %s9935_s8 }
  0x44   :  { %p7683_p4 = pnand %p7681_p3, %p7678_p2 }
  0x46   :  { %7686 = shalt.err (!%p7683_p4)
}
  0x47   :  { %s7687_s29 = scalar_lea.vmem %s103_s4, 16  ;;  %s7691_s25 = scalar_lea.vmem %s103_s4, 32 }
  0x48   :  { %p7688_p5 = scmp.ne.s32.totalorder %s103_s4, %s7687_s29  ;;  %p7692_p6 = scmp.lt.s32.totalorder %s103_s4, %s103_s4 }
  0x49   :  { %p7693_p7 = scmp.lt.s32.totalorder %s7691_s25, %s7687_s29 }
  0x4b   :  { %p7694_p8 = por %p7693_p7, %p7692_p6 }
  0x4d   :  { %p7695_p9 = pnand %p7694_p8, %p7688_p5 }
  0x4f   :  { %7698 = shalt.err (!%p7695_p9)
}
  0x50   :  { %105 = dma.hbm_to_vmem [thread:$0]  %s9935_s8, 16, %s103_s4, [#allocation13]  }
  0x51   :  { %s8052_s30 = smov [#allocation15]   ;;  %s8053_s0 = smov [#allocation18]  }
  0x52   :  { %s121_s26 = sshll.u32 %s8052_s30, 4  ;;  %s144_s24 = sshll.u32 %s8053_s0, 4  ;;  %s122_s26 = int_to_ptr.vmem [resolvable:$true] %s121_s26  ;;  %s145_s24 = int_to_ptr.vmem [resolvable:$true] %s144_s24 }
  0x53   :  { %s7699_s27 = scalar_lea.hbm %s9937_s10, 768 }
  0x54   :  { %p7700_p10 = scmp.ne.s32.totalorder %s9937_s10, %s7699_s27  ;;  %p7703_p11 = scmp.lt.u32.totalorder %s7699_s27, %s9937_s10 }
  0x56   :  { %p7705_p12 = pnand %p7703_p11, %p7700_p10 }
  0x58   :  { %7708 = shalt.err (!%p7705_p12)
}
  0x59   :  { %s7709_s8 = scalar_lea.vmem %s122_s26, 768  ;;  %p7714_p0 = scmp.lt.s32.totalorder %s122_s26, %s122_s26 }
  0x5a   :  { %p7710_p13 = scmp.ne.s32.totalorder %s122_s26, %s7709_s8  ;;  %p7715_p1 = scmp.lt.s32.totalorder %s7709_s8, %s7709_s8 }
  0x5c   :  { %p7716_p2 = por %p7715_p1, %p7714_p0 }
  0x5e   :  { %p7717_p3 = pnand %p7716_p2, %p7710_p13 }
  0x60   :  { %7720 = shalt.err (!%p7717_p3)
}
  0x61   :  { %s8054_s4 = smov 64   ;;  %s8055_s25 = smov 4  }
  0x62   :  { %127 = dma.hbm_to_vmem [thread:$0]  %s9937_s10, 768, %s122_s26, [#allocation16], %s8054_s4, %s8054_s4, %s8055_s25  }
  0x63   :  { %s7721_s5 = scalar_lea.hbm %s9939_s12, 16 }
  0x64   :  { %p7722_p4 = scmp.ne.s32.totalorder %s9939_s12, %s7721_s5  ;;  %p7725_p5 = scmp.lt.u32.totalorder %s7721_s5, %s9939_s12 }
  0x66   :  { %p7727_p6 = pnand %p7725_p5, %p7722_p4 }
  0x68   :  { %7730 = shalt.err (!%p7727_p6)
}
  0x69   :  { %s7731_s28 = scalar_lea.vmem %s145_s24, 16  ;;  %s7735_s29 = scalar_lea.vmem %s145_s24, 32 }
  0x6a   :  { %p7732_p7 = scmp.ne.s32.totalorder %s145_s24, %s7731_s28  ;;  %p7736_p8 = scmp.lt.s32.totalorder %s145_s24, %s145_s24 }
  0x6b   :  { %p7737_p9 = scmp.lt.s32.totalorder %s7735_s29, %s7731_s28 }
  0x6d   :  { %p7738_p10 = por %p7737_p9, %p7736_p8 }
  0x6f   :  { %p7739_p11 = pnand %p7738_p10, %p7732_p7 }
  0x71   :  { %7742 = shalt.err (!%p7739_p11)
}
  0x72   :  { %147 = dma.hbm_to_vmem [thread:$0]  %s9939_s12, 16, %s145_s24, [#allocation19]  }
  0x73   :  { %s8056_s8 = smov [#allocation21]   ;;  %s8057_s3 = smov [#allocation24]  }
  0x74   :  { %s166_s1 = sshll.u32 %s8056_s8, 4  ;;  %s185_s30 = sshll.u32 %s8057_s3, 4  ;;  %s167_s1 = int_to_ptr.vmem [resolvable:$true] %s166_s1  ;;  %s186_s30 = int_to_ptr.vmem [resolvable:$true] %s185_s30 }
  0x75   :  { %s7743_s6 = scalar_lea.hbm %s9941_s14, 16 }
  0x76   :  { %p7744_p12 = scmp.ne.s32.totalorder %s9941_s14, %s7743_s6  ;;  %p7747_p13 = scmp.lt.u32.totalorder %s7743_s6, %s9941_s14 }
  0x78   :  { %p7749_p0 = pnand %p7747_p13, %p7744_p12 }
  0x7a   :  { %7752 = shalt.err (!%p7749_p0)
}
  0x7b   :  { %s7753_s12 = scalar_lea.vmem %s167_s1, 16  ;;  %s7757_s24 = scalar_lea.vmem %s167_s1, 32 }
  0x7c   :  { %p7754_p1 = scmp.ne.s32.totalorder %s167_s1, %s7753_s12  ;;  %p7758_p2 = scmp.lt.s32.totalorder %s167_s1, %s167_s1 }
  0x7d   :  { %p7759_p3 = scmp.lt.s32.totalorder %s7757_s24, %s7753_s12 }
  0x7f   :  { %p7760_p4 = por %p7759_p3, %p7758_p2 }
  0x81   :  { %p7761_p5 = pnand %p7760_p4, %p7754_p1 }
  0x83   :  { %7764 = shalt.err (!%p7761_p5)
}
  0x84   :  { %169 = dma.hbm_to_vmem [thread:$0]  %s9941_s14, 16, %s167_s1, [#allocation22]  }
  0x85   :  { %s7765_s3 = scalar_lea.hbm %s9943_s16, 1536 }
  0x86   :  { %p7766_p6 = scmp.ne.s32.totalorder %s9943_s16, %s7765_s3  ;;  %p7769_p7 = scmp.lt.u32.totalorder %s7765_s3, %s9943_s16 }
  0x88   :  { %p7771_p8 = pnand %p7769_p7, %p7766_p6 }
  0x8a   :  { %7774 = shalt.err (!%p7771_p8)
}
  0x8b   :  { %s7775_s2 = scalar_lea.vmem %s186_s30, 1536  ;;  %p7780_p10 = scmp.lt.s32.totalorder %s186_s30, %s186_s30 }
  0x8c   :  { %p7776_p9 = scmp.ne.s32.totalorder %s186_s30, %s7775_s2  ;;  %p7781_p11 = scmp.lt.s32.totalorder %s7775_s2, %s7775_s2 }
  0x8e   :  { %p7782_p12 = por %p7781_p11, %p7780_p10 }
  0x90   :  { %p7783_p13 = pnand %p7782_p12, %p7776_p9 }
  0x92   :  { %7786 = shalt.err (!%p7783_p13)
}
  0x93   :  { %191 = dma.hbm_to_vmem [thread:$0]  %s9943_s16, 1536, %s186_s30, [#allocation25], %s8054_s4, %s8054_s4, %s8055_s25  }
  0x94   :  { %s8058_s7 = smov [#allocation27]   ;;  %s8059_s12 = smov [#allocation4]  }
  0x95   :  { %s212_s28 = sshll.u32 %s8058_s7, 4  ;;  %s48_s24 = sshll.u32 %s8059_s12, 4  ;;  %s213_s28 = int_to_ptr.vmem [resolvable:$true] %s212_s28  ;;  %s49_s24 = int_to_ptr.vmem [resolvable:$true] %s48_s24 }
  0x96   :  { %s7787_s26 = scalar_lea.hbm %s9947_s20, 16 }
  0x97   :  { %p7788_p0 = scmp.ne.s32.totalorder %s9947_s20, %s7787_s26  ;;  %p7791_p1 = scmp.lt.u32.totalorder %s7787_s26, %s9947_s20 }
  0x99   :  { %p7793_p2 = pnand %p7791_p1, %p7788_p0 }
  0x9b   :  { %7796 = shalt.err (!%p7793_p2)
}
  0x9c   :  { %s7797_s16 = scalar_lea.vmem %s213_s28, 16  ;;  %s7801_s30 = scalar_lea.vmem %s213_s28, 32 }
  0x9d   :  { %p7798_p3 = scmp.ne.s32.totalorder %s213_s28, %s7797_s16  ;;  %p7802_p4 = scmp.lt.s32.totalorder %s213_s28, %s213_s28 }
  0x9e   :  { %p7803_p5 = scmp.lt.s32.totalorder %s7801_s30, %s7797_s16 }
  0xa0   :  { %p7804_p6 = por %p7803_p5, %p7802_p4 }
  0xa2   :  { %p7805_p7 = pnand %p7804_p6, %p7798_p3 }
  0xa4   :  { %7808 = shalt.err (!%p7805_p7)
}
  0xa5   :  { %215 = dma.hbm_to_vmem [thread:$0]  %s9947_s20, 16, %s213_s28, [#allocation28]  }
  0xa6   :  { %s9971_s1 = sld [smem:[#allocation45_spill]] }
  0xac   :  { %s7809_s7 = scalar_lea.hbm %s9971_s1, 16 }
  0xad   :  { %p7810_p8 = scmp.ne.s32.totalorder %s9971_s1, %s7809_s7  ;;  %p7813_p9 = scmp.lt.u32.totalorder %s7809_s7, %s9971_s1 }
  0xaf   :  { %p7815_p10 = pnand %p7813_p9, %p7810_p8 }
  0xb1   :  { %7818 = shalt.err (!%p7815_p10)
}
  0xb2   :  { %s7819_s8 = scalar_lea.vmem %s49_s24, 16  ;;  %s7823_s3 = scalar_lea.vmem %s49_s24, 32 }
  0xb3   :  { %p7820_p11 = scmp.ne.s32.totalorder %s49_s24, %s7819_s8  ;;  %p7824_p12 = scmp.lt.s32.totalorder %s49_s24, %s49_s24 }
  0xb4   :  { %p7825_p13 = scmp.lt.s32.totalorder %s7823_s3, %s7819_s8 }
  0xb6   :  { %p7826_p0 = por %p7825_p13, %p7824_p12 }
  0xb8   :  { %p7827_p1 = pnand %p7826_p0, %p7820_p11 }
  0xba   :  { %7830 = shalt.err (!%p7827_p1)
}
  0xbb   :  { %51 = dma.hbm_to_vmem [thread:$0]  %s9971_s1, 16, %s49_s24, [#allocation5]  }
  0xbc   :  { %s8060_s0 = smov [#allocation8]   ;;  %s8061_s16 = smov [#allocation11]  }
  0xbd   :  { %s70_s5 = sshll.u32 %s8060_s0, 4  ;;  %s89_s30 = sshll.u32 %s8061_s16, 4  ;;  %s71_s5 = int_to_ptr.vmem [resolvable:$true] %s70_s5  ;;  %s90_s30 = int_to_ptr.vmem [resolvable:$true] %s89_s30 }
  0xbe   :  { %s9972_s2 = sld [smem:[#allocation48_spill]] }
  0xc4   :  { %s7831_s14 = scalar_lea.hbm %s9972_s2, 16 }
  0xc5   :  { %p7832_p2 = scmp.ne.s32.totalorder %s9972_s2, %s7831_s14  ;;  %p7835_p3 = scmp.lt.u32.totalorder %s7831_s14, %s9972_s2 }
  0xc7   :  { %p7837_p4 = pnand %p7835_p3, %p7832_p2 }
  0xc9   :  { %7840 = shalt.err (!%p7837_p4)
}
  0xca   :  { %s7841_s24 = scalar_lea.vmem %s71_s5, 16  ;;  %s7845_s1 = scalar_lea.vmem %s71_s5, 32 }
  0xcb   :  { %p7842_p5 = scmp.ne.s32.totalorder %s71_s5, %s7841_s24  ;;  %p7846_p6 = scmp.lt.s32.totalorder %s71_s5, %s71_s5 }
  0xcc   :  { %p7847_p7 = scmp.lt.s32.totalorder %s7845_s1, %s7841_s24 }
  0xce   :  { %p7848_p8 = por %p7847_p7, %p7846_p6 }
  0xd0   :  { %p7849_p9 = pnand %p7848_p8, %p7842_p5 }
  0xd2   :  { %7852 = shalt.err (!%p7849_p9)
}
  0xd3   :  { %73 = dma.hbm_to_vmem [thread:$0]  %s9972_s2, 16, %s71_s5, [#allocation7]  }
  0xd4   :  { %s9973_s28 = sld [smem:[#allocation50_spill]] }
  0xda   :  { %s7853_s0 = scalar_lea.hbm %s9973_s28, 768 }
  0xdb   :  { %p7854_p10 = scmp.ne.s32.totalorder %s9973_s28, %s7853_s0  ;;  %p7857_p11 = scmp.lt.u32.totalorder %s7853_s0, %s9973_s28 }
  0xdd   :  { %p7859_p12 = pnand %p7857_p11, %p7854_p10 }
  0xdf   :  { %7862 = shalt.err (!%p7859_p12)
}
  0xe0   :  { %s7863_s7 = scalar_lea.vmem %s90_s30, 768  ;;  %p7868_p0 = scmp.lt.s32.totalorder %s90_s30, %s90_s30 }
  0xe1   :  { %p7864_p13 = scmp.ne.s32.totalorder %s90_s30, %s7863_s7  ;;  %p7869_p1 = scmp.lt.s32.totalorder %s7863_s7, %s7863_s7 }
  0xe3   :  { %p7870_p2 = por %p7869_p1, %p7868_p0 }
  0xe5   :  { %p7871_p3 = pnand %p7870_p2, %p7864_p13 }
  0xe7   :  { %7874 = shalt.err (!%p7871_p3)
}
  0xe8   :  { %95 = dma.hbm_to_vmem [thread:$0]  %s9973_s28, 768, %s90_s30, [#allocation10], %s8054_s4, %s8054_s4, %s8055_s25  }
  0xe9   :  { %s8062_s12 = smov [#allocation14]   ;;  %s8063_s10 = smov [#allocation17]  }
  0xea   :  { %s112_s29 = sshll.u32 %s8062_s12, 4  ;;  %s134_s24 = sshll.u32 %s8063_s10, 4  ;;  %s113_s29 = int_to_ptr.vmem [resolvable:$true] %s112_s29  ;;  %s135_s24 = int_to_ptr.vmem [resolvable:$true] %s134_s24 }
  0xeb   :  { %s7875_s8 = scalar_lea.hbm %s9936_s9, 16 }
  0xec   :  { %p7876_p4 = scmp.ne.s32.totalorder %s9936_s9, %s7875_s8  ;;  %p7879_p5 = scmp.lt.u32.totalorder %s7875_s8, %s9936_s9 }
  0xee   :  { %p7881_p6 = pnand %p7879_p5, %p7876_p4 }
  0xf0   :  { %7884 = shalt.err (!%p7881_p6)
}
  0xf1   :  { %s7885_s30 = scalar_lea.vmem %s113_s29, 16  ;;  %s7889_s28 = scalar_lea.vmem %s113_s29, 32 }
  0xf2   :  { %p7886_p7 = scmp.ne.s32.totalorder %s113_s29, %s7885_s30  ;;  %p7890_p8 = scmp.lt.s32.totalorder %s113_s29, %s113_s29 }
  0xf3   :  { %p7891_p9 = scmp.lt.s32.totalorder %s7889_s28, %s7885_s30 }
  0xf5   :  { %p7892_p10 = por %p7891_p9, %p7890_p8 }
  0xf7   :  { %p7893_p11 = pnand %p7892_p10, %p7886_p7 }
  0xf9   :  { %7896 = shalt.err (!%p7893_p11)
}
  0xfa   :  { %115 = dma.hbm_to_vmem [thread:$0]  %s9936_s9, 16, %s113_s29, [#allocation13]  }
  0xfb   :  { %s7897_s5 = scalar_lea.hbm %s9938_s11, 16 }
  0xfc   :  { %p7898_p12 = scmp.ne.s32.totalorder %s9938_s11, %s7897_s5  ;;  %p7901_p13 = scmp.lt.u32.totalorder %s7897_s5, %s9938_s11 }
  0xfe   :  { %p7903_p0 = pnand %p7901_p13, %p7898_p12 }
 0x100   :  { %7906 = shalt.err (!%p7903_p0)
}
 0x101   :  { %s7907_s26 = scalar_lea.vmem %s135_s24, 16  ;;  %s7911_s8 = scalar_lea.vmem %s135_s24, 32 }
 0x102   :  { %p7908_p1 = scmp.ne.s32.totalorder %s135_s24, %s7907_s26  ;;  %p7912_p2 = scmp.lt.s32.totalorder %s135_s24, %s135_s24 }
 0x103   :  { %p7913_p3 = scmp.lt.s32.totalorder %s7911_s8, %s7907_s26 }
 0x105   :  { %p7914_p4 = por %p7913_p3, %p7912_p2 }
 0x107   :  { %p7915_p5 = pnand %p7914_p4, %p7908_p1 }
 0x109   :  { %7918 = shalt.err (!%p7915_p5)
}
 0x10a   :  { %137 = dma.hbm_to_vmem [thread:$0]  %s9938_s11, 16, %s135_s24, [#allocation16]  }
 0x10b   :  { %s8064_s3 = smov [#allocation20]   ;;  %s8065_s0 = smov [#allocation23]  }
 0x10c   :  { %s153_s20 = sshll.u32 %s8064_s3, 4  ;;  %s176_s16 = sshll.u32 %s8065_s0, 4  ;;  %s154_s20 = int_to_ptr.vmem [resolvable:$true] %s153_s20  ;;  %s177_s16 = int_to_ptr.vmem [resolvable:$true] %s176_s16 }
 0x10d   :  { %s7919_s6 = scalar_lea.hbm %s9940_s13, 1536 }
 0x10e   :  { %p7920_p6 = scmp.ne.s32.totalorder %s9940_s13, %s7919_s6  ;;  %p7923_p7 = scmp.lt.u32.totalorder %s7919_s6, %s9940_s13 }
 0x110   :  { %p7925_p8 = pnand %p7923_p7, %p7920_p6 }
 0x112   :  { %7928 = shalt.err (!%p7925_p8)
}
 0x113   :  { %s7929_s11 = scalar_lea.vmem %s154_s20, 1536  ;;  %p7934_p10 = scmp.lt.s32.totalorder %s154_s20, %s154_s20 }
 0x114   :  { %p7930_p9 = scmp.ne.s32.totalorder %s154_s20, %s7929_s11  ;;  %p7935_p11 = scmp.lt.s32.totalorder %s7929_s11, %s7929_s11 }
 0x116   :  { %p7936_p12 = por %p7935_p11, %p7934_p10 }
 0x118   :  { %p7937_p13 = pnand %p7936_p12, %p7930_p9 }
 0x11a   :  { %7940 = shalt.err (!%p7937_p13)
}
 0x11b   :  { %159 = dma.hbm_to_vmem [thread:$0]  %s9940_s13, 1536, %s154_s20, [#allocation19], %s8054_s4, %s8054_s4, %s8055_s25  }
 0x11c   :  { %s7941_s1 = scalar_lea.hbm %s9942_s15, 16 }
 0x11d   :  { %p7942_p0 = scmp.ne.s32.totalorder %s9942_s15, %s7941_s1  ;;  %p7945_p1 = scmp.lt.u32.totalorder %s7941_s1, %s9942_s15 }
 0x11f   :  { %p7947_p2 = pnand %p7945_p1, %p7942_p0 }
 0x121   :  { %7950 = shalt.err (!%p7947_p2)
}
 0x122   :  { %s7951_s3 = scalar_lea.vmem %s177_s16, 16  ;;  %s7955_s0 = scalar_lea.vmem %s177_s16, 32 }
 0x123   :  { %p7952_p3 = scmp.ne.s32.totalorder %s177_s16, %s7951_s3  ;;  %p7956_p4 = scmp.lt.s32.totalorder %s177_s16, %s177_s16 }
 0x124   :  { %p7957_p5 = scmp.lt.s32.totalorder %s7955_s0, %s7951_s3 }
 0x126   :  { %p7958_p6 = por %p7957_p5, %p7956_p4 }
 0x128   :  { %p7959_p7 = pnand %p7958_p6, %p7952_p3 }
 0x12a   :  { %7962 = shalt.err (!%p7959_p7)
}
 0x12b   :  { %179 = dma.hbm_to_vmem [thread:$0]  %s9942_s15, 16, %s177_s16, [#allocation22]  }
 0x12c   :  { %s8066_s30 = smov [#allocation26]   ;;  %s8067_s6 = smov [#allocation29]  }
 0x12d   :  { %s198_s28 = sshll.u32 %s8066_s30, 4  ;;  %s221_s27 = sshll.u32 %s8067_s6, 4  ;;  %s199_s28 = int_to_ptr.vmem [resolvable:$true] %s198_s28  ;;  %s222_s27 = int_to_ptr.vmem [resolvable:$true] %s221_s27 }
 0x12e   :  { %s7963_s5 = scalar_lea.hbm %s9944_s17, 16 }
 0x12f   :  { %p7964_p8 = scmp.ne.s32.totalorder %s9944_s17, %s7963_s5  ;;  %p7967_p9 = scmp.lt.u32.totalorder %s7963_s5, %s9944_s17 }
 0x131   :  { %p7969_p10 = pnand %p7967_p9, %p7964_p8 }
 0x133   :  { %7972 = shalt.err (!%p7969_p10)
}
 0x134   :  { %s7973_s15 = scalar_lea.vmem %s199_s28, 16  ;;  %s7977_s16 = scalar_lea.vmem %s199_s28, 32 }
 0x135   :  { %p7974_p11 = scmp.ne.s32.totalorder %s199_s28, %s7973_s15  ;;  %p7978_p12 = scmp.lt.s32.totalorder %s199_s28, %s199_s28 }
 0x136   :  { %p7979_p13 = scmp.lt.s32.totalorder %s7977_s16, %s7973_s15 }
 0x138   :  { %p7980_p0 = por %p7979_p13, %p7978_p12 }
 0x13a   :  { %p7981_p1 = pnand %p7980_p0, %p7974_p11 }
 0x13c   :  { %7984 = shalt.err (!%p7981_p1)
}
 0x13d   :  { %201 = dma.hbm_to_vmem [thread:$0]  %s9944_s17, 16, %s199_s28, [#allocation25]  }
 0x13e   :  { %s7985_s9 = scalar_lea.hbm %s9948_s21, 512 }
 0x13f   :  { %p7986_p2 = scmp.ne.s32.totalorder %s9948_s21, %s7985_s9  ;;  %p7989_p3 = scmp.lt.u32.totalorder %s7985_s9, %s9948_s21 }
 0x141   :  { %p7991_p4 = pnand %p7989_p3, %p7986_p2 }
 0x143   :  { %7994 = shalt.err (!%p7991_p4)
}
 0x144   :  { %s7995_s20 = scalar_lea.vmem %s222_s27, 512  ;;  %p8000_p6 = scmp.lt.s32.totalorder %s222_s27, %s222_s27 }
 0x145   :  { %p7996_p5 = scmp.ne.s32.totalorder %s222_s27, %s7995_s20  ;;  %p8001_p7 = scmp.lt.s32.totalorder %s7995_s20, %s7995_s20 }
 0x147   :  { %p8002_p8 = por %p8001_p7, %p8000_p6 }
 0x149   :  { %p8003_p9 = pnand %p8002_p8, %p7996_p5 }
 0x14b   :  { %8006 = shalt.err (!%p8003_p9)
}
 0x14c   :  { %227 = dma.hbm_to_vmem [thread:$0]  %s9948_s21, 512, %s222_s27, [#allocation28], %s8054_s4, %s8054_s4, %s8055_s25  }
 0x14d   :  { %s8068_s28 = smov [#allocation30]   ;;  %s8007_s5 = scalar_lea.hbm %s9949_s22, 16 }
 0x14e   :  { %s234_s6 = sshll.u32 %s8068_s28, 4  ;;  %p8008_p10 = scmp.ne.s32.totalorder %s9949_s22, %s8007_s5  ;;  %s235_s6 = int_to_ptr.vmem [resolvable:$true] %s234_s6 }
 0x14f   :  { %p8011_p11 = scmp.lt.u32.totalorder %s8007_s5, %s9949_s22 }
 0x151   :  { %p8013_p12 = pnand %p8011_p11, %p8008_p10 }
 0x153   :  { %8016 = shalt.err (!%p8013_p12)
}
 0x154   :  { %s8017_s15 = scalar_lea.vmem %s235_s6, 16  ;;  %s8021_s21 = scalar_lea.vmem %s235_s6, 32 }
 0x155   :  { %p8018_p13 = scmp.ne.s32.totalorder %s235_s6, %s8017_s15  ;;  %p8022_p0 = scmp.lt.s32.totalorder %s235_s6, %s235_s6 }
 0x156   :  { %p8023_p1 = scmp.lt.s32.totalorder %s8021_s21, %s8017_s15 }
 0x158   :  { %p8024_p2 = por %p8023_p1, %p8022_p0 }
 0x15a   :  { %p8025_p3 = pnand %p8024_p2, %p8018_p13 }
 0x15c   :  { %8028 = shalt.err (!%p8025_p3)
}
 0x15d   :  { %237 = dma.hbm_to_vmem [thread:$0]  %s9949_s22, 16, %s235_s6, [#allocation31]  }
 0x15e   :  { %8029 = dma.done.wait [#allocation5], 16  }
 0x15f   :  { %8030 = vsyncadd [#allocation5], 4294967280 }
 0x160   :  { %8031 = dma.done.wait [#allocation7], 32  }
 0x161   :  { %8032 = vsyncadd [#allocation7], 4294967264 }
 0x162   :  { %8033 = dma.done.wait [#allocation10], 784  }
 0x163   :  { %8034 = vsyncadd [#allocation10], 4294966512 }
 0x164   :  { %8035 = dma.done.wait [#allocation13], 32  }
 0x165   :  { %8036 = vsyncadd [#allocation13], 4294967264 }
 0x166   :  { %8037 = dma.done.wait [#allocation16], 784  }
 0x167   :  { %8038 = vsyncadd [#allocation16], 4294966512 }
 0x168   :  { %8039 = dma.done.wait [#allocation19], 1552  }
 0x169   :  { %8040 = vsyncadd [#allocation19], 4294965744 }
 0x16a   :  { %8041 = dma.done.wait [#allocation22], 32  }
 0x16b   :  { %8042 = vsyncadd [#allocation22], 4294967264 }
 0x16c   :  { %8043 = dma.done.wait [#allocation25], 1552  }
 0x16d   :  { %8044 = vsyncadd [#allocation25], 4294965744 }
 0x16e   :  { %8045 = dma.done.wait [#allocation28], 528  }
 0x16f   :  { %8046 = vsyncadd [#allocation28], 4294966768 }
 0x170   :  { %8047 = dma.done.wait [#allocation31], 16  }
 0x171   :  { %8048 = vsyncadd [#allocation31], 4294967280  ;;  %v8069_v0 = vmov 0   ;;  %s9974_s16 = sld [smem:[#allocation43_spill]]  ;;  %vm309_vm0 = vcmask 1040384   ;;  %vm330_vm1 = vcmask 1046528  }
 0x172   :  { %7553 = vset.pattern.permute.xlu1 %v8069_v0  ;;  %7554 = vset.pattern.permute.xlu0 %v8069_v0  ;;  %s9975_s5 = sld [smem:[#allocation47_spill]]  ;;  %s9976_s4 = sld [smem:[#allocation44_spill]]  ;;  %v8504_v63 = vld [vmem:[#allocation4] ss:$0 sm:$0xff]  ;;  %vm632_vm2 = vcmask 261120   ;;  %vm3394_vm3 = vcmask 253952  }
 0x173   :  { %vm3751_vm4 = vcmask 523264   ;;  %vm8071_vm5 = vmmov 0   ;;  %vm6078_vm6 = vcmask 257024  }
 0x177   :  { %v293_v1 = vld [vmem:[%s9974_s16] sm:$0xff]  ;;  %v294_v2 = vld [vmem:[%s9974_s16 + $0x8] sm:$0xff]  ;;  %v295_v3 = vld [vmem:[%s9974_s16 + $0x10] sm:$0xff] }
 0x178   :  { %402 = vperm.xlu1 %7553, %v293_v1   ;;  %v310_v4 = vrot.slane %v293_v1, 7  ;;  %v311_v5 = vrot.slane %v294_v2, 7  ;;  %v296_v6 = vld [vmem:[%s9974_s16 + $0x18] sm:$0xff]  ;;  %v313_v7 = vrot.slane %v295_v3, 7  ;;  %v332_v10 = vrot.slane %v294_v2, 1  ;;  %v297_v12 = vld [vmem:[%s9974_s16 + $0x20] sm:$0xff] }
 0x179   :  { %v314_v8 = vrot.slane %v296_v6, 7  ;;  %v335_v11 = vrot.slane %v296_v6, 1  ;;  %v298_v14 = vld [vmem:[%s9974_s16 + $0x28] sm:$0xff]  ;;  %v331_v15 = vrot.slane %v293_v1, 1  ;;  %v334_v18 = vrot.slane %v295_v3, 1  ;;  %v299_v23 = vld [vmem:[%s9974_s16 + $0x30] sm:$0xff] }
 0x17a   :  { %v326_v9 = vsel %vm309_vm0, 0.0, %v310_v4  ;;  %v312_v13 = vsel %vm309_vm0, %v310_v4, %v311_v5  ;;  %v327_v17 = vsel %vm309_vm0, 0.0, %v313_v7  ;;  %v347_v19 = vsel %vm330_vm1, %v332_v10, 0.0  ;;  %v300_v24 = vld [vmem:[%s9974_s16 + $0x38] sm:$0xff]  ;;  %v8461_v35 = vld [vmem:[%s9975_s5 + $0x10] sm:$0xff]   ;;  %v8480_v43 = vld [vmem:[%s9975_s5] sm:$0xff]  }
 0x17b   :  { %354 = vperm.xlu0 %7554, %v326_v9   ;;  %v315_v16 = vsel %vm309_vm0, %v313_v7, %v314_v8  ;;  %v316_v20 = vrot.slane %v297_v12, 7  ;;  %v348_v21 = vsel %vm330_vm1, %v335_v11, 0.0  ;;  %v317_v22 = vrot.slane %v298_v14, 7  ;;  %6653 = vmatprep.subr.bf16.mxu0 %v8461_v35  ;;  %v8469_v38 = vld [vmem:[%s9975_s5 + $0x18] sm:$0xff]   ;;  %v8486_v50 = vld [vmem:[%s9976_s4 + $0x1] ss:$0 sm:$0xff] }
 0x17c   :  { %406 = vperm.xlu1 %7553, %v294_v2   ;;  %v319_v26 = vrot.slane %v299_v23, 7  ;;  %v333_v27 = vsel %vm330_vm1, %v331_v15, %v332_v10  ;;  %v320_v28 = vrot.slane %v300_v24, 7  ;;  %v338_v29 = vrot.slane %v298_v14, 1  ;;  %6654 = vmatpush3.bf16.msra.mxu0 %v8461_v35  ;;  %v8491_v51 = vld [vmem:[%s9976_s4] ss:$0 sm:$0xff] }
 0x17d   :  { %v328_v25 = vsel %vm309_vm0, 0.0, %v316_v20  ;;  %v337_v30 = vrot.slane %v297_v12, 1  ;;  %v341_v31 = vrot.slane %v300_v24, 1  ;;  %v336_v32 = vsel %vm330_vm1, %v334_v18, %v335_v11  ;;  %6655 = vmatprep.subr.bf16.mxu0 %v8469_v38  ;;  %v8497_v54 = vld [vmem:[%s9976_s4 + $0x2] ss:$0 sm:$0xff] }
 0x17e   :  { %v318_v33 = vsel %vm309_vm0, %v316_v20, %v317_v22  ;;  %v329_v34 = vsel %vm309_vm0, 0.0, %v319_v26  ;;  %v321_v36 = vsel %vm309_vm0, %v319_v26, %v320_v28  ;;  %v340_v37 = vrot.slane %v299_v23, 1  ;;  %v8509_v8 = vld [vmem:[#allocation6] ss:$0 sm:$0xff] }
 0x17f   :  { %358 = vperm.xlu0 %7554, %v312_v13   ;;  %v349_v39 = vsel %vm330_vm1, %v338_v29, 0.0  ;;  %v350_v40 = vsel %vm330_vm1, %v341_v31, 0.0  ;;  %v339_v41 = vsel %vm330_vm1, %v337_v30, %v338_v29 }
 0x180   :  { %367 = vperm.xlu1 %7553, %v315_v16   ;;  %6656 = vmatpush3.bf16.msra.mxu0 %v8469_v38  ;;  %v342_v42 = vsel %vm330_vm1, %v340_v37, %v341_v31  ;;  %v8538_v37 = vld [vmem:[%s9975_s5 + $0x8] sm:$0xff]  }
 0x181   :  { %6665 = vmatprep.subr.bf16.mxu0 %v8480_v43 }
 0x183   :  { %363 = vperm.xlu0 %7554, %v327_v17  }
 0x184   :  { %414 = vperm.xlu1 %7553, %v296_v6  }
 0x187   :  { %410 = vperm.xlu0 %7554, %v295_v3  }
 0x188   :  { %460 = vperm.xlu1 %7553, %v347_v19  }
 0x18b   :  { %455 = vperm.xlu0 %7554, %v333_v27  }
 0x18c   :  { %469 = vperm.xlu1 %7553, %v348_v21  }
 0x18f   :  { %464 = vperm.xlu0 %7554, %v336_v32  }
 0x190   :  { %376 = vperm.xlu1 %7553, %v318_v33  }
 0x193   :  { %372 = vperm.xlu0 %7554, %v328_v25  }
 0x194   :  { %422 = vperm.xlu1 %7553, %v298_v14  }
 0x197   :  { %418 = vperm.xlu0 %7554, %v297_v12  }
 0x198   :  { %385 = vperm.xlu1 %7553, %v321_v36  }
 0x19b   :  { %381 = vperm.xlu0 %7554, %v329_v34  }
 0x19c   :  { %430 = vperm.xlu1 %7553, %v300_v24  }
 0x19f   :  { %426 = vperm.xlu0 %7554, %v299_v23  }
 0x1a0   :  { %478 = vperm.xlu1 %7553, %v349_v39  }
 0x1a3   :  { %473 = vperm.xlu0 %7554, %v339_v41  }
 0x1a4   :  { %487 = vperm.xlu1 %7553, %v350_v40  }
 0x1a7   :  { %482 = vperm.xlu0 %7554, %v342_v42   ;;  %v8547_v42 = vld [vmem:[%s9975_s5 + $0x20] sm:$0xff]  }
 0x1f7   :  { %v403_v44 = vpop.permute.xlu1 %402 }
 0x1f8   :  { %v437_v57 = vmul.f32 %v8486_v50, %v403_v44 }
 0x1fa   :  { %v355_v45 = vpop.permute.xlu0 %354 }
 0x1fb   :  { %v407_v46 = vpop.permute.xlu1 %406  ;;  %v392_v58 = vmul.f32 %v8491_v51, %v355_v45 }
 0x1fc   :  { %v438_v55 = vmul.f32 %v8486_v50, %v407_v46 }
 0x1fd   :  { %v445_v3 = vadd.f32 %v437_v57, %v392_v58 }
 0x1fe   :  { %v359_v47 = vpop.permute.xlu0 %358 }
 0x1ff   :  { %v368_v48 = vpop.permute.xlu1 %367  ;;  %v393_v53 = vmul.f32 %v8491_v51, %v359_v47 }
 0x200   :  { %v395_v0 = vmul.f32 %v8491_v51, %v368_v48 }
 0x201   :  { %v446_v60 = vadd.f32 %v438_v55, %v393_v53 }
 0x202   :  { %v364_v49 = vpop.permute.xlu0 %363 }
 0x203   :  { %v415_v52 = vpop.permute.xlu1 %414  ;;  %v394_v11 = vmul.f32 %v8491_v51, %v364_v49 }
 0x204   :  { %v440_v61 = vmul.f32 %v8486_v50, %v415_v52 }
 0x206   :  { %v411_v56 = vpop.permute.xlu0 %410  ;;  %v448_v7 = vadd.f32 %v440_v61, %v395_v0 }
 0x207   :  { %v461_v59 = vpop.permute.xlu1 %460  ;;  %v439_v4 = vmul.f32 %v8486_v50, %v411_v56 }
 0x208   :  { %v495_v62 = vmul.f32 %v8497_v54, %v461_v59 }
 0x209   :  { %v447_v15 = vadd.f32 %v439_v4, %v394_v11 }
 0x20a   :  { %v503_v1 = vadd.f32 %v495_v62, %v446_v60  ;;  %v456_v2 = vpop.permute.xlu0 %455 }
 0x20b   :  { %v494_v5 = vmul.f32 %v8497_v54, %v456_v2  ;;  %v470_v6 = vpop.permute.xlu1 %469 }
 0x20c   :  { %v518_v9 = vmul.f32 %v8504_v63, %v503_v1  ;;  %v497_v10 = vmul.f32 %v8497_v54, %v470_v6 }
 0x20d   :  { %v502_v12 = vadd.f32 %v494_v5, %v445_v3 }
 0x20e   :  { %v505_v13 = vadd.f32 %v497_v10, %v448_v7  ;;  %v465_v14 = vpop.permute.xlu0 %464  ;;  %v533_v16 = vadd.f32 %v8509_v8, %v518_v9 }
 0x20f   :  { %v517_v17 = vmul.f32 %v8504_v63, %v502_v12  ;;  %v496_v18 = vmul.f32 %v8497_v54, %v465_v14  ;;  %v377_v19 = vpop.permute.xlu1 %376 }
 0x210   :  { %v520_v20 = vmul.f32 %v8504_v63, %v505_v13  ;;  %v8519_v24 = vmax.f32 %v533_v16, 0.0  ;;  %v397_v44 = vmul.f32 %v8491_v51, %v377_v19 }
 0x211   :  { %v532_v21 = vadd.f32 %v8509_v8, %v517_v17  ;;  %v504_v22 = vadd.f32 %v496_v18, %v447_v15 }
 0x212   :  { %v373_v23 = vpop.permute.xlu0 %372  ;;  %v535_v26 = vadd.f32 %v8509_v8, %v520_v20  ;;  %v557_v18 = vrot.slane %v8519_v24, 7 }
 0x213   :  { %v8521_v25 = vmax.f32 %v532_v21, 0.0  ;;  %v519_v27 = vmul.f32 %v8504_v63, %v504_v22  ;;  %v423_v28 = vpop.permute.xlu1 %422  ;;  %v396_v53 = vmul.f32 %v8491_v51, %v373_v23 }
 0x214   :  { %v8528_v32 = vmax.f32 %v535_v26, 0.0  ;;  %v442_v41 = vmul.f32 %v8486_v50, %v423_v28 }
 0x215   :  { %v534_v29 = vadd.f32 %v8509_v8, %v519_v27  ;;  %v612_v30 = vpack.c.bf16 %v8519_v24, %v8521_v25  ;;  %v556_v13 = vrot.slane %v8521_v25, 7 }
 0x216   :  { %v419_v31 = vpop.permute.xlu0 %418  ;;  %v450_v48 = vadd.f32 %v442_v41, %v397_v44  ;;  %v560_v27 = vrot.slane %v8528_v32, 7  ;;  %v580_v44 = vrot.slane %v8521_v25, 1 }
 0x217   :  { %v8530_v33 = vmax.f32 %v534_v29, 0.0  ;;  %v386_v34 = vpop.permute.xlu1 %385  ;;  %6657 = vmatprep.mubr.msk.bf16.mxu0 %vm632_vm2, %v612_v30  ;;  %v441_v46 = vmul.f32 %v8486_v50, %v419_v31  ;;  %v558_v21 = vsel %vm309_vm0, %v556_v13, %v557_v18  ;;  %v576_v22 = vsel %vm309_vm0, 0.0, %v556_v13  ;;  %v8650_v13 = vld [vmem:[#allocation9] ss:$0 sm:$0xff] }
 0x218   :  { %v399_v55 = vmul.f32 %v8491_v51, %v386_v34  ;;  %v604_v23 = vpack.c.bf16 %v558_v21, %v576_v22 }
 0x219   :  { %v613_v36 = vpack.c.bf16 %v8528_v32, %v8530_v33  ;;  %v449_v58 = vadd.f32 %v441_v46, %v396_v53  ;;  %v581_v46 = vrot.slane %v8519_v24, 1 }
 0x21a   :  { %v382_v39 = vpop.permute.xlu0 %381 }
 0x21b   :  { %v431_v40 = vpop.permute.xlu1 %430  ;;  %6658 = vmatmul.mubr.msk.bf16.vlgmr.msra.gmra.mrb[0].mxu0 %vm632_vm2, %v613_v36  ;;  %v398_v2 = vmul.f32 %v8491_v51, %v382_v39  ;;  %v8600_v39 = vld [vmem:[%s9975_s5 + $0x28] sm:$0xff]   ;;  %v600_v53 = vsel %vm330_vm1, %v581_v46, 0.0 }
 0x21c   :  { %6666 = vmatpush3.bf16.msra.mxu0 %v8480_v43  ;;  %v444_v49 = vmul.f32 %v8486_v50, %v431_v40 }
 0x21d   :  { %6667 = vmatprep.subr.bf16.mxu0 %v8538_v37 }
 0x21e   :  { %v427_v45 = vpop.permute.xlu0 %426  ;;  %v452_v62 = vadd.f32 %v444_v49, %v399_v55  ;;  %v582_v49 = vsel %vm330_vm1, %v580_v44, %v581_v46 }
 0x21f   :  { %v479_v47 = vpop.permute.xlu1 %478  ;;  %v443_v59 = vmul.f32 %v8486_v50, %v427_v45  ;;  %v799_v55 = vpack.c.bf16 %v600_v53, %v582_v49 }
 0x220   :  { %v499_v52 = vmul.f32 %v8497_v54, %v479_v47  ;;  %6668 = vmatpush3.bf16.msra.mxu0 %v8538_v37 }
 0x221   :  { %6677 = vmatprep.subr.bf16.mxu0 %v8547_v42  ;;  %v451_v6 = vadd.f32 %v443_v59, %v398_v2 }
 0x222   :  { %v507_v56 = vadd.f32 %v499_v52, %v450_v48  ;;  %v474_v57 = vpop.permute.xlu0 %473 }
 0x223   :  { %v498_v60 = vmul.f32 %v8497_v54, %v474_v57  ;;  %v488_v61 = vpop.permute.xlu1 %487 }
 0x224   :  { %v522_v0 = vmul.f32 %v8504_v63, %v507_v56  ;;  %v501_v1 = vmul.f32 %v8497_v54, %v488_v61  ;;  %v583_v56 = vrot.slane %v8530_v33, 1 }
 0x225   :  { %v506_v3 = vadd.f32 %v498_v60, %v449_v58  ;;  %v584_v58 = vrot.slane %v8528_v32, 1 }
 0x226   :  { %v509_v4 = vadd.f32 %v501_v1, %v452_v62  ;;  %v483_v5 = vpop.permute.xlu0 %482  ;;  %v537_v7 = vadd.f32 %v8509_v8, %v522_v0 }
 0x227   :  { %v521_v9 = vmul.f32 %v8504_v63, %v506_v3  ;;  %v500_v50 = vmul.f32 %v8497_v54, %v483_v5  ;;  %v585_v60 = vsel %vm330_vm1, %v583_v56, %v584_v58  ;;  %v601_v62 = vsel %vm330_vm1, %v584_v58, 0.0 }
 0x228   :  { %v524_v10 = vmul.f32 %v8504_v63, %v509_v4  ;;  %v8568_v14 = vmax.f32 %v537_v7, 0.0  ;;  %v800_v0 = vpack.c.bf16 %v601_v62, %v585_v60 }
 0x229   :  { %v536_v11 = vadd.f32 %v8509_v8, %v521_v9  ;;  %v508_v12 = vadd.f32 %v500_v50, %v451_v6  ;;  %v8632_v9 = vld [vmem:[#allocation11 + $0x10] sm:$0xff]   ;;  %v8638_v50 = vld [vmem:[#allocation11 + $0x18] sm:$0xff]  }
 0x22a   :  { %v539_v15 = vadd.f32 %v8509_v8, %v524_v10  ;;  %v563_v28 = vrot.slane %v8568_v14, 7  ;;  %v587_v59 = vrot.slane %v8568_v14, 1  ;;  %7313 = vmatprep.subr.bf16.mxu1 %v8632_v9  ;;  %v8645_v10 = vld [vmem:[#allocation11] sm:$0xff]  }
 0x22b   :  { %v8570_v51 = vmax.f32 %v536_v11, 0.0  ;;  %v523_v16 = vmul.f32 %v8504_v63, %v508_v12  ;;  %7315 = vmatpush3.bf16.msra.mxu1 %v8632_v9  ;;  %v8648_v11 = vld [vmem:[#allocation8] ss:$0 sm:$0xff] }
 0x22c   :  { %v8578_v19 = vmax.f32 %v539_v15, 0.0  ;;  %v602_v1 = vsel %vm330_vm1, %v587_v59, 0.0  ;;  %7314 = vmatprep.subr.bf16.mxu1 %v8638_v50 }
 0x22d   :  { %v538_v17 = vadd.f32 %v8509_v8, %v523_v16  ;;  %v614_v54 = vpack.c.bf16 %v8568_v14, %v8570_v51  ;;  %v559_v8 = vrot.slane %v8530_v33, 7  ;;  %v562_v26 = vrot.slane %v8570_v51, 7 }
 0x22e   :  { %v566_v45 = vrot.slane %v8578_v19, 7  ;;  %v586_v57 = vrot.slane %v8570_v51, 1  ;;  %v590_v4 = vrot.slane %v8578_v19, 1 }
 0x22f   :  { %v8580_v20 = vmax.f32 %v538_v17, 0.0  ;;  %6661 = vmatprep.mubr.msk.bf16.mxu0 %vm632_vm2, %v614_v54  ;;  %v561_v29 = vsel %vm309_vm0, %v559_v8, %v560_v27  ;;  %v577_v30 = vsel %vm309_vm0, 0.0, %v559_v8  ;;  %v564_v31 = vsel %vm309_vm0, %v562_v26, %v563_v28  ;;  %7316 = vmatpush3.bf16.msra.mxu1 %v8638_v50 }
 0x230   :  { %v578_v34 = vsel %vm309_vm0, 0.0, %v562_v26  ;;  %v605_v36 = vpack.c.bf16 %v561_v29, %v577_v30  ;;  %v588_v61 = vsel %vm330_vm1, %v586_v57, %v587_v59  ;;  %v603_v6 = vsel %vm330_vm1, %v590_v4, 0.0  ;;  %6701 = vmatprep.subr.bf16.mxu1 %v8645_v10 }
 0x231   :  { %v615_v63 = vpack.c.bf16 %v8578_v19, %v8580_v20  ;;  %v606_v40 = vpack.c.bf16 %v564_v31, %v578_v34  ;;  %v565_v41 = vrot.slane %v8580_v20, 7  ;;  %v801_v2 = vpack.c.bf16 %v602_v1, %v588_v61 }
 0x232   :  { %v589_v3 = vrot.slane %v8580_v20, 1 }
 0x233   :  { %6662 = vmatmul.mubr.msk.bf16.gmra.mrb[4].mxu0 %vm632_vm2, %v615_v63  ;;  %v567_v47 = vsel %vm309_vm0, %v565_v41, %v566_v45  ;;  %v579_v48 = vsel %vm309_vm0, 0.0, %v565_v41 }
 0x234   :  { %6669 = vmatprep.mubr.msk.bf16.mxu0 %vm632_vm2, %v604_v23  ;;  %v607_v52 = vpack.c.bf16 %v567_v47, %v579_v48  ;;  %v591_v5 = vsel %vm330_vm1, %v589_v3, %v590_v4 }
 0x235   :  { %v802_v7 = vpack.c.bf16 %v603_v6, %v591_v5 }
 0x23b   :  { %6670 = vmatmul.mubr.msk.bf16.vlgmr.msra.gmra.mrb[0].mxu0 %vm632_vm2, %v605_v36 }
 0x23c   :  { %6678 = vmatpush3.bf16.msra.mxu0 %v8547_v42  ;;  %6673 = vmatprep.mubr.msk.bf16.mxu0 %vm632_vm2, %v606_v40 }
 0x23d   :  { %6679 = vmatprep.subr.bf16.mxu0 %v8600_v39 }
 0x240   :  { %6680 = vmatpush3.bf16.msra.mxu0 %v8600_v39 }
 0x241   :  { %6689 = vmatprep.subr.bf16.mxu0 %v8632_v9 }
 0x243   :  { %6674 = vmatmul.mubr.msk.bf16.gmra.mrb[4].mxu0 %vm632_vm2, %v607_v52 }
 0x244   :  { %6681 = vmatprep.mubr.msk.bf16.mxu0 %vm632_vm2, %v799_v55 }
 0x24b   :  { %6682 = vmatmul.mubr.msk.bf16.vlgmr.msra.gmra.mrb[0].mxu0 %vm632_vm2, %v800_v0 }
 0x24c   :  { %6685 = vmatprep.mubr.msk.bf16.mxu0 %vm632_vm2, %v801_v2  ;;  %6690 = vmatpush3.bf16.msra.mxu0 %v8632_v9 }
 0x24d   :  { %6691 = vmatprep.subr.bf16.mxu0 %v8638_v50 }
 0x250   :  { %6692 = vmatpush3.bf16.msra.mxu0 %v8638_v50 }
 0x251   :  { %6725 = vmatprep.subr.bf16.mxu0 %v8461_v35 }
 0x253   :  { %6686 = vmatmul.mubr.msk.bf16.gmra.mrb[4].mxu0 %vm632_vm2, %v802_v7 }
 0x31e   :  { %v6683_v12 = vpop.f32.mrb[0].mxu0 }
 0x31f   :  { %v913_v15 = vmul.f32 %v6683_v12, %v8648_v11  ;;  %v865_v16 = vpop.f32.mrb[1].mxu0 }
 0x320   :  { %v911_v17 = vmul.f32 %v8648_v11, %v865_v16  ;;  %v6684_v54 = vpop.f32.mrb[2].mxu0 }
 0x321   :  { %v928_v18 = vadd.f32 %v8650_v13, %v913_v15  ;;  %v914_v21 = vmul.f32 %v6684_v54, %v8648_v11  ;;  %v868_v22 = vpop.f32.mrb[3].mxu0 }
 0x322   :  { %v926_v63 = vadd.f32 %v8650_v13, %v911_v17  ;;  %v912_v23 = vmul.f32 %v8648_v11, %v868_v22 }
 0x323   :  { %v936_v8 = vmax.f32 %v928_v18, 0.0  ;;  %v929_v26 = vadd.f32 %v8650_v13, %v914_v21 }
 0x324   :  { %v934_v27 = vmax.f32 %v926_v63, 0.0  ;;  %v927_v28 = vadd.f32 %v8650_v13, %v912_v23 }
 0x325   :  { %v953_v29 = vrot.slane %v936_v8, 7  ;;  %v937_v30 = vmax.f32 %v929_v26, 0.0  ;;  %v977_v31 = vrot.slane %v936_v8, 1 }
 0x326   :  { %v950_v34 = vrot.slane %v934_v27, 7  ;;  %v974_v36 = vrot.slane %v934_v27, 1  ;;  %v935_v40 = vmax.f32 %v927_v28, 0.0  ;;  %v6687_v41 = vpop.f32.mrb[4].mxu0 }
 0x327   :  { %v8661_v44 = vsel %vm309_vm0, 0.0, %v953_v29  ;;  %v954_v45 = vrot.slane %v937_v30, 7  ;;  %v978_v46 = vrot.slane %v937_v30, 1  ;;  %v1007_v47 = vpack.c.bf16 %v937_v30, %v936_v8  ;;  %v881_v48 = vpop.f32.mrb[5].mxu0 }
 0x328   :  { %v951_v49 = vrot.slane %v935_v40, 7  ;;  %v975_v52 = vrot.slane %v935_v40, 1  ;;  %v917_v53 = vmul.f32 %v6687_v41, %v8648_v11  ;;  %v915_v55 = vmul.f32 %v8648_v11, %v881_v48  ;;  %v6688_v56 = vpop.f32.mrb[6].mxu0 }
 0x329   :  { %v955_v57 = vsel %vm309_vm0, %v953_v29, %v954_v45  ;;  %v8667_v58 = vsel %vm330_vm1, %v977_v31, %v978_v46  ;;  %v8670_v59 = vsel %vm330_vm1, %v978_v46, 0.0  ;;  %v918_v60 = vmul.f32 %v6688_v56, %v8648_v11  ;;  %v884_v61 = vpop.f32.mrb[7].mxu0 }
 0x32a   :  { %v1193_v62 = vpack.c.bf16 %v8670_v59, %v8667_v58  ;;  %v932_v0 = vadd.f32 %v8650_v13, %v917_v53  ;;  %v930_v1 = vadd.f32 %v8650_v13, %v915_v55  ;;  %v916_v2 = vmul.f32 %v8648_v11, %v884_v61  ;;  %v8710_v61 = vld [vmem:[#allocation11 + $0x28] sm:$0xff]   ;;  %v8730_v58 = vld [vmem:[#allocation12] ss:$0 sm:$0xff] }
 0x32b   :  { %v933_v3 = vadd.f32 %v8650_v13, %v918_v60  ;;  %v1006_v4 = vpack.c.bf16 %v935_v40, %v934_v27  ;;  %v952_v5 = vsel %vm309_vm0, %v950_v34, %v951_v49  ;;  %v970_v6 = vsel %vm309_vm0, 0.0, %v950_v34  ;;  %v8706_v60 = vld [vmem:[#allocation11 + $0x20] sm:$0xff]  }
 0x32c   :  { %v940_v7 = vmax.f32 %v932_v0, 0.0  ;;  %v938_v12 = vmax.f32 %v930_v1, 0.0  ;;  %v931_v15 = vadd.f32 %v8650_v13, %v916_v2  ;;  %v998_v16 = vpack.c.bf16 %v952_v5, %v970_v6  ;;  %v8732_v5 = vld [vmem:[#allocation14] ss:$0 sm:$0xff] }
 0x32d   :  { %v941_v17 = vmax.f32 %v933_v3, 0.0  ;;  %6693 = vmatprep.mubr.msk.bf16.mxu0 %vm632_vm2, %v1006_v4  ;;  %v999_v54 = vpack.c.bf16 %v955_v57, %v8661_v44  ;;  %v976_v18 = vsel %vm330_vm1, %v974_v36, %v975_v52  ;;  %v994_v21 = vsel %vm330_vm1, %v975_v52, 0.0  ;;  %v8691_v44 = vld [vmem:[#allocation11 + $0x8] sm:$0xff]  }
 0x32e   :  { %v959_v22 = vrot.slane %v940_v7, 7  ;;  %v956_v63 = vrot.slane %v938_v12, 7  ;;  %6694 = vmatmul.mubr.msk.bf16.vlgmr.msra.gmra.mrb[8].mxu0 %vm632_vm2, %v1007_v47  ;;  %v939_v26 = vmax.f32 %v931_v15, 0.0  ;;  %v983_v28 = vrot.slane %v940_v7, 1 }
 0x32f   :  { %v960_v23 = vrot.slane %v941_v17, 7  ;;  %v984_v8 = vrot.slane %v941_v17, 1  ;;  %v1009_v27 = vpack.c.bf16 %v941_v17, %v940_v7  ;;  %6726 = vmatpush3.bf16.msra.mxu0 %v8461_v35  ;;  %v980_v29 = vrot.slane %v938_v12, 1 }
 0x330   :  { %v973_v30 = vsel %vm309_vm0, 0.0, %v959_v22  ;;  %v1192_v31 = vpack.c.bf16 %v994_v21, %v976_v18  ;;  %6727 = vmatprep.subr.bf16.mxu0 %v8469_v38  ;;  %v957_v34 = vrot.slane %v939_v26, 7  ;;  %v981_v36 = vrot.slane %v939_v26, 1 }
 0x331   :  { %v1008_v40 = vpack.c.bf16 %v939_v26, %v938_v12  ;;  %v961_v41 = vsel %vm309_vm0, %v959_v22, %v960_v23  ;;  %v972_v45 = vsel %vm309_vm0, 0.0, %v956_v63  ;;  %v985_v47 = vsel %vm330_vm1, %v983_v28, %v984_v8 }
 0x332   :  { %v1001_v46 = vpack.c.bf16 %v961_v41, %v973_v30  ;;  %v997_v48 = vsel %vm330_vm1, %v984_v8, 0.0  ;;  %v958_v49 = vsel %vm309_vm0, %v956_v63, %v957_v34  ;;  %v982_v52 = vsel %vm330_vm1, %v980_v29, %v981_v36 }
 0x333   :  { %6697 = vmatprep.mubr.msk.bf16.mxu1 %vm632_vm2, %v1008_v40  ;;  %v996_v53 = vsel %vm330_vm1, %v981_v36, 0.0  ;;  %v1195_v55 = vpack.c.bf16 %v997_v48, %v985_v47  ;;  %6728 = vmatpush3.bf16.msra.mxu0 %v8469_v38  ;;  %v1000_v56 = vpack.c.bf16 %v958_v49, %v972_v45 }
 0x334   :  { %6698 = vmatmul.mubr.msk.bf16.vlgmr.msra.gmra.mrb[0].mxu1 %vm632_vm2, %v1009_v27  ;;  %v1194_v57 = vpack.c.bf16 %v996_v53, %v982_v52  ;;  %6737 = vmatprep.subr.bf16.mxu0 %v8480_v43 }
 0x335   :  { %6702 = vmatpush3.bf16.msra.mxu1 %v8645_v10  ;;  %6705 = vmatprep.mubr.msk.bf16.mxu1 %vm632_vm2, %v998_v16 }
 0x336   :  { %6703 = vmatprep.subr.bf16.mxu1 %v8691_v44 }
 0x339   :  { %6704 = vmatpush3.bf16.msra.mxu1 %v8691_v44 }
 0x33a   :  { %6713 = vmatprep.subr.bf16.mxu1 %v8706_v60 }
 0x33c   :  { %6706 = vmatmul.mubr.msk.bf16.vlgmr.msra.gmra.mrb[4].mxu1 %vm632_vm2, %v999_v54 }
 0x33d   :  { %6714 = vmatpush3.bf16.msra.mxu1 %v8706_v60  ;;  %6709 = vmatprep.mubr.msk.bf16.mxu1 %vm632_vm2, %v1000_v56 }
 0x33e   :  { %6715 = vmatprep.subr.bf16.mxu1 %v8710_v61 }
 0x341   :  { %6716 = vmatpush3.bf16.msra.mxu1 %v8710_v61 }
 0x342   :  { %6761 = vmatprep.subr.bf16.mxu1 %v8632_v9 }
 0x344   :  { %6710 = vmatmul.mubr.msk.bf16.gmra.mrb[0].mxu1 %vm632_vm2, %v1001_v46 }
 0x345   :  { %6717 = vmatprep.mubr.msk.bf16.mxu1 %vm632_vm2, %v1192_v31 }
 0x34c   :  { %6718 = vmatmul.mubr.msk.bf16.vlgmr.msra.gmra.mrb[4].mxu1 %vm632_vm2, %v1193_v62 }
 0x34d   :  { %6721 = vmatprep.mubr.msk.bf16.mxu1 %vm632_vm2, %v1194_v57  ;;  %6762 = vmatpush3.bf16.msra.mxu1 %v8632_v9 }
 0x34e   :  { %6763 = vmatprep.subr.bf16.mxu1 %v8638_v50 }
 0x351   :  { %6764 = vmatpush3.bf16.msra.mxu1 %v8638_v50 }
 0x352   :  { %6773 = vmatprep.subr.bf16.mxu1 %v8645_v10 }
 0x354   :  { %6722 = vmatmul.mubr.msk.bf16.gmra.mrb[0].mxu1 %vm632_vm2, %v1195_v55 }
 0x401   :  { %v6695_v0 = vpop.f32.mrb[8].mxu0 }
 0x402   :  { %v1072_v1 = vpop.f32.mrb[9].mxu0 }
 0x403   :  { %v6696_v2 = vpop.f32.mrb[10].mxu0 }
 0x404   :  { %v1075_v3 = vpop.f32.mrb[11].mxu0 }
 0x41f   :  { %v6719_v4 = vpop.f32.mrb[4].mxu1 }
 0x420   :  { %v7317_v59 = vadd.f32 %v6719_v4, %v6695_v0  ;;  %v1258_v62 = vpop.f32.mrb[5].mxu1 }
 0x421   :  { %v7318_v6 = vadd.f32 %v1258_v62, %v1072_v1  ;;  %v6720_v7 = vpop.f32.mrb[6].mxu1 }
 0x422   :  { %v1306_v12 = vmul.f32 %v7317_v59, %v8730_v58  ;;  %v7319_v15 = vadd.f32 %v6720_v7, %v6696_v2  ;;  %v1261_v16 = vpop.f32.mrb[7].mxu1 }
 0x423   :  { %v1304_v17 = vmul.f32 %v7318_v6, %v8730_v58  ;;  %v7320_v54 = vadd.f32 %v1261_v16, %v1075_v3 }
 0x424   :  { %v8737_v18 = vadd.f32 %v8732_v5, %v1306_v12  ;;  %v1307_v21 = vmul.f32 %v7319_v15, %v8730_v58 }
 0x425   :  { %v8741_v22 = vadd.f32 %v8732_v5, %v1304_v17  ;;  %v1305_v63 = vmul.f32 %v7320_v54, %v8730_v58 }
 0x426   :  { %v8745_v23 = vadd.f32 %v8732_v5, %v1307_v21  ;;  %v8754_v28 = vmul.f32 0.33333334, %v8737_v18 }
 0x427   :  { %v8748_v8 = vmul.f32 0.33333334, %v8741_v22  ;;  %v8751_v26 = vadd.f32 %v8732_v5, %v1305_v63  ;;  %v6723_v27 = vpop.f32.mrb[0].mxu1 }
 0x428   :  { %v8757_v29 = vmul.f32 0.33333334, %v8745_v23  ;;  %v1310_v30 = vmul.f32 %v6723_v27, %v8730_v58  ;;  %v1274_v31 = vpop.f32.mrb[1].mxu1  ;;  %v8779_v53 = vadd.f32 %v8754_v28, %v8530_v33 }
 0x429   :  { %v8761_v34 = vmul.f32 0.33333334, %v8751_v26  ;;  %v1308_v36 = vmul.f32 %v8730_v58, %v1274_v31  ;;  %v6724_v40 = vpop.f32.mrb[2].mxu1  ;;  %v1336_v41 = vadd.f32 %v8748_v8, %v8521_v25 }
 0x42a   :  { %v8768_v45 = vadd.f32 %v8757_v29, %v8528_v32  ;;  %v1277_v46 = vpop.f32.mrb[3].mxu1  ;;  %v1311_v49 = vmul.f32 %v6724_v40, %v8730_v58  ;;  %v8782_v55 = vadd.f32 %v8732_v5, %v1310_v30 }
 0x42b   :  { %v1337_v47 = vadd.f32 %v8761_v34, %v8519_v24  ;;  %v8773_v48 = vadd.f32 %v8732_v5, %v1308_v36  ;;  %v1309_v52 = vmul.f32 %v8730_v58, %v1277_v46  ;;  %v1352_v15 = vrot.slane %v1336_v41, 7 }
 0x42c   :  { %v8788_v57 = vadd.f32 %v8732_v5, %v1311_v49  ;;  %v1405_v2 = vpack.c.bf16 %v8768_v45, %v8779_v53  ;;  %v8803_v59 = vmul.f32 0.33333334, %v8782_v55  ;;  %v1356_v27 = vrot.slane %v8768_v45, 7 }
 0x42d   :  { %v8785_v56 = vmul.f32 0.33333334, %v8773_v48  ;;  %v8791_v0 = vadd.f32 %v8732_v5, %v1309_v52  ;;  %v1404_v1 = vpack.c.bf16 %v1337_v47, %v1336_v41  ;;  %v1353_v62 = vrot.slane %v1337_v47, 7 }
 0x42e   :  { %v8796_v3 = vmul.f32 0.33333334, %v8788_v57  ;;  %v1342_v17 = vadd.f32 %v8803_v59, %v8580_v20  ;;  %v1372_v63 = vsel %vm309_vm0, 0.0, %v1352_v15  ;;  %v1355_v36 = vrot.slane %v8779_v53, 7 }
 0x42f   :  { %9977 = vst [vmem:[#allocation42_spill] sm:$0xff] %v8791_v0  ;;  %v8799_v4 = vmul.f32 0.33333334, %v8791_v0  ;;  %6729 = vmatprep.mubr.msk.bf16.mxu0 %vm632_vm2, %v1404_v1  ;;  %v1340_v6 = vadd.f32 %v8785_v56, %v8570_v51  ;;  %v1354_v54 = vsel %vm309_vm0, %v1352_v15, %v1353_v62 }
 0x430   :  { %6730 = vmatmul.mubr.msk.bf16.vlgmr.msra.gmra.mrb[12].mxu0 %vm632_vm2, %v1405_v2  ;;  %v1343_v12 = vadd.f32 %v8796_v3, %v8578_v19  ;;  %v1400_v30 = vpack.c.bf16 %v1354_v54, %v1372_v63  ;;  %v1357_v46 = vsel %vm309_vm0, %v1355_v36, %v1356_v27  ;;  %v1373_v52 = vsel %vm309_vm0, 0.0, %v1355_v36 }
 0x431   :  { %v1341_v7 = vadd.f32 %v8799_v4, %v8568_v14  ;;  %6738 = vmatpush3.bf16.msra.mxu0 %v8480_v43  ;;  %v1358_v40 = vrot.slane %v1340_v6, 7  ;;  %v1401_v1 = vpack.c.bf16 %v1357_v46, %v1373_v52  ;;  %v1361_v54 = vrot.slane %v1342_v17, 7 }
 0x432   :  { %6739 = vmatprep.subr.bf16.mxu0 %v8538_v37  ;;  %v1407_v21 = vpack.c.bf16 %v1343_v12, %v1342_v17  ;;  %v1362_v15 = vrot.slane %v1343_v12, 7 }
 0x433   :  { %v1406_v16 = vpack.c.bf16 %v1341_v7, %v1340_v6  ;;  %v1359_v31 = vrot.slane %v1341_v7, 7  ;;  %v1374_v2 = vsel %vm309_vm0, 0.0, %v1358_v40  ;;  %v1383_v46 = vrot.slane %v1341_v7, 1 }
 0x434   :  { %v1363_v63 = vsel %vm309_vm0, %v1361_v54, %v1362_v15  ;;  %v1385_v7 = vrot.slane %v1342_v17, 1 }
 0x435   :  { %6733 = vmatprep.mubr.msk.bf16.mxu0 %vm632_vm2, %v1406_v16  ;;  %6740 = vmatpush3.bf16.msra.mxu0 %v8538_v37  ;;  %v1360_v49 = vsel %vm309_vm0, %v1358_v40, %v1359_v31  ;;  %v1377_v16 = vrot.slane %v1337_v47, 1  ;;  %v1375_v31 = vsel %vm309_vm0, 0.0, %v1361_v54  ;;  %v1380_v47 = vrot.slane %v8768_v45, 1 }
 0x436   :  { %6749 = vmatprep.subr.bf16.mxu0 %v8547_v42  ;;  %v1402_v62 = vpack.c.bf16 %v1360_v49, %v1374_v2  ;;  %v1403_v36 = vpack.c.bf16 %v1363_v63, %v1375_v31  ;;  %v1382_v49 = vrot.slane %v1340_v6, 1  ;;  %v1386_v45 = vrot.slane %v1343_v12, 1 }
 0x437   :  { %v1397_v52 = vsel %vm330_vm1, %v1380_v47, 0.0 }
 0x438   :  { %6734 = vmatmul.mubr.msk.bf16.gmra.mrb[16].mxu0 %vm632_vm2, %v1407_v21  ;;  %v1376_v21 = vrot.slane %v1336_v41, 1  ;;  %v1379_v41 = vrot.slane %v8779_v53, 1  ;;  %v1384_v2 = vsel %vm330_vm1, %v1382_v49, %v1383_v46  ;;  %v1387_v53 = vsel %vm330_vm1, %v1385_v7, %v1386_v45 }
 0x439   :  { %6741 = vmatprep.mubr.msk.bf16.mxu0 %vm632_vm2, %v1400_v30  ;;  %v1396_v30 = vsel %vm330_vm1, %v1377_v16, 0.0  ;;  %v1399_v6 = vsel %vm330_vm1, %v1386_v45, 0.0 }
 0x43a   :  { %v1378_v27 = vsel %vm330_vm1, %v1376_v21, %v1377_v16  ;;  %v1565_v54 = vpack.c.bf16 %v1399_v6, %v1387_v53 }
 0x43b   :  { %v1562_v40 = vpack.c.bf16 %v1396_v30, %v1378_v27 }
 0x440   :  { %6742 = vmatmul.mubr.msk.bf16.vlgmr.msra.gmra.mrb[12].mxu0 %vm632_vm2, %v1401_v1  ;;  %v1381_v1 = vsel %vm330_vm1, %v1379_v41, %v1380_v47 }
 0x441   :  { %6750 = vmatpush3.bf16.msra.mxu0 %v8547_v42  ;;  %6745 = vmatprep.mubr.msk.bf16.mxu0 %vm632_vm2, %v1402_v62  ;;  %v1398_v62 = vsel %vm330_vm1, %v1383_v46, 0.0  ;;  %v1563_v15 = vpack.c.bf16 %v1397_v52, %v1381_v1 }
 0x442   :  { %6751 = vmatprep.subr.bf16.mxu0 %v8600_v39  ;;  %v1564_v16 = vpack.c.bf16 %v1398_v62, %v1384_v2 }
 0x445   :  { %6752 = vmatpush3.bf16.msra.mxu0 %v8600_v39 }
 0x446   :  { %6797 = vmatprep.subr.bf16.mxu0 %v8461_v35 }
 0x448   :  { %6746 = vmatmul.mubr.msk.bf16.gmra.mrb[16].mxu0 %vm632_vm2, %v1403_v36 }
 0x449   :  { %6753 = vmatprep.mubr.msk.bf16.mxu0 %vm632_vm2, %v1562_v40 }
 0x450   :  { %6754 = vmatmul.mubr.msk.bf16.vlgmr.msra.gmra.mrb[12].mxu0 %vm632_vm2, %v1563_v15 }
 0x451   :  { %6757 = vmatprep.mubr.msk.bf16.mxu0 %vm632_vm2, %v1564_v16  ;;  %6798 = vmatpush3.bf16.msra.mxu0 %v8461_v35 }
 0x452   :  { %6799 = vmatprep.subr.bf16.mxu0 %v8469_v38 }
 0x455   :  { %6800 = vmatpush3.bf16.msra.mxu0 %v8469_v38 }
 0x456   :  { %6809 = vmatprep.subr.bf16.mxu0 %v8480_v43 }
 0x458   :  { %6758 = vmatmul.mubr.msk.bf16.gmra.mrb[16].mxu0 %vm632_vm2, %v1565_v54 }
 0x523   :  { %v6755_v12 = vpop.f32.mrb[12].mxu0 }
 0x524   :  { %v1653_v21 = vmul.f32 %v6755_v12, %v8648_v11  ;;  %v1612_v63 = vpop.f32.mrb[13].mxu0 }
 0x525   :  { %v1651_v17 = vmul.f32 %v8648_v11, %v1612_v63  ;;  %v6756_v35 = vpop.f32.mrb[14].mxu0 }
 0x526   :  { %v1661_v27 = vadd.f32 %v8650_v13, %v1653_v21  ;;  %v1654_v30 = vmul.f32 %v6756_v35, %v8648_v11  ;;  %v1615_v31 = vpop.f32.mrb[15].mxu0 }
 0x527   :  { %v1659_v36 = vadd.f32 %v8650_v13, %v1651_v17  ;;  %v1652_v38 = vmul.f32 %v8648_v11, %v1615_v31 }
 0x528   :  { %v1669_v47 = vmax.f32 %v1661_v27, 0.0  ;;  %v1662_v43 = vadd.f32 %v8650_v13, %v1654_v30 }
 0x529   :  { %v1667_v40 = vmax.f32 %v1659_v36, 0.0  ;;  %v1660_v46 = vadd.f32 %v8650_v13, %v1652_v38 }
 0x52a   :  { %v1686_v41 = vrot.slane %v1669_v47, 7  ;;  %v1670_v49 = vmax.f32 %v1662_v43, 0.0  ;;  %v1710_v52 = vrot.slane %v1669_v47, 1 }
 0x52b   :  { %v1683_v1 = vrot.slane %v1667_v40, 7  ;;  %v1707_v2 = vrot.slane %v1667_v40, 1  ;;  %v1668_v62 = vmax.f32 %v1660_v46, 0.0  ;;  %v6759_v15 = vpop.f32.mrb[16].mxu0 }
 0x52c   :  { %v8865_v16 = vsel %vm309_vm0, 0.0, %v1686_v41  ;;  %v1687_v45 = vrot.slane %v1670_v49, 7  ;;  %v1711_v7 = vrot.slane %v1670_v49, 1  ;;  %v1736_v53 = vpack.c.bf16 %v1670_v49, %v1669_v47  ;;  %v1628_v6 = vpop.f32.mrb[17].mxu0 }
 0x52d   :  { %v1684_v54 = vrot.slane %v1668_v62, 7  ;;  %v1708_v12 = vrot.slane %v1668_v62, 1  ;;  %v1657_v21 = vmul.f32 %v6759_v15, %v8648_v11  ;;  %v1655_v63 = vmul.f32 %v8648_v11, %v1628_v6  ;;  %v6760_v17 = vpop.f32.mrb[18].mxu0 }
 0x52e   :  { %v1688_v35 = vsel %vm309_vm0, %v1686_v41, %v1687_v45  ;;  %v1712_v27 = vsel %vm330_vm1, %v1710_v52, %v1711_v7  ;;  %v1728_v30 = vsel %vm330_vm1, %v1711_v7, 0.0  ;;  %v1658_v31 = vmul.f32 %v6760_v17, %v8648_v11  ;;  %v1631_v36 = vpop.f32.mrb[19].mxu0 }
 0x52f   :  { %v1732_v38 = vpack.c.bf16 %v1688_v35, %v8865_v16  ;;  %v1894_v47 = vpack.c.bf16 %v1728_v30, %v1712_v27  ;;  %v1665_v43 = vadd.f32 %v8650_v13, %v1657_v21  ;;  %v1663_v46 = vadd.f32 %v8650_v13, %v1655_v63 }
 0x530   :  { %v1666_v49 = vadd.f32 %v8650_v13, %v1658_v31  ;;  %v1656_v15 = vmul.f32 %v8648_v11, %v1631_v36  ;;  %v1735_v6 = vpack.c.bf16 %v1668_v62, %v1667_v40  ;;  %v1685_v41 = vsel %vm309_vm0, %v1683_v1, %v1684_v54 }
 0x531   :  { %v1673_v52 = vmax.f32 %v1665_v43, 0.0  ;;  %v1671_v45 = vmax.f32 %v1663_v46, 0.0  ;;  %v1703_v7 = vsel %vm309_vm0, 0.0, %v1683_v1  ;;  %v1709_v17 = vsel %vm330_vm1, %v1707_v2, %v1708_v12 }
 0x532   :  { %v1674_v0 = vmax.f32 %v1666_v49, 0.0  ;;  %v1664_v16 = vadd.f32 %v8650_v13, %v1656_v15  ;;  %6765 = vmatprep.mubr.msk.bf16.mxu1 %vm632_vm2, %v1735_v6  ;;  %v1731_v21 = vpack.c.bf16 %v1685_v41, %v1703_v7  ;;  %v1727_v63 = vsel %vm330_vm1, %v1708_v12, 0.0 }
 0x533   :  { %v1692_v35 = vrot.slane %v1673_v52, 7  ;;  %v1689_v27 = vrot.slane %v1671_v45, 7  ;;  %6766 = vmatmul.mubr.msk.bf16.vlgmr.msra.gmra.mrb[8].mxu1 %vm632_vm2, %v1736_v53  ;;  %v1716_v30 = vrot.slane %v1673_v52, 1  ;;  %v1713_v2 = vrot.slane %v1671_v45, 1 }
 0x534   :  { %v1693_v40 = vrot.slane %v1674_v0, 7  ;;  %v1717_v62 = vrot.slane %v1674_v0, 1  ;;  %v1672_v54 = vmax.f32 %v1664_v16, 0.0  ;;  %6774 = vmatpush3.bf16.msra.mxu1 %v8645_v10  ;;  %v1738_v1 = vpack.c.bf16 %v1674_v0, %v1673_v52 }
 0x535   :  { %6775 = vmatprep.subr.bf16.mxu1 %v8691_v44  ;;  %v1706_v31 = vsel %vm309_vm0, 0.0, %v1692_v35  ;;  %v1893_v36 = vpack.c.bf16 %v1727_v63, %v1709_v17  ;;  %v1705_v53 = vsel %vm309_vm0, 0.0, %v1689_v27 }
 0x536   :  { %v1690_v43 = vrot.slane %v1672_v54, 7  ;;  %v1714_v46 = vrot.slane %v1672_v54, 1  ;;  %v1737_v12 = vpack.c.bf16 %v1672_v54, %v1671_v45  ;;  %v1694_v49 = vsel %vm309_vm0, %v1692_v35, %v1693_v40 }
 0x537   :  { %v1734_v15 = vpack.c.bf16 %v1694_v49, %v1706_v31  ;;  %v1718_v6 = vsel %vm330_vm1, %v1716_v30, %v1717_v62  ;;  %v1730_v41 = vsel %vm330_vm1, %v1717_v62, 0.0 }
 0x538   :  { %6769 = vmatprep.mubr.msk.bf16.mxu1 %vm632_vm2, %v1737_v12  ;;  %6776 = vmatpush3.bf16.msra.mxu1 %v8691_v44  ;;  %v1691_v0 = vsel %vm309_vm0, %v1689_v27, %v1690_v43  ;;  %v1715_v52 = vsel %vm330_vm1, %v1713_v2, %v1714_v46  ;;  %v1729_v7 = vsel %vm330_vm1, %v1714_v46, 0.0  ;;  %v1896_v45 = vpack.c.bf16 %v1730_v41, %v1718_v6 }
 0x539   :  { %6785 = vmatprep.subr.bf16.mxu1 %v8706_v60  ;;  %v1733_v17 = vpack.c.bf16 %v1691_v0, %v1705_v53  ;;  %v1895_v16 = vpack.c.bf16 %v1729_v7, %v1715_v52 }
 0x53b   :  { %6770 = vmatmul.mubr.msk.bf16.gmra.mrb[12].mxu1 %vm632_vm2, %v1738_v1 }
 0x53c   :  { %6777 = vmatprep.mubr.msk.bf16.mxu1 %vm632_vm2, %v1731_v21 }
 0x543   :  { %6778 = vmatmul.mubr.msk.bf16.vlgmr.msra.gmra.mrb[8].mxu1 %vm632_vm2, %v1732_v38 }
 0x544   :  { %6786 = vmatpush3.bf16.msra.mxu1 %v8706_v60  ;;  %6781 = vmatprep.mubr.msk.bf16.mxu1 %vm632_vm2, %v1733_v17 }
 0x545   :  { %6787 = vmatprep.subr.bf16.mxu1 %v8710_v61 }
 0x548   :  { %6788 = vmatpush3.bf16.msra.mxu1 %v8710_v61 }
 0x549   :  { %6833 = vmatprep.subr.bf16.mxu1 %v8632_v9 }
 0x54b   :  { %6782 = vmatmul.mubr.msk.bf16.gmra.mrb[12].mxu1 %vm632_vm2, %v1734_v15 }
 0x54c   :  { %6789 = vmatprep.mubr.msk.bf16.mxu1 %vm632_vm2, %v1893_v36 }
 0x553   :  { %6790 = vmatmul.mubr.msk.bf16.vlgmr.msra.gmra.mrb[8].mxu1 %vm632_vm2, %v1894_v47 }
 0x554   :  { %6793 = vmatprep.mubr.msk.bf16.mxu1 %vm632_vm2, %v1895_v16  ;;  %6834 = vmatpush3.bf16.msra.mxu1 %v8632_v9 }
 0x555   :  { %6835 = vmatprep.subr.bf16.mxu1 %v8638_v50 }
 0x558   :  { %6836 = vmatpush3.bf16.msra.mxu1 %v8638_v50 }
 0x559   :  { %6845 = vmatprep.subr.bf16.mxu1 %v8645_v10 }
 0x55b   :  { %6794 = vmatmul.mubr.msk.bf16.gmra.mrb[12].mxu1 %vm632_vm2, %v1896_v45 }
 0x626   :  { %v6791_v38 = vpop.f32.mrb[8].mxu1 }
 0x627   :  { %v1984_v21 = vmul.f32 %v6791_v38, %v8730_v58  ;;  %v1943_v63 = vpop.f32.mrb[9].mxu1 }
 0x628   :  { %v1982_v35 = vmul.f32 %v8730_v58, %v1943_v63  ;;  %v6792_v27 = vpop.f32.mrb[10].mxu1 }
 0x629   :  { %v8918_v47 = vadd.f32 %v8732_v5, %v1984_v21  ;;  %v1985_v9 = vmul.f32 %v6792_v27, %v8730_v58  ;;  %v1946_v40 = vpop.f32.mrb[11].mxu1 }
 0x62a   :  { %v8922_v62 = vadd.f32 %v8732_v5, %v1982_v35  ;;  %v1983_v50 = vmul.f32 %v8730_v58, %v1946_v40 }
 0x62b   :  { %v8926_v54 = vadd.f32 %v8732_v5, %v1985_v9  ;;  %v2000_v30 = vsub.f32 %v8918_v47, %v8754_v28 }
 0x62c   :  { %v8929_v1 = vadd.f32 %v8732_v5, %v1983_v50  ;;  %v1998_v2 = vsub.f32 %v8922_v62, %v8748_v8 }
 0x62d   :  { %v2001_v31 = vsub.f32 %v8926_v54, %v8757_v29  ;;  %v8946_v8 = vadd.f32 %v2000_v30, %v8530_v33 }
 0x62e   :  { %v1999_v36 = vsub.f32 %v8929_v1, %v8761_v34  ;;  %v6795_v43 = vpop.f32.mrb[12].mxu1  ;;  %v2006_v29 = vadd.f32 %v1998_v2, %v8521_v25 }
 0x62f   :  { %v1988_v46 = vmul.f32 %v6795_v43, %v8730_v58  ;;  %v1959_v12 = vpop.f32.mrb[13].mxu1  ;;  %v8941_v49 = vadd.f32 %v2001_v31, %v8528_v32 }
 0x630   :  { %v2007_v53 = vadd.f32 %v1999_v36, %v8519_v24  ;;  %v1986_v28 = vmul.f32 %v8730_v58, %v1959_v12  ;;  %v6796_v15 = vpop.f32.mrb[14].mxu1  ;;  %v2025_v12 = vrot.slane %v8946_v8, 7 }
 0x631   :  { %v1962_v6 = vpop.f32.mrb[15].mxu1  ;;  %v8950_v34 = vadd.f32 %v8732_v5, %v1988_v46  ;;  %v1989_v0 = vmul.f32 %v6796_v15, %v8730_v58  ;;  %v2075_v45 = vpack.c.bf16 %v8941_v49, %v8946_v8  ;;  %v2026_v36 = vrot.slane %v8941_v49, 7 }
 0x632   :  { %v8953_v41 = vadd.f32 %v8732_v5, %v1986_v28  ;;  %v1987_v52 = vmul.f32 %v8730_v58, %v1962_v6  ;;  %v2074_v7 = vpack.c.bf16 %v2007_v53, %v2006_v29  ;;  %v2023_v35 = vrot.slane %v2007_v53, 7 }
 0x633   :  { %v8960_v17 = vadd.f32 %v8732_v5, %v1989_v0  ;;  %v2004_v21 = vsub.f32 %v8950_v34, %v8803_v59  ;;  %v2022_v59 = vrot.slane %v2006_v29, 7  ;;  %v2043_v6 = vsel %vm309_vm0, 0.0, %v2025_v12 }
 0x634   :  { %v2002_v16 = vsub.f32 %v8953_v41, %v8785_v56  ;;  %v8965_v38 = vadd.f32 %v8732_v5, %v1987_v52  ;;  %6801 = vmatprep.mubr.msk.bf16.mxu0 %vm632_vm2, %v2074_v7  ;;  %v8978_v56 = vld [vmem:[%s9975_s5] sm:$0xff]  }
 0x635   :  { %v2005_v63 = vsub.f32 %v8960_v17, %v8796_v3  ;;  %6802 = vmatmul.mubr.msk.bf16.vlgmr.msra.gmra.mrb[20].mxu0 %vm632_vm2, %v2075_v45  ;;  %v2012_v50 = vadd.f32 %v2004_v21, %v8580_v20  ;;  %v2042_v31 = vsel %vm309_vm0, 0.0, %v2022_v59 }
 0x636   :  { %v2003_v27 = vsub.f32 %v8965_v38, %v8799_v4  ;;  %6810 = vmatpush3.bf16.msra.mxu0 %v8978_v56  ;;  %v2010_v3 = vadd.f32 %v2002_v16, %v8570_v51  ;;  %v2024_v4 = vsel %vm309_vm0, %v2022_v59, %v2023_v35  ;;  %v2047_v16 = vrot.slane %v2007_v53, 1 }
 0x637   :  { %v8982_v9 = vadd.f32 %v2005_v63, %v8578_v19  ;;  %6811 = vmatprep.subr.bf16.mxu0 %v8538_v37  ;;  %v2070_v43 = vpack.c.bf16 %v2024_v4, %v2042_v31  ;;  %v2031_v21 = vrot.slane %v2012_v50, 7  ;;  %v2046_v63 = vrot.slane %v2006_v29, 1 }
 0x638   :  { %v2011_v40 = vadd.f32 %v2003_v27, %v8568_v14  ;;  %v2028_v28 = vrot.slane %v2010_v3, 7  ;;  %v2066_v59 = vsel %vm330_vm1, %v2047_v16, 0.0  ;;  %v2050_v53 = vrot.slane %v8941_v49, 1 }
 0x639   :  { %v2077_v2 = vpack.c.bf16 %v8982_v9, %v2012_v50  ;;  %v2032_v45 = vrot.slane %v8982_v9, 7  ;;  %v2048_v27 = vsel %vm330_vm1, %v2046_v63, %v2047_v16  ;;  %v2045_v4 = vsel %vm309_vm0, 0.0, %v2031_v21 }
 0x63a   :  { %v2076_v30 = vpack.c.bf16 %v2011_v40, %v2010_v3  ;;  %6812 = vmatpush3.bf16.msra.mxu0 %v8538_v37  ;;  %v2029_v46 = vrot.slane %v2011_v40, 7  ;;  %v2027_v37 = vsel %vm309_vm0, %v2025_v12, %v2026_v36  ;;  %v2044_v52 = vsel %vm309_vm0, 0.0, %v2028_v28 }
 0x63b   :  { %6821 = vmatprep.subr.bf16.mxu0 %v8547_v42  ;;  %v2071_v0 = vpack.c.bf16 %v2027_v37, %v2043_v6  ;;  %v2033_v35 = vsel %vm309_vm0, %v2031_v21, %v2032_v45  ;;  %v2053_v29 = vrot.slane %v2011_v40, 1  ;;  %v2049_v31 = vrot.slane %v8946_v8, 1 }
 0x63c   :  { %6805 = vmatprep.mubr.msk.bf16.mxu0 %vm632_vm2, %v2076_v30  ;;  %v2030_v15 = vsel %vm309_vm0, %v2028_v28, %v2029_v46  ;;  %v2073_v30 = vpack.c.bf16 %v2033_v35, %v2045_v4  ;;  %v2052_v36 = vrot.slane %v2010_v3, 1  ;;  %v2056_v49 = vrot.slane %v8982_v9, 1  ;;  %v7619_v3 = vld [vmem:[%s9975_s5 + $0x18] sm:$0xff]  }
 0x63d   :  { %6806 = vmatmul.mubr.msk.bf16.gmra.mrb[24].mxu0 %vm632_vm2, %v2077_v2  ;;  %v2072_v7 = vpack.c.bf16 %v2030_v15, %v2044_v52  ;;  %v2232_v2 = vpack.c.bf16 %v2066_v59, %v2048_v27  ;;  %v2068_v12 = vsel %vm330_vm1, %v2053_v29, 0.0  ;;  %v2055_v8 = vrot.slane %v2012_v50, 1 }
 0x63e   :  { %6813 = vmatprep.mubr.msk.bf16.mxu0 %vm632_vm2, %v2070_v43  ;;  %v2051_v43 = vsel %vm330_vm1, %v2049_v31, %v2050_v53  ;;  %v2054_v46 = vsel %vm330_vm1, %v2052_v36, %v2053_v29  ;;  %v2069_v15 = vsel %vm330_vm1, %v2056_v49, 0.0 }
 0x63f   :  { %v2234_v37 = vpack.c.bf16 %v2068_v12, %v2054_v46  ;;  %v2057_v40 = vsel %vm330_vm1, %v2055_v8, %v2056_v49 }
 0x640   :  { %v2235_v6 = vpack.c.bf16 %v2069_v15, %v2057_v40 }
 0x645   :  { %6814 = vmatmul.mubr.msk.bf16.vlgmr.msra.gmra.mrb[20].mxu0 %vm632_vm2, %v2071_v0 }
 0x646   :  { %6822 = vmatpush3.bf16.msra.mxu0 %v8547_v42  ;;  %6817 = vmatprep.mubr.msk.bf16.mxu0 %vm632_vm2, %v2072_v7  ;;  %v7618_v42 = vld [vmem:[%s9975_s5 + $0x10] sm:$0xff]  }
 0x647   :  { %6823 = vmatprep.subr.bf16.mxu0 %v8600_v39 }
 0x64a   :  { %6824 = vmatpush3.bf16.msra.mxu0 %v8600_v39  ;;  %v2067_v39 = vsel %vm330_vm1, %v2050_v53, 0.0 }
 0x64b   :  { %6869 = vmatprep.subr.bf16.mxu0 %v7618_v42  ;;  %v2233_v28 = vpack.c.bf16 %v2067_v39, %v2051_v43 }
 0x64d   :  { %6818 = vmatmul.mubr.msk.bf16.gmra.mrb[24].mxu0 %vm632_vm2, %v2073_v30 }
 0x64e   :  { %6825 = vmatprep.mubr.msk.bf16.mxu0 %vm632_vm2, %v2232_v2 }
 0x655   :  { %6826 = vmatmul.mubr.msk.bf16.vlgmr.msra.gmra.mrb[20].mxu0 %vm632_vm2, %v2233_v28 }
 0x656   :  { %6829 = vmatprep.mubr.msk.bf16.mxu0 %vm632_vm2, %v2234_v37  ;;  %6870 = vmatpush3.bf16.msra.mxu0 %v7618_v42 }
 0x657   :  { %6871 = vmatprep.subr.bf16.mxu0 %v7619_v3 }
 0x65a   :  { %6872 = vmatpush3.bf16.msra.mxu0 %v7619_v3 }
 0x65b   :  { %6881 = vmatprep.subr.bf16.mxu0 %v8978_v56 }
 0x65d   :  { %6830 = vmatmul.mubr.msk.bf16.gmra.mrb[24].mxu0 %vm632_vm2, %v2235_v6 }
 0x728   :  { %v6827_v9 = vpop.f32.mrb[20].mxu0 }
 0x729   :  { %v2323_v0 = vmul.f32 %v6827_v9, %v8648_v11  ;;  %v2282_v50 = vpop.f32.mrb[21].mxu0 }
 0x72a   :  { %v2321_v52 = vmul.f32 %v8648_v11, %v2282_v50  ;;  %v6828_v7 = vpop.f32.mrb[22].mxu0 }
 0x72b   :  { %v2331_v45 = vadd.f32 %v8650_v13, %v2323_v0  ;;  %v2324_v16 = vmul.f32 %v6828_v7, %v8648_v11  ;;  %v2285_v21 = vpop.f32.mrb[23].mxu0 }
 0x72c   :  { %v2329_v63 = vadd.f32 %v8650_v13, %v2321_v52  ;;  %v2322_v35 = vmul.f32 %v8648_v11, %v2285_v21 }
 0x72d   :  { %v2339_v27 = vmax.f32 %v2331_v45, 0.0  ;;  %v2332_v59 = vadd.f32 %v8650_v13, %v2324_v16 }
 0x72e   :  { %v2337_v4 = vmax.f32 %v2329_v63, 0.0  ;;  %v2330_v30 = vadd.f32 %v8650_v13, %v2322_v35 }
 0x72f   :  { %v2356_v42 = vrot.slane %v2339_v27, 7  ;;  %v2340_v53 = vmax.f32 %v2332_v59, 0.0  ;;  %v2380_v2 = vrot.slane %v2339_v27, 1 }
 0x730   :  { %v2353_v29 = vrot.slane %v2337_v4, 7  ;;  %v2377_v31 = vrot.slane %v2337_v4, 1  ;;  %v2338_v36 = vmax.f32 %v2330_v30, 0.0  ;;  %v6831_v43 = vpop.f32.mrb[24].mxu0 }
 0x731   :  { %v9042_v39 = vsel %vm309_vm0, 0.0, %v2356_v42  ;;  %v2357_v46 = vrot.slane %v2340_v53, 7  ;;  %v2381_v12 = vrot.slane %v2340_v53, 1  ;;  %v2406_v28 = vpack.c.bf16 %v2340_v53, %v2339_v27  ;;  %v2298_v37 = vpop.f32.mrb[25].mxu0 }
 0x732   :  { %v2354_v49 = vrot.slane %v2338_v36, 7  ;;  %v2378_v8 = vrot.slane %v2338_v36, 1  ;;  %v2327_v3 = vmul.f32 %v6831_v43, %v8648_v11  ;;  %v2325_v40 = vmul.f32 %v8648_v11, %v2298_v37  ;;  %v6832_v15 = vpop.f32.mrb[26].mxu0 }
 0x733   :  { %v2358_v6 = vsel %vm309_vm0, %v2356_v42, %v2357_v46  ;;  %v9048_v9 = vsel %vm330_vm1, %v2380_v2, %v2381_v12  ;;  %v2398_v0 = vsel %vm330_vm1, %v2381_v12, 0.0  ;;  %v2328_v50 = vmul.f32 %v6832_v15, %v8648_v11  ;;  %v2301_v52 = vpop.f32.mrb[27].mxu0 }
 0x734   :  { %v2402_v7 = vpack.c.bf16 %v2358_v6, %v9042_v39  ;;  %v2564_v45 = vpack.c.bf16 %v2398_v0, %v9048_v9  ;;  %v2335_v16 = vadd.f32 %v8650_v13, %v2327_v3  ;;  %v2333_v21 = vadd.f32 %v8650_v13, %v2325_v40 }
 0x735   :  { %v2336_v63 = vadd.f32 %v8650_v13, %v2328_v50  ;;  %v2326_v35 = vmul.f32 %v8648_v11, %v2301_v52  ;;  %v2405_v27 = vpack.c.bf16 %v2338_v36, %v2337_v4  ;;  %v2355_v59 = vsel %vm309_vm0, %v2353_v29, %v2354_v49 }
 0x736   :  { %v2343_v30 = vmax.f32 %v2335_v16, 0.0  ;;  %v2341_v42 = vmax.f32 %v2333_v21, 0.0  ;;  %v2373_v53 = vsel %vm309_vm0, 0.0, %v2353_v29  ;;  %v2379_v2 = vsel %vm330_vm1, %v2377_v31, %v2378_v8 }
 0x737   :  { %v2344_v43 = vmax.f32 %v2336_v63, 0.0  ;;  %v2334_v39 = vadd.f32 %v8650_v13, %v2326_v35  ;;  %6837 = vmatprep.mubr.msk.bf16.mxu1 %vm632_vm2, %v2405_v27  ;;  %v2401_v46 = vpack.c.bf16 %v2355_v59, %v2373_v53  ;;  %v2397_v12 = vsel %vm330_vm1, %v2378_v8, 0.0 }
 0x738   :  { %v2362_v37 = vrot.slane %v2343_v30, 7  ;;  %v2359_v3 = vrot.slane %v2341_v42, 7  ;;  %6838 = vmatmul.mubr.msk.bf16.vlgmr.msra.gmra.mrb[16].mxu1 %vm632_vm2, %v2406_v28  ;;  %v2386_v49 = vrot.slane %v2343_v30, 1  ;;  %v2383_v31 = vrot.slane %v2341_v42, 1 }
 0x739   :  { %v2363_v11 = vrot.slane %v2344_v43, 7  ;;  %v2387_v4 = vrot.slane %v2344_v43, 1  ;;  %v2342_v36 = vmax.f32 %v2334_v39, 0.0  ;;  %6846 = vmatpush3.bf16.msra.mxu1 %v8645_v10  ;;  %v2408_v29 = vpack.c.bf16 %v2344_v43, %v2343_v30 }
 0x73a   :  { %6847 = vmatprep.subr.bf16.mxu1 %v8691_v44  ;;  %v2376_v13 = vsel %vm309_vm0, 0.0, %v2362_v37  ;;  %v2563_v40 = vpack.c.bf16 %v2397_v12, %v2379_v2  ;;  %v2375_v28 = vsel %vm309_vm0, 0.0, %v2359_v3  ;;  %v2670_v2 = vsub.f32 %v8737_v18, %v8918_v47 }
 0x73b   :  { %v2360_v15 = vrot.slane %v2342_v36, 7  ;;  %v2384_v6 = vrot.slane %v2342_v36, 1  ;;  %v2407_v8 = vpack.c.bf16 %v2342_v36, %v2341_v42  ;;  %v2364_v9 = vsel %vm309_vm0, %v2362_v37, %v2363_v11 }
 0x73c   :  { %v2404_v0 = vpack.c.bf16 %v2364_v9, %v2376_v13  ;;  %v2388_v50 = vsel %vm330_vm1, %v2386_v49, %v2387_v4  ;;  %v2400_v10 = vsel %vm330_vm1, %v2387_v4, 0.0  ;;  %v2668_v12 = vsub.f32 %v8741_v22, %v8922_v62 }
 0x73d   :  { %6841 = vmatprep.mubr.msk.bf16.mxu1 %vm632_vm2, %v2407_v8  ;;  %6848 = vmatpush3.bf16.msra.mxu1 %v8691_v44  ;;  %v2361_v52 = vsel %vm309_vm0, %v2359_v3, %v2360_v15  ;;  %v2385_v16 = vsel %vm330_vm1, %v2383_v31, %v2384_v6  ;;  %v2399_v21 = vsel %vm330_vm1, %v2384_v6, 0.0  ;;  %v2566_v63 = vpack.c.bf16 %v2400_v10, %v2388_v50  ;;  %v7620_v44 = vld [vmem:[#allocation11 + $0x10] sm:$0xff]  }
 0x73e   :  { %6857 = vmatprep.subr.bf16.mxu1 %v8706_v60  ;;  %v2403_v35 = vpack.c.bf16 %v2361_v52, %v2375_v28  ;;  %v2565_v27 = vpack.c.bf16 %v2399_v21, %v2385_v16  ;;  %v2671_v4 = vsub.f32 %v8745_v23, %v8926_v54  ;;  %v2669_v49 = vsub.f32 %v8751_v26, %v8929_v1 }
 0x73f   :  { %v2674_v9 = vsub.f32 %v8782_v55, %v8950_v34  ;;  %v2675_v21 = vsub.f32 %v8788_v57, %v8960_v17 }
 0x740   :  { %6842 = vmatmul.mubr.msk.bf16.gmra.mrb[20].mxu1 %vm632_vm2, %v2408_v29 }
 0x741   :  { %6849 = vmatprep.mubr.msk.bf16.mxu1 %vm632_vm2, %v2401_v46 }
 0x748   :  { %6850 = vmatmul.mubr.msk.bf16.vlgmr.msra.gmra.mrb[16].mxu1 %vm632_vm2, %v2402_v7  ;;  %v7621_v7 = vld [vmem:[#allocation11 + $0x18] sm:$0xff]  }
 0x749   :  { %6858 = vmatpush3.bf16.msra.mxu1 %v8706_v60  ;;  %6853 = vmatprep.mubr.msk.bf16.mxu1 %vm632_vm2, %v2403_v35  ;;  %v9089_v60 = vld [vmem:[#allocation11] sm:$0xff]  }
 0x74a   :  { %6859 = vmatprep.subr.bf16.mxu1 %v8710_v61 }
 0x74d   :  { %6860 = vmatpush3.bf16.msra.mxu1 %v8710_v61 }
 0x74e   :  { %6905 = vmatprep.subr.bf16.mxu1 %v7620_v44 }
 0x750   :  { %6854 = vmatmul.mubr.msk.bf16.gmra.mrb[20].mxu1 %vm632_vm2, %v2404_v0  ;;  %v2672_v0 = vsub.f32 %v8773_v48, %v8953_v41 }
 0x751   :  { %6861 = vmatprep.mubr.msk.bf16.mxu1 %vm632_vm2, %v2563_v40 }
 0x758   :  { %6862 = vmatmul.mubr.msk.bf16.vlgmr.msra.gmra.mrb[16].mxu1 %vm632_vm2, %v2564_v45 }
 0x759   :  { %6865 = vmatprep.mubr.msk.bf16.mxu1 %vm632_vm2, %v2565_v27  ;;  %6906 = vmatpush3.bf16.msra.mxu1 %v7620_v44 }
 0x75a   :  { %6907 = vmatprep.subr.bf16.mxu1 %v7621_v7 }
 0x75d   :  { %6908 = vmatpush3.bf16.msra.mxu1 %v7621_v7 }
 0x75e   :  { %6917 = vmatprep.subr.bf16.mxu1 %v9089_v60 }
 0x760   :  { %6866 = vmatmul.mubr.msk.bf16.gmra.mrb[20].mxu1 %vm632_vm2, %v2566_v63 }
 0x82b   :  { %v6863_v61 = vpop.f32.mrb[16].mxu1 }
 0x82c   :  { %v2654_v59 = vmul.f32 %v6863_v61, %v8730_v58  ;;  %v2613_v30 = vpop.f32.mrb[17].mxu1 }
 0x82d   :  { %v2652_v42 = vmul.f32 %v8730_v58, %v2613_v30  ;;  %v6864_v53 = vpop.f32.mrb[18].mxu1 }
 0x82e   :  { %v9096_v45 = vadd.f32 %v8732_v5, %v2654_v59  ;;  %v2655_v43 = vmul.f32 %v6864_v53, %v8730_v58  ;;  %v2616_v39 = vpop.f32.mrb[19].mxu1 }
 0x82f   :  { %v9102_v46 = vadd.f32 %v8732_v5, %v2652_v42  ;;  %v2653_v37 = vmul.f32 %v8730_v58, %v2616_v39 }
 0x830   :  { %v2678_v3 = vadd.f32 %v2670_v2, %v9096_v45  ;;  %v9109_v11 = vadd.f32 %v8732_v5, %v2655_v43 }
 0x831   :  { %v2676_v36 = vadd.f32 %v2668_v12, %v9102_v46  ;;  %v9115_v29 = vadd.f32 %v8732_v5, %v2653_v37 }
 0x832   :  { %v2686_v31 = vadd.f32 %v2678_v3, %v8530_v33  ;;  %v2679_v13 = vadd.f32 %v2671_v4, %v9109_v11 }
 0x833   :  { %v2677_v40 = vadd.f32 %v2669_v49, %v9115_v29  ;;  %v6867_v15 = vpop.f32.mrb[20].mxu1  ;;  %v2684_v50 = vadd.f32 %v2676_v36, %v8521_v25 }
 0x834   :  { %v2703_v6 = vrot.slane %v2686_v31, 7  ;;  %v2687_v8 = vadd.f32 %v2679_v13, %v8528_v32  ;;  %v2629_v28 = vpop.f32.mrb[21].mxu1  ;;  %v2658_v52 = vmul.f32 %v6867_v15, %v8730_v58  ;;  %v2727_v63 = vrot.slane %v2686_v31, 1 }
 0x835   :  { %v2685_v10 = vadd.f32 %v2677_v40, %v8519_v24  ;;  %v6868_v16 = vpop.f32.mrb[22].mxu1  ;;  %v2656_v30 = vmul.f32 %v8730_v58, %v2629_v28  ;;  %v9978_v40 = vld [vmem:[#allocation42_spill] sm:$0xff] }
 0x836   :  { %v2704_v35 = vrot.slane %v2687_v8, 7  ;;  %v2728_v27 = vrot.slane %v2687_v8, 1  ;;  %v2753_v44 = vpack.c.bf16 %v2687_v8, %v2686_v31  ;;  %v2632_v7 = vpop.f32.mrb[23].mxu1  ;;  %v9133_v61 = vsel %vm309_vm0, 0.0, %v2703_v6 }
 0x837   :  { %v9136_v59 = vadd.f32 %v8732_v5, %v2658_v52  ;;  %v2659_v42 = vmul.f32 %v6868_v16, %v8730_v58  ;;  %v2657_v39 = vmul.f32 %v8730_v58, %v2632_v7  ;;  %v2701_v3 = vrot.slane %v2685_v10, 7 }
 0x838   :  { %v9141_v53 = vsel %vm309_vm0, %v2703_v6, %v2704_v35  ;;  %v9144_v2 = vsel %vm330_vm1, %v2727_v63, %v2728_v27  ;;  %v9147_v43 = vsel %vm330_vm1, %v2728_v27, 0.0  ;;  %v9156_v36 = vadd.f32 %v8732_v5, %v2656_v30 }
 0x839   :  { %v2749_v12 = vpack.c.bf16 %v9141_v53, %v9133_v61  ;;  %v2911_v37 = vpack.c.bf16 %v9147_v43, %v9144_v2  ;;  %v2682_v4 = vadd.f32 %v2674_v9, %v9136_v59  ;;  %v9159_v49 = vadd.f32 %v8732_v5, %v2659_v42 }
 0x83a   :  { %v9162_v31 = vadd.f32 %v8732_v5, %v2657_v39  ;;  %v2752_v13 = vpack.c.bf16 %v2685_v10, %v2684_v50  ;;  %v2673_v15 = vsub.f32 %v9978_v40, %v8965_v38  ;;  %v2700_v6 = vrot.slane %v2684_v50, 7 }
 0x83b   :  { %v2690_v58 = vadd.f32 %v2682_v4, %v8580_v20  ;;  %v2680_v8 = vadd.f32 %v2672_v0, %v9156_v36  ;;  %v2683_v9 = vadd.f32 %v2675_v21, %v9159_v49  ;;  %v2724_v52 = vrot.slane %v2684_v50, 1  ;;  %v7623_v21 = vld [vmem:[%s9975_s5 + $0x8] sm:$0xff]  }
 0x83c   :  { %6873 = vmatprep.mubr.msk.bf16.mxu0 %vm632_vm2, %v2752_v13  ;;  %v2681_v28 = vadd.f32 %v2673_v15, %v9162_v31  ;;  %v2702_v5 = vsel %vm309_vm0, %v2700_v6, %v2701_v3  ;;  %v2725_v35 = vrot.slane %v2685_v10, 1 }
 0x83d   :  { %6874 = vmatmul.mubr.msk.bf16.vlgmr.msra.gmra.mrb[28].mxu0 %vm632_vm2, %v2753_v44  ;;  %v2688_v16 = vadd.f32 %v2680_v8, %v8570_v51  ;;  %v2691_v63 = vadd.f32 %v2683_v9, %v8578_v19  ;;  %v2733_v27 = vrot.slane %v2690_v58, 1  ;;  %v2720_v44 = vsel %vm309_vm0, 0.0, %v2700_v6 }
 0x83e   :  { %6882 = vmatpush3.bf16.msra.mxu0 %v8978_v56  ;;  %v2689_v0 = vadd.f32 %v2681_v28, %v8568_v14  ;;  %v2709_v7 = vrot.slane %v2690_v58, 7  ;;  %v2748_v42 = vpack.c.bf16 %v2702_v5, %v2720_v44  ;;  %v2726_v4 = vsel %vm330_vm1, %v2724_v52, %v2725_v35 }
 0x83f   :  { %6883 = vmatprep.subr.bf16.mxu0 %v7623_v21  ;;  %v2730_v61 = vrot.slane %v2688_v16, 1  ;;  %v2710_v50 = vrot.slane %v2691_v63, 7  ;;  %v2755_v30 = vpack.c.bf16 %v2691_v63, %v2690_v58  ;;  %v2706_v3 = vrot.slane %v2688_v16, 7  ;;  %v7624_v58 = vld [vmem:[%s9975_s5 + $0x20] sm:$0xff]  }
 0x840   :  { %v2707_v53 = vrot.slane %v2689_v0, 7  ;;  %v2754_v39 = vpack.c.bf16 %v2689_v0, %v2688_v16  ;;  %v2723_v56 = vsel %vm309_vm0, 0.0, %v2709_v7  ;;  %v2744_v13 = vsel %vm330_vm1, %v2725_v35, 0.0 }
 0x841   :  { %v2711_v10 = vsel %vm309_vm0, %v2709_v7, %v2710_v50  ;;  %v2731_v15 = vrot.slane %v2689_v0, 1  ;;  %v2722_v8 = vsel %vm309_vm0, 0.0, %v2706_v3  ;;  %v2910_v28 = vpack.c.bf16 %v2744_v13, %v2726_v4 }
 0x842   :  { %6884 = vmatpush3.bf16.msra.mxu0 %v7623_v21  ;;  %6877 = vmatprep.mubr.msk.bf16.mxu0 %vm632_vm2, %v2754_v39  ;;  %v2708_v6 = vsel %vm309_vm0, %v2706_v3, %v2707_v53  ;;  %v2751_v9 = vpack.c.bf16 %v2711_v10, %v2723_v56  ;;  %v2734_v35 = vrot.slane %v2691_v63, 1  ;;  %v7626_v63 = vld [vmem:[#allocation8] ss:$0 sm:$0xff]  ;;  %v7627_v53 = vld [vmem:[#allocation9] ss:$0 sm:$0xff] }
 0x843   :  { %6893 = vmatprep.subr.bf16.mxu0 %v7624_v58  ;;  %v2750_v5 = vpack.c.bf16 %v2708_v6, %v2722_v8  ;;  %v2732_v16 = vsel %vm330_vm1, %v2730_v61, %v2731_v15  ;;  %v2746_v52 = vsel %vm330_vm1, %v2731_v15, 0.0  ;;  %v7625_v61 = vld [vmem:[%s9975_s5 + $0x28] sm:$0xff]  }
 0x844   :  { %v2912_v0 = vpack.c.bf16 %v2746_v52, %v2732_v16  ;;  %v2735_v21 = vsel %vm330_vm1, %v2733_v27, %v2734_v35  ;;  %v2747_v44 = vsel %vm330_vm1, %v2734_v35, 0.0 }
 0x845   :  { %6878 = vmatmul.mubr.msk.bf16.gmra.mrb[32].mxu0 %vm632_vm2, %v2755_v30  ;;  %v2913_v7 = vpack.c.bf16 %v2747_v44, %v2735_v21 }
 0x846   :  { %6885 = vmatprep.mubr.msk.bf16.mxu0 %vm632_vm2, %v2748_v42 }
 0x84d   :  { %6886 = vmatmul.mubr.msk.bf16.vlgmr.msra.gmra.mrb[28].mxu0 %vm632_vm2, %v2749_v12 }
 0x84e   :  { %6894 = vmatpush3.bf16.msra.mxu0 %v7624_v58  ;;  %6889 = vmatprep.mubr.msk.bf16.mxu0 %vm632_vm2, %v2750_v5 }
 0x84f   :  { %6895 = vmatprep.subr.bf16.mxu0 %v7625_v61 }
 0x852   :  { %6896 = vmatpush3.bf16.msra.mxu0 %v7625_v61 }
 0x855   :  { %6890 = vmatmul.mubr.msk.bf16.gmra.mrb[32].mxu0 %vm632_vm2, %v2751_v9 }
 0x856   :  { %6897 = vmatprep.mubr.msk.bf16.mxu0 %vm632_vm2, %v2910_v28 }
 0x85d   :  { %6898 = vmatmul.mubr.msk.bf16.vlgmr.msra.gmra.mrb[28].mxu0 %vm632_vm2, %v2911_v37 }
 0x85e   :  { %6901 = vmatprep.mubr.msk.bf16.mxu0 %vm632_vm2, %v2912_v0 }
 0x865   :  { %6902 = vmatmul.mubr.msk.bf16.gmra.mrb[32].mxu0 %vm632_vm2, %v2913_v7 }
 0x930   :  { %v6899_v12 = vpop.f32.mrb[28].mxu0 }
 0x931   :  { %v3001_v27 = vmul.f32 %v7626_v63, %v6899_v12  ;;  %v2960_v50 = vpop.f32.mrb[29].mxu0 }
 0x932   :  { %v2999_v30 = vmul.f32 %v7626_v63, %v2960_v50  ;;  %v6900_v42 = vpop.f32.mrb[30].mxu0 }
 0x933   :  { %v3009_v39 = vadd.f32 %v7627_v53, %v3001_v27  ;;  %v3002_v3 = vmul.f32 %v7626_v63, %v6900_v42  ;;  %v2963_v56 = vpop.f32.mrb[31].mxu0 }
 0x934   :  { %v3007_v10 = vadd.f32 %v7627_v53, %v2999_v30  ;;  %v3000_v4 = vmul.f32 %v7626_v63, %v2963_v56 }
 0x935   :  { %v3017_v13 = vmax.f32 %v3009_v39, 0.0  ;;  %v3010_v2 = vadd.f32 %v7627_v53, %v3002_v3 }
 0x936   :  { %v3015_v43 = vmax.f32 %v3007_v10, 0.0  ;;  %v3008_v37 = vadd.f32 %v7627_v53, %v3000_v4 }
 0x937   :  { %v3034_v15 = vrot.slane %v3017_v13, 7  ;;  %v3018_v58 = vmax.f32 %v3010_v2, 0.0  ;;  %v3058_v6 = vrot.slane %v3017_v13, 1 }
 0x938   :  { %v3031_v8 = vrot.slane %v3015_v43, 7  ;;  %v3055_v9 = vrot.slane %v3015_v43, 1  ;;  %v3016_v28 = vmax.f32 %v3008_v37, 0.0  ;;  %v6903_v5 = vpop.f32.mrb[32].mxu0 }
 0x939   :  { %v9211_v16 = vsel %vm309_vm0, 0.0, %v3034_v15  ;;  %v3035_v52 = vrot.slane %v3018_v58, 7  ;;  %v3059_v35 = vrot.slane %v3018_v58, 1  ;;  %v3084_v0 = vpack.c.bf16 %v3018_v58, %v3017_v13  ;;  %v2976_v21 = vpop.f32.mrb[33].mxu0 }
 0x93a   :  { %v3032_v44 = vrot.slane %v3016_v28, 7  ;;  %v3056_v7 = vrot.slane %v3016_v28, 1  ;;  %v3005_v61 = vmul.f32 %v7626_v63, %v6903_v5  ;;  %v3003_v12 = vmul.f32 %v7626_v63, %v2976_v21  ;;  %v6904_v27 = vpop.f32.mrb[34].mxu0 }
 0x93b   :  { %v3036_v50 = vsel %vm309_vm0, %v3034_v15, %v3035_v52  ;;  %v9215_v30 = vsel %vm330_vm1, %v3058_v6, %v3059_v35  ;;  %v9218_v42 = vsel %vm330_vm1, %v3059_v35, 0.0  ;;  %v3006_v39 = vmul.f32 %v7626_v63, %v6904_v27  ;;  %v2979_v3 = vpop.f32.mrb[35].mxu0 }
 0x93c   :  { %v3080_v56 = vpack.c.bf16 %v3036_v50, %v9211_v16  ;;  %v3242_v10 = vpack.c.bf16 %v9218_v42, %v9215_v30  ;;  %v3013_v4 = vadd.f32 %v7627_v53, %v3005_v61  ;;  %v3011_v13 = vadd.f32 %v7627_v53, %v3003_v12 }
 0x93d   :  { %v3014_v2 = vadd.f32 %v7627_v53, %v3006_v39  ;;  %v3004_v37 = vmul.f32 %v7626_v63, %v2979_v3  ;;  %v3083_v58 = vpack.c.bf16 %v3016_v28, %v3015_v43  ;;  %v3033_v15 = vsel %vm309_vm0, %v3031_v8, %v3032_v44 }
 0x93e   :  { %v3021_v5 = vmax.f32 %v3013_v4, 0.0  ;;  %v3019_v6 = vmax.f32 %v3011_v13, 0.0  ;;  %v3051_v52 = vsel %vm309_vm0, 0.0, %v3031_v8  ;;  %v3057_v35 = vsel %vm330_vm1, %v3055_v9, %v3056_v7  ;;  %v7628_v9 = vld [vmem:[#allocation11 + $0x8] sm:$0xff]  }
 0x93f   :  { %v3022_v21 = vmax.f32 %v3014_v2, 0.0  ;;  %v3012_v27 = vadd.f32 %v7627_v53, %v3004_v37  ;;  %6909 = vmatprep.mubr.msk.bf16.mxu1 %vm632_vm2, %v3083_v58  ;;  %v3079_v16 = vpack.c.bf16 %v3033_v15, %v3051_v52  ;;  %v3075_v50 = vsel %vm330_vm1, %v3056_v7, 0.0 }
 0x940   :  { %v3040_v61 = vrot.slane %v3021_v5, 7  ;;  %v3037_v12 = vrot.slane %v3019_v6, 7  ;;  %6910 = vmatmul.mubr.msk.bf16.vlgmr.msra.gmra.mrb[24].mxu1 %vm632_vm2, %v3084_v0  ;;  %v3064_v8 = vrot.slane %v3021_v5, 1  ;;  %v3061_v30 = vrot.slane %v3019_v6, 1 }
 0x941   :  { %v3041_v63 = vrot.slane %v3022_v21, 7  ;;  %v3065_v43 = vrot.slane %v3022_v21, 1  ;;  %v3020_v28 = vmax.f32 %v3012_v27, 0.0  ;;  %6918 = vmatpush3.bf16.msra.mxu1 %v9089_v60  ;;  %v3086_v44 = vpack.c.bf16 %v3022_v21, %v3021_v5  ;;  %v7630_v21 = vld [vmem:[#allocation11 + $0x28] sm:$0xff]  }
 0x942   :  { %6919 = vmatprep.subr.bf16.mxu1 %v7628_v9  ;;  %v3054_v53 = vsel %vm309_vm0, 0.0, %v3040_v61  ;;  %v3241_v42 = vpack.c.bf16 %v3075_v50, %v3057_v35  ;;  %v3053_v0 = vsel %vm309_vm0, 0.0, %v3037_v12  ;;  %v7567_v27 = vld [vmem:[#allocation15 + $0x10] sm:$0xff]  }
 0x943   :  { %v3038_v39 = vrot.slane %v3020_v28, 7  ;;  %v3062_v3 = vrot.slane %v3020_v28, 1  ;;  %v3085_v7 = vpack.c.bf16 %v3020_v28, %v3019_v6  ;;  %v3042_v4 = vsel %vm309_vm0, %v3040_v61, %v3041_v63  ;;  %v7629_v6 = vld [vmem:[#allocation11 + $0x20] sm:$0xff]   ;;  %6941 = vmatprep.subr.bf16.mxu0 %v7567_v27  ;;  %v9255_v50 = vld [vmem:[#allocation20 + $0x20] sm:$0xff]  }
 0x944   :  { %v3082_v13 = vpack.c.bf16 %v3042_v4, %v3054_v53  ;;  %v3066_v2 = vsel %vm330_vm1, %v3064_v8, %v3065_v43  ;;  %v3078_v60 = vsel %vm330_vm1, %v3065_v43, 0.0  ;;  %6942 = vmatpush3.bf16.msra.mxu0 %v7567_v27  ;;  %v3348_v61 = vadd.f32 %v9096_v45, %v8918_v47 }
 0x945   :  { %6913 = vmatprep.mubr.msk.bf16.mxu1 %vm632_vm2, %v3085_v7  ;;  %6920 = vmatpush3.bf16.msra.mxu1 %v7628_v9  ;;  %v3039_v37 = vsel %vm309_vm0, %v3037_v12, %v3038_v39  ;;  %v3063_v58 = vsel %vm330_vm1, %v3061_v30, %v3062_v3  ;;  %v3077_v15 = vsel %vm330_vm1, %v3062_v3, 0.0  ;;  %v3244_v5 = vpack.c.bf16 %v3078_v60, %v3066_v2  ;;  %v7631_v9 = vld [vmem:[#allocation12] ss:$0 sm:$0xff] }
 0x946   :  { %6929 = vmatprep.subr.bf16.mxu1 %v7629_v6  ;;  %v3081_v52 = vpack.c.bf16 %v3039_v37, %v3053_v0  ;;  %v3243_v35 = vpack.c.bf16 %v3077_v15, %v3063_v58  ;;  %v3346_v12 = vadd.f32 %v9102_v46, %v8922_v62  ;;  %v3349_v63 = vadd.f32 %v9109_v11, %v8926_v54  ;;  %v7632_v62 = vld [vmem:[#allocation14] ss:$0 sm:$0xff] }
 0x947   :  { %v3347_v43 = vadd.f32 %v9115_v29, %v8929_v1  ;;  %v3356_v28 = vmul.f32 3.0, %v3348_v61  ;;  %v3352_v47 = vadd.f32 %v9136_v59, %v8950_v34  ;;  %v3350_v1 = vadd.f32 %v9156_v36, %v8953_v41 }
 0x948   :  { %6914 = vmatmul.mubr.msk.bf16.gmra.mrb[28].mxu1 %vm632_vm2, %v3086_v44  ;;  %v3354_v44 = vmul.f32 3.0, %v3346_v12  ;;  %v3357_v30 = vmul.f32 3.0, %v3349_v63  ;;  %v3351_v59 = vadd.f32 %v9162_v31, %v8965_v38 }
 0x949   :  { %6921 = vmatprep.mubr.msk.bf16.mxu1 %vm632_vm2, %v3079_v16  ;;  %v7568_v16 = vld [vmem:[#allocation15 + $0x18] sm:$0xff]   ;;  %v3355_v39 = vmul.f32 3.0, %v3347_v43  ;;  %v3364_v54 = vadd.f32 %v3356_v28, %v8737_v18  ;;  %v3360_v15 = vmul.f32 3.0, %v3352_v47 }
 0x94a   :  { %6943 = vmatprep.subr.bf16.mxu0 %v7568_v16  ;;  %v3362_v4 = vadd.f32 %v3354_v44, %v8741_v22  ;;  %v3365_v34 = vadd.f32 %v3357_v30, %v8745_v23  ;;  %v3359_v27 = vmul.f32 3.0, %v3351_v59 }
 0x94b   :  { %6944 = vmatpush3.bf16.msra.mxu0 %v7568_v16  ;;  %v3363_v58 = vadd.f32 %v3355_v39, %v8751_v26  ;;  %v3368_v63 = vadd.f32 %v3360_v15, %v8782_v55 }
 0x94c   :  { %v3367_v39 = vadd.f32 %v3359_v27, %v9978_v40 }
 0x950   :  { %6922 = vmatmul.mubr.msk.bf16.vlgmr.msra.gmra.mrb[24].mxu1 %vm632_vm2, %v3080_v56  ;;  %v8070_v56 = vmov 0.0  }
 0x951   :  { %6930 = vmatpush3.bf16.msra.mxu1 %v7629_v6  ;;  %6925 = vmatprep.mubr.msk.bf16.mxu1 %vm632_vm2, %v3081_v52  ;;  %3395 = vst.msk [vmem:[#allocation2] sm:$0x1] %vm3394_vm3, %v8070_v56  ;;  %3396 = vst.msk [vmem:[#allocation2 + $0x18] sm:$0x1] %vm3394_vm3, %v8070_v56 }
 0x952   :  { %6931 = vmatprep.subr.bf16.mxu1 %v7630_v21  ;;  %3397 = vst.msk [vmem:[#allocation2 + $0x30] sm:$0x1] %vm3394_vm3, %v8070_v56  ;;  %3398 = vst.msk [vmem:[#allocation2 + $0x48] sm:$0x1] %vm3394_vm3, %v8070_v56 }
 0x955   :  { %6932 = vmatpush3.bf16.msra.mxu1 %v7630_v21 }
 0x956   :  { %6965 = vmatprep.subr.bf16.mxu1 %v9255_v50 }
 0x958   :  { %6926 = vmatmul.mubr.msk.bf16.gmra.mrb[28].mxu1 %vm632_vm2, %v3082_v13  ;;  %v3353_v13 = vadd.f32 %v9159_v49, %v8960_v17 }
 0x959   :  { %6933 = vmatprep.mubr.msk.bf16.mxu1 %vm632_vm2, %v3241_v42 }
 0x960   :  { %6934 = vmatmul.mubr.msk.bf16.vlgmr.msra.gmra.mrb[24].mxu1 %vm632_vm2, %v3242_v10  ;;  %v9252_v10 = vld [vmem:[#allocation15] sm:$0xff]  }
 0x961   :  { %6937 = vmatprep.mubr.msk.bf16.mxu1 %vm632_vm2, %v3243_v35  ;;  %6949 = vmatprep.subr.bf16.mxu0 %v9252_v10  ;;  %v3361_v35 = vmul.f32 3.0, %v3353_v13 }
 0x962   :  { %6966 = vmatpush3.bf16.msra.mxu1 %v9255_v50 }
 0x968   :  { %6938 = vmatmul.mubr.msk.bf16.gmra.mrb[28].mxu1 %vm632_vm2, %v3244_v5  ;;  %v3358_v5 = vmul.f32 3.0, %v3350_v1 }
 0xa33   :  { %v6935_v8 = vpop.f32.mrb[24].mxu1 }
 0xa34   :  { %v3332_v53 = vmul.f32 %v7631_v9, %v6935_v8  ;;  %v3291_v42 = vpop.f32.mrb[25].mxu1  ;;  %v3366_v8 = vadd.f32 %v3358_v5, %v8773_v48  ;;  %v9312_v5 = vld [vmem:[#allocation20 + $0x38] sm:$0xff]  }
 0xa35   :  { %v3330_v3 = vmul.f32 %v7631_v9, %v3291_v42  ;;  %v6936_v7 = vpop.f32.mrb[26].mxu1  ;;  %v3369_v42 = vadd.f32 %v3361_v35, %v8788_v57 }
 0xa36   :  { %v3340_v45 = vadd.f32 %v7632_v62, %v3332_v53  ;;  %v3333_v46 = vmul.f32 %v7631_v9, %v6936_v7  ;;  %v3294_v11 = vpop.f32.mrb[27].mxu1 }
 0xa37   :  { %v3338_v29 = vadd.f32 %v7632_v62, %v3330_v3  ;;  %v3331_v0 = vmul.f32 %v7631_v9, %v3294_v11 }
 0xa38   :  { %v3372_v2 = vadd.f32 %v3364_v54, %v3340_v45  ;;  %v3341_v60 = vadd.f32 %v7632_v62, %v3333_v46 }
 0xa39   :  { %v3370_v18 = vadd.f32 %v3362_v4, %v3338_v29  ;;  %v3339_v37 = vadd.f32 %v7632_v62, %v3331_v0  ;;  %v7570_v0 = vld [vmem:[#allocation15 + $0x8] sm:$0xff]  }
 0xa3a   :  { %v3380_v41 = vmul.f32 0.125, %v3372_v2  ;;  %v3373_v36 = vadd.f32 %v3365_v34, %v3341_v60 }
 0xa3b   :  { %v3378_v22 = vmul.f32 0.125, %v3370_v18  ;;  %v3371_v6 = vadd.f32 %v3363_v58, %v3339_v37  ;;  %v6939_v52 = vpop.f32.mrb[28].mxu1  ;;  %v7572_v18 = vld [vmem:[#allocation15 + $0x28] sm:$0xff]  }
 0xa3c   :  { %v3388_v17 = vadd.f32 %v3380_v41, %v8530_v33  ;;  %v3381_v49 = vmul.f32 0.125, %v3373_v36  ;;  %v3336_v21 = vmul.f32 %v7631_v9, %v6939_v52  ;;  %v3307_v23 = vpop.f32.mrb[29].mxu1  ;;  %v9306_v41 = vld [vmem:[#allocation20 + $0x28] sm:$0xff]   ;;  %v9310_v36 = vld [vmem:[#allocation20 + $0x30] sm:$0xff]   ;;  %v6223_v52 = vld [vmem:[#allocation17] ss:$0 sm:$0xff] }
 0xa3d   :  { %v3386_v38 = vadd.f32 %v3378_v22, %v8521_v25  ;;  %v3379_v31 = vmul.f32 0.125, %v3371_v6  ;;  %v3334_v16 = vmul.f32 %v7631_v9, %v3307_v23  ;;  %v6940_v61 = vpop.f32.mrb[30].mxu1  ;;  %6967 = vmatprep.subr.bf16.mxu1 %v9306_v41  ;;  %v9317_v22 = vld [vmem:[#allocation20] sm:$0xff]  }
 0xa3e   :  { %3401 = vst.msk [vmem:[#allocation2 + $0x19] sm:$0xff] %vm632_vm2, %v3388_v17  ;;  %v3389_v26 = vadd.f32 %v3381_v49, %v8528_v32  ;;  %v3344_v12 = vadd.f32 %v7632_v62, %v3336_v21  ;;  %v3337_v43 = vmul.f32 %v7631_v9, %v6940_v61  ;;  %v3310_v28 = vpop.f32.mrb[31].mxu1  ;;  %6968 = vmatpush3.bf16.msra.mxu1 %v9306_v41  ;;  %v9321_v6 = vld [vmem:[#allocation24 + $0x20] sm:$0xff]   ;;  %v6224_v49 = vld [vmem:[#allocation18] ss:$0 sm:$0xff] }
 0xa3f   :  { %3399 = vst.msk [vmem:[#allocation2 + $0x1] sm:$0xff] %vm632_vm2, %v3386_v38  ;;  %v3387_v33 = vadd.f32 %v3379_v31, %v8519_v24  ;;  %v3342_v44 = vadd.f32 %v7632_v62, %v3334_v16  ;;  %v3335_v25 = vmul.f32 %v7631_v9, %v3310_v28  ;;  %6969 = vmatprep.subr.bf16.mxu1 %v9310_v36 }
 0xa40   :  { %3402 = vst.msk [vmem:[#allocation2 + $0x21] sm:$0xff] %vm632_vm2, %v3389_v26  ;;  %v3376_v30 = vadd.f32 %v3368_v63, %v3344_v12  ;;  %v3345_v53 = vadd.f32 %v7632_v62, %v3337_v43 }
 0xa41   :  { %3400 = vst.msk [vmem:[#allocation2 + $0x9] sm:$0xff] %vm632_vm2, %v3387_v33  ;;  %v3374_v32 = vadd.f32 %v3366_v8, %v3342_v44  ;;  %v3343_v55 = vadd.f32 %v7632_v62, %v3335_v25 }
 0xa42   :  { %v3384_v3 = vmul.f32 0.125, %v3376_v30  ;;  %v3377_v7 = vadd.f32 %v3369_v42, %v3345_v53  ;;  %6970 = vmatpush3.bf16.msra.mxu1 %v9310_v36  ;;  %v9339_v42 = vld [vmem:[#allocation20 + $0x8] sm:$0xff]  }
 0xa43   :  { %v3382_v47 = vmul.f32 0.125, %v3374_v32  ;;  %v3375_v24 = vadd.f32 %v3367_v39, %v3343_v55  ;;  %6971 = vmatprep.subr.bf16.mxu1 %v9312_v5 }
 0xa44   :  { %v3392_v45 = vadd.f32 %v3384_v3, %v8580_v20  ;;  %v3385_v48 = vmul.f32 0.125, %v3377_v7  ;;  %v9348_v3 = vld [vmem:[#allocation20 + $0x10] sm:$0xff]   ;;  %v9352_v7 = vld [vmem:[#allocation20 + $0x18] sm:$0xff]  }
 0xa45   :  { %v3390_v9 = vadd.f32 %v3382_v47, %v8570_v51  ;;  %v3383_v54 = vmul.f32 0.125, %v3375_v24 }
 0xa46   :  { %3405 = vst.msk [vmem:[#allocation2 + $0x49] sm:$0xff] %vm632_vm2, %v3392_v45  ;;  %v3393_v57 = vadd.f32 %v3385_v48, %v8578_v19  ;;  %6972 = vmatpush3.bf16.msra.mxu1 %v9312_v5  ;;  %v9359_v48 = vld [vmem:[#allocation20 + $0x40] sm:$0xff]  }
 0xa47   :  { %3403 = vst.msk [vmem:[#allocation2 + $0x31] sm:$0xff] %vm632_vm2, %v3390_v9  ;;  %v3391_v62 = vadd.f32 %v3383_v54, %v8568_v14  ;;  %v3417_v46 = vld [vmem:[#allocation2 + $0x19] ss:$2 sm:$0xff]  ;;  %v3409_v1 = vld [vmem:[#allocation2 + $0x18] ss:$2 sm:$0xff]  ;;  %6977 = vmatprep.subr.bf16.mxu1 %v9317_v22 }
 0xa48   :  { %3406 = vst.msk [vmem:[#allocation2 + $0x51] sm:$0xff] %vm632_vm2, %v3393_v57  ;;  %v3415_v40 = vld [vmem:[#allocation2 + $0x1] ss:$2 sm:$0xff]  ;;  %v3407_v51 = vld [vmem:[#allocation2] ss:$2 sm:$0xff] }
 0xa49   :  { %3404 = vst.msk [vmem:[#allocation2 + $0x39] sm:$0xff] %vm632_vm2, %v3391_v62  ;;  %v3436_v11 = vpack.c.bf16 %v3417_v46, %v3415_v40  ;;  %v3430_v19 = vpack.c.bf16 %v3409_v1, %v3407_v51  ;;  %v7571_v14 = vld [vmem:[#allocation15 + $0x20] sm:$0xff]   ;;  %v9378_v1 = vld [vmem:[#allocation20 + $0x58] sm:$0xff]  }
 0xa4a   :  { %v3423_v60 = vld [vmem:[#allocation2 + $0x2] ss:$2 sm:$0xff] }
 0xa4b   :  { %6945 = vmatprep.mubr.msk.bf16.mxu0 %vm632_vm2, %v3436_v11  ;;  %v3425_v34 = vld [vmem:[#allocation2 + $0x1a] ss:$2 sm:$0xff] }
 0xa4c   :  { %v3576_v37 = vpack.c.bf16 %v3425_v34, %v3423_v60  ;;  %v9368_v11 = vld [vmem:[#allocation20 + $0x48] sm:$0xff]   ;;  %v9374_v51 = vld [vmem:[#allocation20 + $0x50] sm:$0xff]   ;;  %v9403_v60 = vld [vmem:[#allocation24 + $0x38] sm:$0xff]  }
 0xa4d   :  { %v9408_v34 = vld [vmem:[#allocation24] sm:$0xff]  }
 0xa4f   :  { %v3421_v20 = vld [vmem:[#allocation2 + $0x49] ss:$2 sm:$0xff]  ;;  %v3413_v2 = vld [vmem:[#allocation2 + $0x48] ss:$2 sm:$0xff] }
 0xa50   :  { %v3419_v29 = vld [vmem:[#allocation2 + $0x31] ss:$2 sm:$0xff]  ;;  %v3411_v13 = vld [vmem:[#allocation2 + $0x30] ss:$2 sm:$0xff] }
 0xa51   :  { %v3437_v4 = vpack.c.bf16 %v3421_v20, %v3419_v29  ;;  %v3431_v59 = vpack.c.bf16 %v3413_v2, %v3411_v13  ;;  %v3429_v58 = vld [vmem:[#allocation2 + $0x4a] ss:$2 sm:$0xff]  ;;  %v9397_v13 = vld [vmem:[#allocation24 + $0x28] sm:$0xff]  }
 0xa52   :  { %v9401_v2 = vld [vmem:[#allocation24 + $0x30] sm:$0xff]  }
 0xa53   :  { %6946 = vmatmul.mubr.msk.bf16.vlgmr.msra.gmra.mrb[36].mxu0 %vm632_vm2, %v3437_v4 }
 0xa54   :  { %6950 = vmatpush3.bf16.msra.mxu0 %v9252_v10  ;;  %6953 = vmatprep.mubr.msk.bf16.mxu0 %vm632_vm2, %v3430_v19  ;;  %v3427_v10 = vld [vmem:[#allocation2 + $0x32] ss:$2 sm:$0xff] }
 0xa55   :  { %6951 = vmatprep.subr.bf16.mxu0 %v7570_v0  ;;  %v3577_v15 = vpack.c.bf16 %v3429_v58, %v3427_v10 }
 0xa58   :  { %6952 = vmatpush3.bf16.msra.mxu0 %v7570_v0 }
 0xa59   :  { %6957 = vmatprep.subr.bf16.mxu0 %v7571_v14 }
 0xa5f   :  { %6954 = vmatmul.mubr.msk.bf16.vlgmr.msra.gmra.mrb[36].mxu0 %vm632_vm2, %v3431_v59  ;;  %v9412_v59 = vld [vmem:[#allocation21] ss:$0 sm:$0xff] }
 0xa60   :  { %6958 = vmatpush3.bf16.msra.mxu0 %v7571_v14  ;;  %6961 = vmatprep.mubr.msk.bf16.mxu0 %vm632_vm2, %v3576_v37  ;;  %v9414_v37 = vld [vmem:[#allocation23] ss:$0 sm:$0xff] }
 0xa61   :  { %6959 = vmatprep.subr.bf16.mxu0 %v7572_v18 }
 0xa64   :  { %6960 = vmatpush3.bf16.msra.mxu0 %v7572_v18 }
 0xa65   :  { %7001 = vmatprep.subr.bf16.mxu0 %v9321_v6 }
 0xa6b   :  { %6962 = vmatmul.mubr.msk.bf16.vlgmr.msra.gmra.mrb[36].mxu0 %vm632_vm2, %v3577_v15 }
 0xa6c   :  { %7002 = vmatpush3.bf16.msra.mxu0 %v9321_v6 }
 0xa6d   :  { %7003 = vmatprep.subr.bf16.mxu0 %v9397_v13 }
 0xa70   :  { %7004 = vmatpush3.bf16.msra.mxu0 %v9397_v13 }
 0xa71   :  { %7005 = vmatprep.subr.bf16.mxu0 %v9401_v2 }
 0xa74   :  { %7006 = vmatpush3.bf16.msra.mxu0 %v9401_v2 }
 0xa75   :  { %7007 = vmatprep.subr.bf16.mxu0 %v9403_v60 }
 0xa78   :  { %7008 = vmatpush3.bf16.msra.mxu0 %v9403_v60 }
 0xa79   :  { %7013 = vmatprep.subr.bf16.mxu0 %v9408_v34 }
 0xb3e   :  { %v6963_v35 = vpop.f32.mrb[36].mxu0 }
 0xb3f   :  { %v3662_v17 = vmul.f32 %v6963_v35, %v6223_v52  ;;  %v3634_v21 = vpop.f32.mrb[37].mxu0 }
 0xb40   :  { %v3660_v23 = vmul.f32 %v6223_v52, %v3634_v21  ;;  %v6964_v27 = vpop.f32.mrb[38].mxu0 }
 0xb41   :  { %v3663_v38 = vmul.f32 %v6964_v27, %v6223_v52  ;;  %v3637_v31 = vpop.f32.mrb[39].mxu0  ;;  %v3673_v26 = vadd.f32 %v6224_v49, %v3662_v17 }
 0xb42   :  { %v3671_v16 = vadd.f32 %v6224_v49, %v3660_v23  ;;  %v3661_v61 = vmul.f32 %v6223_v52, %v3637_v31 }
 0xb43   :  { %v3674_v12 = vadd.f32 %v6224_v49, %v3663_v38  ;;  %v9332_v8 = vmax.f32 %v3673_v26, 0.0 }
 0xb44   :  { %v9325_v63 = vmax.f32 %v3671_v16, 0.0  ;;  %v3672_v43 = vadd.f32 %v6224_v49, %v3661_v61 }
 0xb45   :  { %v9327_v28 = vmax.f32 %v3674_v12, 0.0  ;;  %v3685_v45 = vrot.slane %v9332_v8, 7  ;;  %v3697_v4 = vrot.slane %v9332_v8, 1 }
 0xb46   :  { %v9329_v33 = vmax.f32 %v3672_v43, 0.0  ;;  %v3683_v44 = vrot.slane %v9325_v63, 7  ;;  %v3695_v9 = vrot.slane %v9325_v63, 1 }
 0xb47   :  { %v3718_v53 = vpack.c.bf16 %v9327_v28, %v9332_v8  ;;  %v3686_v47 = vrot.slane %v9327_v28, 7  ;;  %v3693_v62 = vsel %vm309_vm0, 0.0, %v3685_v45  ;;  %v3698_v29 = vrot.slane %v9327_v28, 1 }
 0xb48   :  { %v3717_v25 = vpack.c.bf16 %v9329_v33, %v9325_v63  ;;  %v3684_v30 = vrot.slane %v9329_v33, 7  ;;  %v3691_v32 = vsel %vm309_vm0, 0.0, %v3683_v44  ;;  %v3696_v24 = vrot.slane %v9329_v33, 1 }
 0xb49   :  { %v3694_v54 = vsel %vm309_vm0, 0.0, %v3686_v47  ;;  %v3703_v40 = vsel %vm330_vm1, %v3695_v9, 0.0  ;;  %v3706_v0 = vsel %vm330_vm1, %v3698_v29, 0.0  ;;  %v3705_v19 = vsel %vm330_vm1, %v3697_v4, 0.0 }
 0xb4a   :  { %6973 = vmatprep.mubr.msk.bf16.mxu1 %vm3751_vm4, %v3717_v25  ;;  %v3692_v55 = vsel %vm309_vm0, 0.0, %v3684_v30  ;;  %v3704_v57 = vsel %vm330_vm1, %v3696_v24, 0.0  ;;  %v3708_v46 = vpack.c.bf16 %v3694_v54, %v3693_v62  ;;  %v3887_v14 = vpack.c.bf16 %v3706_v0, %v3705_v19  ;;  %v9429_v62 = vld [vmem:[#allocation24 + $0x8] sm:$0xff]  }
 0xb4b   :  { %6974 = vmatmul.mubr.msk.bf16.vlgmr.msra.gmra.mrb[32].mxu1 %vm3751_vm4, %v3718_v53  ;;  %v3707_v39 = vpack.c.bf16 %v3692_v55, %v3691_v32  ;;  %v3886_v20 = vpack.c.bf16 %v3704_v57, %v3703_v40 }
 0xb4c   :  { %6978 = vmatpush3.bf16.msra.mxu1 %v9317_v22 }
 0xb4d   :  { %6985 = vmatprep.mubr.msk.bf16.mxu1 %vm3751_vm4, %v3707_v39  ;;  %6979 = vmatprep.subr.bf16.mxu1 %v9339_v42 }
 0xb50   :  { %6980 = vmatpush3.bf16.msra.mxu1 %v9339_v42 }
 0xb51   :  { %6981 = vmatprep.subr.bf16.mxu1 %v9348_v3 }
 0xb54   :  { %6982 = vmatpush3.bf16.msra.mxu1 %v9348_v3 }
 0xb55   :  { %6983 = vmatprep.subr.bf16.mxu1 %v9352_v7 }
 0xb58   :  { %6984 = vmatpush3.bf16.msra.mxu1 %v9352_v7 }
 0xb59   :  { %6989 = vmatprep.subr.bf16.mxu1 %v9359_v48 }
 0xb5b   :  { %6986 = vmatmul.mubr.msk.bf16.vlgmr.msra.gmra.mrb[32].mxu1 %vm3751_vm4, %v3708_v46 }
 0xb5c   :  { %6990 = vmatpush3.bf16.msra.mxu1 %v9359_v48  ;;  %6997 = vmatprep.mubr.msk.bf16.mxu1 %vm3751_vm4, %v3886_v20 }
 0xb5d   :  { %6991 = vmatprep.subr.bf16.mxu1 %v9368_v11 }
 0xb60   :  { %6992 = vmatpush3.bf16.msra.mxu1 %v9368_v11 }
 0xb61   :  { %6993 = vmatprep.subr.bf16.mxu1 %v9374_v51 }
 0xb64   :  { %6994 = vmatpush3.bf16.msra.mxu1 %v9374_v51 }
 0xb65   :  { %6995 = vmatprep.subr.bf16.mxu1 %v9378_v1 }
 0xb68   :  { %6996 = vmatpush3.bf16.msra.mxu1 %v9378_v1 }
 0xb69   :  { %7037 = vmatprep.subr.bf16.mxu1 %v9255_v50 }
 0xb6b   :  { %6998 = vmatmul.mubr.msk.bf16.vlgmr.msra.gmra.mrb[32].mxu1 %vm3751_vm4, %v3887_v14  ;;  %v9439_v14 = vld [vmem:[#allocation24 + $0x10] sm:$0xff]  }
 0xb6c   :  { %7038 = vmatpush3.bf16.msra.mxu1 %v9255_v50 }
 0xb6d   :  { %7039 = vmatprep.subr.bf16.mxu1 %v9306_v41 }
 0xb70   :  { %7040 = vmatpush3.bf16.msra.mxu1 %v9306_v41 }
 0xb71   :  { %7041 = vmatprep.subr.bf16.mxu1 %v9310_v36 }
 0xb74   :  { %7042 = vmatpush3.bf16.msra.mxu1 %v9310_v36 }
 0xb75   :  { %7043 = vmatprep.subr.bf16.mxu1 %v9312_v5 }
 0xb78   :  { %7044 = vmatpush3.bf16.msra.mxu1 %v9312_v5 }
 0xb79   :  { %7049 = vmatprep.subr.bf16.mxu1 %v9317_v22 }
 0xc3e   :  { %v6999_v18 = vpop.f32.mrb[32].mxu1 }
 0xc3f   :  { %v3988_v10 = vmul.f32 %v6999_v18, %v9412_v59  ;;  %v3960_v58 = vpop.f32.mrb[33].mxu1  ;;  %v9443_v18 = vld [vmem:[#allocation24 + $0x18] sm:$0xff]  }
 0xc40   :  { %v3986_v15 = vmul.f32 %v9412_v59, %v3960_v58  ;;  %v7000_v52 = vpop.f32.mrb[34].mxu1  ;;  %v9451_v58 = vld [vmem:[#allocation24 + $0x48] sm:$0xff]  }
 0xc41   :  { %v3999_v35 = vadd.f32 %v9414_v37, %v3988_v10  ;;  %v3989_v17 = vmul.f32 %v7000_v52, %v9412_v59  ;;  %v3963_v49 = vpop.f32.mrb[35].mxu1  ;;  %v9447_v10 = vld [vmem:[#allocation24 + $0x40] sm:$0xff]   ;;  %v9461_v52 = vld [vmem:[#allocation24 + $0x58] sm:$0xff]  }
 0xc42   :  { %v3997_v21 = vadd.f32 %v9414_v37, %v3986_v15  ;;  %v3987_v23 = vmul.f32 %v9412_v59, %v3963_v49  ;;  %v9457_v15 = vld [vmem:[#allocation24 + $0x50] sm:$0xff]   ;;  %v9481_v49 = vld [vmem:[%s9945_s18] ss:$0 sm:$0xff] }
 0xc43   :  { %v4003_v27 = vmax.f32 %v3999_v35, 0.0  ;;  %v4000_v38 = vadd.f32 %v9414_v37, %v3989_v17  ;;  %v9476_v35 = vld [vmem:[#allocation26] ss:$0 sm:$0xff] }
 0xc44   :  { %v4001_v31 = vmax.f32 %v3997_v21, 0.0  ;;  %v3998_v16 = vadd.f32 %v9414_v37, %v3987_v23 }
 0xc45   :  { %v4011_v61 = vrot.slane %v4003_v27, 7  ;;  %v4023_v26 = vrot.slane %v4003_v27, 1  ;;  %v4004_v12 = vmax.f32 %v4000_v38, 0.0 }
 0xc46   :  { %v4009_v43 = vrot.slane %v4001_v31, 7  ;;  %v4021_v44 = vrot.slane %v4001_v31, 1  ;;  %v4002_v25 = vmax.f32 %v3998_v16, 0.0 }
 0xc47   :  { %v4019_v30 = vsel %vm309_vm0, 0.0, %v4011_v61  ;;  %v4031_v53 = vsel %vm330_vm1, %v4023_v26, 0.0  ;;  %v4012_v32 = vrot.slane %v4004_v12, 7  ;;  %v4024_v55 = vrot.slane %v4004_v12, 1 }
 0xc48   :  { %v4044_v39 = vpack.c.bf16 %v4004_v12, %v4003_v27  ;;  %v4010_v47 = vrot.slane %v4002_v25, 7  ;;  %v4022_v24 = vrot.slane %v4002_v25, 1  ;;  %v4043_v45 = vpack.c.bf16 %v4002_v25, %v4001_v31 }
 0xc49   :  { %v4020_v9 = vsel %vm309_vm0, 0.0, %v4012_v32  ;;  %v4032_v54 = vsel %vm330_vm1, %v4024_v55, 0.0  ;;  %v4017_v57 = vsel %vm309_vm0, 0.0, %v4009_v43  ;;  %v4029_v46 = vsel %vm330_vm1, %v4021_v44, 0.0 }
 0xc4a   :  { %v4034_v40 = vpack.c.bf16 %v4020_v9, %v4019_v30  ;;  %v4212_v20 = vpack.c.bf16 %v4032_v54, %v4031_v53  ;;  %7009 = vmatprep.mubr.msk.bf16.mxu0 %vm3751_vm4, %v4043_v45  ;;  %v4018_v29 = vsel %vm309_vm0, 0.0, %v4010_v47  ;;  %v4030_v4 = vsel %vm330_vm1, %v4022_v24, 0.0 }
 0xc4b   :  { %7010 = vmatmul.mubr.msk.bf16.vlgmr.msra.gmra.mrb[40].mxu0 %vm3751_vm4, %v4044_v39  ;;  %v4033_v0 = vpack.c.bf16 %v4018_v29, %v4017_v57  ;;  %v4211_v19 = vpack.c.bf16 %v4030_v4, %v4029_v46 }
 0xc4c   :  { %7014 = vmatpush3.bf16.msra.mxu0 %v9408_v34 }
 0xc4d   :  { %7021 = vmatprep.mubr.msk.bf16.mxu0 %vm3751_vm4, %v4033_v0  ;;  %7015 = vmatprep.subr.bf16.mxu0 %v9429_v62 }
 0xc50   :  { %7016 = vmatpush3.bf16.msra.mxu0 %v9429_v62 }
 0xc51   :  { %7017 = vmatprep.subr.bf16.mxu0 %v9439_v14 }
 0xc54   :  { %7018 = vmatpush3.bf16.msra.mxu0 %v9439_v14 }
 0xc55   :  { %7019 = vmatprep.subr.bf16.mxu0 %v9443_v18 }
 0xc58   :  { %7020 = vmatpush3.bf16.msra.mxu0 %v9443_v18 }
 0xc59   :  { %7025 = vmatprep.subr.bf16.mxu0 %v9447_v10 }
 0xc5b   :  { %7022 = vmatmul.mubr.msk.bf16.vlgmr.msra.gmra.mrb[40].mxu0 %vm3751_vm4, %v4034_v40 }
 0xc5c   :  { %7026 = vmatpush3.bf16.msra.mxu0 %v9447_v10  ;;  %7033 = vmatprep.mubr.msk.bf16.mxu0 %vm3751_vm4, %v4211_v19 }
 0xc5d   :  { %7027 = vmatprep.subr.bf16.mxu0 %v9451_v58 }
 0xc60   :  { %7028 = vmatpush3.bf16.msra.mxu0 %v9451_v58 }
 0xc61   :  { %7029 = vmatprep.subr.bf16.mxu0 %v9457_v15 }
 0xc64   :  { %7030 = vmatpush3.bf16.msra.mxu0 %v9457_v15 }
 0xc65   :  { %7031 = vmatprep.subr.bf16.mxu0 %v9461_v52 }
 0xc68   :  { %7032 = vmatpush3.bf16.msra.mxu0 %v9461_v52 }
 0xc69   :  { %7073 = vmatprep.subr.bf16.mxu0 %v9321_v6 }
 0xc6b   :  { %7034 = vmatmul.mubr.msk.bf16.vlgmr.msra.gmra.mrb[40].mxu0 %vm3751_vm4, %v4212_v20 }
 0xc6c   :  { %7074 = vmatpush3.bf16.msra.mxu0 %v9321_v6 }
 0xc6d   :  { %7075 = vmatprep.subr.bf16.mxu0 %v9397_v13 }
 0xc70   :  { %7076 = vmatpush3.bf16.msra.mxu0 %v9397_v13 }
 0xc71   :  { %7077 = vmatprep.subr.bf16.mxu0 %v9401_v2 }
 0xc74   :  { %7078 = vmatpush3.bf16.msra.mxu0 %v9401_v2 }
 0xc75   :  { %7079 = vmatprep.subr.bf16.mxu0 %v9403_v60 }
 0xc78   :  { %7080 = vmatpush3.bf16.msra.mxu0 %v9403_v60 }
 0xc79   :  { %7085 = vmatprep.subr.bf16.mxu0 %v9408_v34 }
 0xd3e   :  { %v7035_v17 = vpop.f32.mrb[40].mxu0 }
 0xd3f   :  { %v4313_v21 = vmul.f32 %v7035_v17, %v9476_v35  ;;  %v4285_v23 = vpop.f32.mrb[41].mxu0 }
 0xd40   :  { %v4311_v27 = vmul.f32 %v9476_v35, %v4285_v23  ;;  %v7036_v38 = vpop.f32.mrb[42].mxu0 }
 0xd41   :  { %v9486_v31 = vadd.f32 %v9481_v49, %v4313_v21  ;;  %v4314_v16 = vmul.f32 %v7036_v38, %v9476_v35  ;;  %v4288_v61 = vpop.f32.mrb[43].mxu0 }
 0xd42   :  { %v9490_v26 = vadd.f32 %v9481_v49, %v4311_v27  ;;  %v4312_v12 = vmul.f32 %v9476_v35, %v4288_v61 }
 0xd43   :  { %v9494_v43 = vadd.f32 %v9481_v49, %v4314_v16  ;;  %v9503_v30 = vmul.f32 0.33333334, %v9486_v31 }
 0xd44   :  { %v9497_v44 = vmul.f32 0.33333334, %v9490_v26  ;;  %v9500_v25 = vadd.f32 %v9481_v49, %v4312_v12 }
 0xd45   :  { %v9506_v53 = vmul.f32 0.33333334, %v9494_v43  ;;  %v4332_v45 = vadd.f32 %v9503_v30, %v9332_v8 }
 0xd46   :  { %v4330_v32 = vadd.f32 %v9497_v44, %v9325_v63  ;;  %v9511_v55 = vmul.f32 0.33333334, %v9500_v25 }
 0xd47   :  { %v4333_v39 = vadd.f32 %v9506_v53, %v9327_v28  ;;  %v4340_v0 = vrot.slane %v4332_v45, 7  ;;  %v4352_v12 = vrot.slane %v4332_v45, 1 }
 0xd48   :  { %v4331_v47 = vadd.f32 %v9511_v55, %v9329_v33  ;;  %v4338_v24 = vrot.slane %v4330_v32, 7  ;;  %v4350_v19 = vrot.slane %v4330_v32, 1 }
 0xd49   :  { %v4365_v57 = vpack.c.bf16 %v4333_v39, %v4332_v45  ;;  %v4341_v29 = vrot.slane %v4333_v39, 7  ;;  %v4348_v23 = vsel %vm309_vm0, 0.0, %v4340_v0  ;;  %v4353_v61 = vrot.slane %v4333_v39, 1 }
 0xd4a   :  { %v4364_v9 = vpack.c.bf16 %v4331_v47, %v4330_v32  ;;  %v4339_v54 = vrot.slane %v4331_v47, 7  ;;  %v4346_v46 = vsel %vm309_vm0, 0.0, %v4338_v24  ;;  %v4351_v4 = vrot.slane %v4331_v47, 1 }
 0xd4b   :  { %v4349_v17 = vsel %vm309_vm0, 0.0, %v4341_v29  ;;  %v4358_v38 = vsel %vm330_vm1, %v4350_v19, 0.0  ;;  %v4361_v32 = vsel %vm330_vm1, %v4353_v61, 0.0  ;;  %v4360_v47 = vsel %vm330_vm1, %v4352_v12, 0.0 }
 0xd4c   :  { %7045 = vmatprep.mubr.msk.bf16.mxu1 %vm3751_vm4, %v4364_v9  ;;  %v4347_v40 = vsel %vm309_vm0, 0.0, %v4339_v54  ;;  %v4359_v21 = vsel %vm330_vm1, %v4351_v4, 0.0  ;;  %v4363_v27 = vpack.c.bf16 %v4349_v17, %v4348_v23  ;;  %v4477_v24 = vpack.c.bf16 %v4361_v32, %v4360_v47 }
 0xd4d   :  { %7046 = vmatmul.mubr.msk.bf16.vlgmr.msra.gmra.mrb[36].mxu1 %vm3751_vm4, %v4365_v57  ;;  %v4362_v20 = vpack.c.bf16 %v4347_v40, %v4346_v46  ;;  %v4476_v16 = vpack.c.bf16 %v4359_v21, %v4358_v38 }
 0xd4e   :  { %7050 = vmatpush3.bf16.msra.mxu1 %v9317_v22 }
 0xd4f   :  { %7057 = vmatprep.mubr.msk.bf16.mxu1 %vm3751_vm4, %v4362_v20  ;;  %7051 = vmatprep.subr.bf16.mxu1 %v9339_v42 }
 0xd52   :  { %7052 = vmatpush3.bf16.msra.mxu1 %v9339_v42 }
 0xd53   :  { %7053 = vmatprep.subr.bf16.mxu1 %v9348_v3 }
 0xd56   :  { %7054 = vmatpush3.bf16.msra.mxu1 %v9348_v3 }
 0xd57   :  { %7055 = vmatprep.subr.bf16.mxu1 %v9352_v7 }
 0xd5a   :  { %7056 = vmatpush3.bf16.msra.mxu1 %v9352_v7 }
 0xd5b   :  { %7061 = vmatprep.subr.bf16.mxu1 %v9359_v48 }
 0xd5d   :  { %7058 = vmatmul.mubr.msk.bf16.vlgmr.msra.gmra.mrb[36].mxu1 %vm3751_vm4, %v4363_v27 }
 0xd5e   :  { %7062 = vmatpush3.bf16.msra.mxu1 %v9359_v48  ;;  %7069 = vmatprep.mubr.msk.bf16.mxu1 %vm3751_vm4, %v4476_v16 }
 0xd5f   :  { %7063 = vmatprep.subr.bf16.mxu1 %v9368_v11 }
 0xd62   :  { %7064 = vmatpush3.bf16.msra.mxu1 %v9368_v11 }
 0xd63   :  { %7065 = vmatprep.subr.bf16.mxu1 %v9374_v51 }
 0xd66   :  { %7066 = vmatpush3.bf16.msra.mxu1 %v9374_v51 }
 0xd67   :  { %7067 = vmatprep.subr.bf16.mxu1 %v9378_v1 }
 0xd6a   :  { %7068 = vmatpush3.bf16.msra.mxu1 %v9378_v1 }
 0xd6b   :  { %7109 = vmatprep.subr.bf16.mxu1 %v9255_v50 }
 0xd6d   :  { %7070 = vmatmul.mubr.msk.bf16.vlgmr.msra.gmra.mrb[36].mxu1 %vm3751_vm4, %v4477_v24 }
 0xd6e   :  { %7110 = vmatpush3.bf16.msra.mxu1 %v9255_v50 }
 0xd6f   :  { %7111 = vmatprep.subr.bf16.mxu1 %v9306_v41 }
 0xd72   :  { %7112 = vmatpush3.bf16.msra.mxu1 %v9306_v41 }
 0xd73   :  { %7113 = vmatprep.subr.bf16.mxu1 %v9310_v36 }
 0xd76   :  { %7114 = vmatpush3.bf16.msra.mxu1 %v9310_v36 }
 0xd77   :  { %7115 = vmatprep.subr.bf16.mxu1 %v9312_v5 }
 0xd7a   :  { %7116 = vmatpush3.bf16.msra.mxu1 %v9312_v5 }
 0xd7b   :  { %7121 = vmatprep.subr.bf16.mxu1 %v9317_v22 }
 0xe40   :  { %v7071_v39 = vpop.f32.mrb[36].mxu1 }
 0xe41   :  { %v4539_v45 = vmul.f32 %v7071_v39, %v9412_v59  ;;  %v4518_v9 = vpop.f32.mrb[37].mxu1 }
 0xe42   :  { %v4537_v54 = vmul.f32 %v9412_v59, %v4518_v9  ;;  %v7072_v57 = vpop.f32.mrb[38].mxu1 }
 0xe43   :  { %v4543_v46 = vadd.f32 %v9414_v37, %v4539_v45  ;;  %v4540_v40 = vmul.f32 %v7072_v57, %v9412_v59  ;;  %v4521_v20 = vpop.f32.mrb[39].mxu1 }
 0xe44   :  { %v4541_v29 = vadd.f32 %v9414_v37, %v4537_v54  ;;  %v4538_v4 = vmul.f32 %v9412_v59, %v4521_v20 }
 0xe45   :  { %v4547_v0 = vmax.f32 %v4543_v46, 0.0  ;;  %v4544_v19 = vadd.f32 %v9414_v37, %v4540_v40 }
 0xe46   :  { %v4545_v17 = vmax.f32 %v4541_v29, 0.0  ;;  %v4542_v21 = vadd.f32 %v9414_v37, %v4538_v4 }
 0xe47   :  { %v4555_v23 = vrot.slane %v4547_v0, 7  ;;  %v4567_v27 = vrot.slane %v4547_v0, 1  ;;  %v4548_v38 = vmax.f32 %v4544_v19, 0.0 }
 0xe48   :  { %v4553_v16 = vrot.slane %v4545_v17, 7  ;;  %v4565_v61 = vrot.slane %v4545_v17, 1  ;;  %v4546_v12 = vmax.f32 %v4542_v21, 0.0 }
 0xe49   :  { %v4563_v32 = vsel %vm309_vm0, 0.0, %v4555_v23  ;;  %v4575_v47 = vsel %vm330_vm1, %v4567_v27, 0.0  ;;  %v4556_v24 = vrot.slane %v4548_v38, 7  ;;  %v4568_v39 = vrot.slane %v4548_v38, 1 }
 0xe4a   :  { %v4580_v45 = vpack.c.bf16 %v4548_v38, %v4547_v0  ;;  %v4554_v9 = vrot.slane %v4546_v12, 7  ;;  %v4566_v54 = vrot.slane %v4546_v12, 1  ;;  %v4579_v57 = vpack.c.bf16 %v4546_v12, %v4545_v17 }
 0xe4b   :  { %v4564_v46 = vsel %vm309_vm0, 0.0, %v4556_v24  ;;  %v4576_v40 = vsel %vm330_vm1, %v4568_v39, 0.0  ;;  %v4561_v20 = vsel %vm309_vm0, 0.0, %v4553_v16  ;;  %v4573_v29 = vsel %vm330_vm1, %v4565_v61, 0.0 }
 0xe4c   :  { %v4578_v4 = vpack.c.bf16 %v4564_v46, %v4563_v32  ;;  %v4692_v19 = vpack.c.bf16 %v4576_v40, %v4575_v47  ;;  %7081 = vmatprep.mubr.msk.bf16.mxu0 %vm3751_vm4, %v4579_v57  ;;  %v4562_v21 = vsel %vm309_vm0, 0.0, %v4554_v9  ;;  %v4574_v23 = vsel %vm330_vm1, %v4566_v54, 0.0 }
 0xe4d   :  { %7082 = vmatmul.mubr.msk.bf16.vlgmr.msra.gmra.mrb[44].mxu0 %vm3751_vm4, %v4580_v45  ;;  %v4577_v0 = vpack.c.bf16 %v4562_v21, %v4561_v20  ;;  %v4691_v17 = vpack.c.bf16 %v4574_v23, %v4573_v29 }
 0xe4e   :  { %7086 = vmatpush3.bf16.msra.mxu0 %v9408_v34 }
 0xe4f   :  { %7093 = vmatprep.mubr.msk.bf16.mxu0 %vm3751_vm4, %v4577_v0  ;;  %7087 = vmatprep.subr.bf16.mxu0 %v9429_v62 }
 0xe52   :  { %7088 = vmatpush3.bf16.msra.mxu0 %v9429_v62 }
 0xe53   :  { %7089 = vmatprep.subr.bf16.mxu0 %v9439_v14 }
 0xe56   :  { %7090 = vmatpush3.bf16.msra.mxu0 %v9439_v14 }
 0xe57   :  { %7091 = vmatprep.subr.bf16.mxu0 %v9443_v18 }
 0xe5a   :  { %7092 = vmatpush3.bf16.msra.mxu0 %v9443_v18 }
 0xe5b   :  { %7097 = vmatprep.subr.bf16.mxu0 %v9447_v10 }
 0xe5d   :  { %7094 = vmatmul.mubr.msk.bf16.vlgmr.msra.gmra.mrb[44].mxu0 %vm3751_vm4, %v4578_v4 }
 0xe5e   :  { %7098 = vmatpush3.bf16.msra.mxu0 %v9447_v10  ;;  %7105 = vmatprep.mubr.msk.bf16.mxu0 %vm3751_vm4, %v4691_v17 }
 0xe5f   :  { %7099 = vmatprep.subr.bf16.mxu0 %v9451_v58 }
 0xe62   :  { %7100 = vmatpush3.bf16.msra.mxu0 %v9451_v58 }
 0xe63   :  { %7101 = vmatprep.subr.bf16.mxu0 %v9457_v15 }
 0xe66   :  { %7102 = vmatpush3.bf16.msra.mxu0 %v9457_v15 }
 0xe67   :  { %7103 = vmatprep.subr.bf16.mxu0 %v9461_v52 }
 0xe6a   :  { %7104 = vmatpush3.bf16.msra.mxu0 %v9461_v52 }
 0xe6b   :  { %7145 = vmatprep.subr.bf16.mxu0 %v9321_v6 }
 0xe6d   :  { %7106 = vmatmul.mubr.msk.bf16.vlgmr.msra.gmra.mrb[44].mxu0 %vm3751_vm4, %v4692_v19 }
 0xe6e   :  { %7146 = vmatpush3.bf16.msra.mxu0 %v9321_v6 }
 0xe6f   :  { %7147 = vmatprep.subr.bf16.mxu0 %v9397_v13 }
 0xe72   :  { %7148 = vmatpush3.bf16.msra.mxu0 %v9397_v13 }
 0xe73   :  { %7149 = vmatprep.subr.bf16.mxu0 %v9401_v2 }
 0xe76   :  { %7150 = vmatpush3.bf16.msra.mxu0 %v9401_v2 }
 0xe77   :  { %7151 = vmatprep.subr.bf16.mxu0 %v9403_v60 }
 0xe7a   :  { %7152 = vmatpush3.bf16.msra.mxu0 %v9403_v60 }
 0xe7b   :  { %7157 = vmatprep.subr.bf16.mxu0 %v9408_v34 }
 0xf40   :  { %v7107_v27 = vpop.f32.mrb[44].mxu0 }
 0xf41   :  { %v4754_v38 = vmul.f32 %v7107_v27, %v9476_v35  ;;  %v4733_v16 = vpop.f32.mrb[45].mxu0 }
 0xf42   :  { %v4752_v61 = vmul.f32 %v9476_v35, %v4733_v16  ;;  %v7108_v12 = vpop.f32.mrb[46].mxu0 }
 0xf43   :  { %v9606_v32 = vadd.f32 %v9481_v49, %v4754_v38  ;;  %v4755_v47 = vmul.f32 %v7108_v12, %v9476_v35  ;;  %v4736_v24 = vpop.f32.mrb[47].mxu0 }
 0xf44   :  { %v9610_v39 = vadd.f32 %v9481_v49, %v4752_v61  ;;  %v4753_v45 = vmul.f32 %v9476_v35, %v4736_v24 }
 0xf45   :  { %v9614_v9 = vadd.f32 %v9481_v49, %v4755_v47  ;;  %v4762_v46 = vsub.f32 %v9606_v32, %v9503_v30 }
 0xf46   :  { %v4760_v54 = vsub.f32 %v9610_v39, %v9497_v44  ;;  %v9619_v57 = vadd.f32 %v9481_v49, %v4753_v45 }
 0xf47   :  { %v4763_v40 = vsub.f32 %v9614_v9, %v9506_v53  ;;  %v4766_v44 = vadd.f32 %v4762_v46, %v9332_v8 }
 0xf48   :  { %v4764_v20 = vadd.f32 %v4760_v54, %v9325_v63  ;;  %v4761_v29 = vsub.f32 %v9619_v57, %v9511_v55 }
 0xf49   :  { %v4767_v4 = vadd.f32 %v4763_v40, %v9327_v28  ;;  %v4774_v16 = vrot.slane %v4766_v44, 7 }
 0xf4a   :  { %v4765_v19 = vadd.f32 %v4761_v29, %v9329_v33  ;;  %v4772_v21 = vrot.slane %v4764_v20, 7  ;;  %v4784_v61 = vrot.slane %v4764_v20, 1 }
 0xf4b   :  { %v4799_v17 = vpack.c.bf16 %v4767_v4, %v4766_v44  ;;  %v4775_v55 = vrot.slane %v4767_v4, 7  ;;  %v4782_v24 = vsel %vm309_vm0, 0.0, %v4774_v16  ;;  %v4787_v40 = vrot.slane %v4767_v4, 1 }
 0xf4c   :  { %v4798_v23 = vpack.c.bf16 %v4765_v19, %v4764_v20  ;;  %v4773_v0 = vrot.slane %v4765_v19, 7  ;;  %v4780_v30 = vsel %vm309_vm0, 0.0, %v4772_v21  ;;  %v4785_v38 = vrot.slane %v4765_v19, 1 }
 0xf4d   :  { %v4783_v12 = vsel %vm309_vm0, 0.0, %v4775_v55  ;;  %v4792_v54 = vsel %vm330_vm1, %v4784_v61, 0.0  ;;  %v4786_v20 = vrot.slane %v4766_v44, 1  ;;  %v4795_v29 = vsel %vm330_vm1, %v4787_v40, 0.0 }
 0xf4e   :  { %7117 = vmatprep.mubr.msk.bf16.mxu1 %vm3751_vm4, %v4798_v23  ;;  %v4781_v53 = vsel %vm309_vm0, 0.0, %v4773_v0  ;;  %v4793_v47 = vsel %vm330_vm1, %v4785_v38, 0.0  ;;  %v4797_v45 = vpack.c.bf16 %v4783_v12, %v4782_v24 }
 0xf4f   :  { %7118 = vmatmul.mubr.msk.bf16.vlgmr.msra.gmra.mrb[40].mxu1 %vm3751_vm4, %v4799_v17  ;;  %v4796_v27 = vpack.c.bf16 %v4781_v53, %v4780_v30  ;;  %v4910_v46 = vpack.c.bf16 %v4793_v47, %v4792_v54  ;;  %v4794_v19 = vsel %vm330_vm1, %v4786_v20, 0.0 }
 0xf50   :  { %7122 = vmatpush3.bf16.msra.mxu1 %v9317_v22  ;;  %v4911_v21 = vpack.c.bf16 %v4795_v29, %v4794_v19 }
 0xf51   :  { %7129 = vmatprep.mubr.msk.bf16.mxu1 %vm3751_vm4, %v4796_v27  ;;  %7123 = vmatprep.subr.bf16.mxu1 %v9339_v42 }
 0xf54   :  { %7124 = vmatpush3.bf16.msra.mxu1 %v9339_v42 }
 0xf55   :  { %7125 = vmatprep.subr.bf16.mxu1 %v9348_v3 }
 0xf58   :  { %7126 = vmatpush3.bf16.msra.mxu1 %v9348_v3 }
 0xf59   :  { %7127 = vmatprep.subr.bf16.mxu1 %v9352_v7 }
 0xf5c   :  { %7128 = vmatpush3.bf16.msra.mxu1 %v9352_v7 }
 0xf5d   :  { %7133 = vmatprep.subr.bf16.mxu1 %v9359_v48 }
 0xf5f   :  { %7130 = vmatmul.mubr.msk.bf16.vlgmr.msra.gmra.mrb[40].mxu1 %vm3751_vm4, %v4797_v45 }
 0xf60   :  { %7134 = vmatpush3.bf16.msra.mxu1 %v9359_v48  ;;  %7141 = vmatprep.mubr.msk.bf16.mxu1 %vm3751_vm4, %v4910_v46 }
 0xf61   :  { %7135 = vmatprep.subr.bf16.mxu1 %v9368_v11 }
 0xf64   :  { %7136 = vmatpush3.bf16.msra.mxu1 %v9368_v11 }
 0xf65   :  { %7137 = vmatprep.subr.bf16.mxu1 %v9374_v51 }
 0xf68   :  { %7138 = vmatpush3.bf16.msra.mxu1 %v9374_v51 }
 0xf69   :  { %7139 = vmatprep.subr.bf16.mxu1 %v9378_v1 }
 0xf6c   :  { %7140 = vmatpush3.bf16.msra.mxu1 %v9378_v1 }
 0xf6d   :  { %7181 = vmatprep.subr.bf16.mxu1 %v9255_v50 }
 0xf6f   :  { %7142 = vmatmul.mubr.msk.bf16.vlgmr.msra.gmra.mrb[40].mxu1 %vm3751_vm4, %v4911_v21 }
 0xf70   :  { %7182 = vmatpush3.bf16.msra.mxu1 %v9255_v50 }
 0xf71   :  { %7183 = vmatprep.subr.bf16.mxu1 %v9306_v41 }
 0xf74   :  { %7184 = vmatpush3.bf16.msra.mxu1 %v9306_v41 }
 0xf75   :  { %7185 = vmatprep.subr.bf16.mxu1 %v9310_v36 }
 0xf78   :  { %7186 = vmatpush3.bf16.msra.mxu1 %v9310_v36 }
 0xf79   :  { %7187 = vmatprep.subr.bf16.mxu1 %v9312_v5 }
 0xf7c   :  { %7188 = vmatpush3.bf16.msra.mxu1 %v9312_v5 }
 0xf7d   :  { %7193 = vmatprep.subr.bf16.mxu1 %v9317_v22 }
0x1042   :  { %v7143_v4 = vpop.f32.mrb[40].mxu1 }
0x1043   :  { %v4973_v44 = vmul.f32 %v7143_v4, %v9412_v59  ;;  %v4952_v23 = vpop.f32.mrb[41].mxu1 }
0x1044   :  { %v4971_v50 = vmul.f32 %v9412_v59, %v4952_v23  ;;  %v7144_v0 = vpop.f32.mrb[42].mxu1 }
0x1045   :  { %v4977_v17 = vadd.f32 %v9414_v37, %v4973_v44  ;;  %v4974_v41 = vmul.f32 %v7144_v0, %v9412_v59  ;;  %v4955_v30 = vpop.f32.mrb[43].mxu1 }
0x1046   :  { %v4975_v36 = vadd.f32 %v9414_v37, %v4971_v50  ;;  %v4972_v53 = vmul.f32 %v9412_v59, %v4955_v30 }
0x1047   :  { %v4981_v27 = vmax.f32 %v4977_v17, 0.0  ;;  %v4978_v5 = vadd.f32 %v9414_v37, %v4974_v41 }
0x1048   :  { %v4979_v55 = vmax.f32 %v4975_v36, 0.0  ;;  %v4976_v38 = vadd.f32 %v9414_v37, %v4972_v53 }
0x1049   :  { %v4989_v16 = vrot.slane %v4981_v27, 7  ;;  %v5001_v61 = vrot.slane %v4981_v27, 1  ;;  %v4982_v12 = vmax.f32 %v4978_v5, 0.0 }
0x104a   :  { %v4987_v47 = vrot.slane %v4979_v55, 7  ;;  %v4999_v24 = vrot.slane %v4979_v55, 1  ;;  %v4980_v45 = vmax.f32 %v4976_v38, 0.0 }
0x104b   :  { %v4997_v54 = vsel %vm309_vm0, 0.0, %v4989_v16  ;;  %v5009_v46 = vsel %vm330_vm1, %v5001_v61, 0.0  ;;  %v4990_v40 = vrot.slane %v4982_v12, 7  ;;  %v5002_v20 = vrot.slane %v4982_v12, 1 }
0x104c   :  { %v5014_v29 = vpack.c.bf16 %v4982_v12, %v4981_v27  ;;  %v4988_v19 = vrot.slane %v4980_v45, 7  ;;  %v5000_v21 = vrot.slane %v4980_v45, 1  ;;  %v5013_v4 = vpack.c.bf16 %v4980_v45, %v4979_v55 }
0x104d   :  { %v4998_v44 = vsel %vm309_vm0, 0.0, %v4990_v40  ;;  %v5010_v23 = vsel %vm330_vm1, %v5002_v20, 0.0  ;;  %v4995_v50 = vsel %vm309_vm0, 0.0, %v4987_v47  ;;  %v5007_v0 = vsel %vm330_vm1, %v4999_v24, 0.0 }
0x104e   :  { %v5012_v17 = vpack.c.bf16 %v4998_v44, %v4997_v54  ;;  %v5126_v41 = vpack.c.bf16 %v5010_v23, %v5009_v46  ;;  %7153 = vmatprep.mubr.msk.bf16.mxu0 %vm3751_vm4, %v5013_v4  ;;  %v4996_v30 = vsel %vm309_vm0, 0.0, %v4988_v19  ;;  %v5008_v36 = vsel %vm330_vm1, %v5000_v21, 0.0 }
0x104f   :  { %7154 = vmatmul.mubr.msk.bf16.vlgmr.msra.gmra.mrb[48].mxu0 %vm3751_vm4, %v5014_v29  ;;  %v5011_v53 = vpack.c.bf16 %v4996_v30, %v4995_v50  ;;  %v5125_v27 = vpack.c.bf16 %v5008_v36, %v5007_v0  ;;  %v5194_v47 = vsub.f32 %v9490_v26, %v9610_v39  ;;  %v5197_v46 = vsub.f32 %v9494_v43, %v9614_v9 }
0x1050   :  { %7158 = vmatpush3.bf16.msra.mxu0 %v9408_v34  ;;  %v5195_v29 = vsub.f32 %v9500_v25, %v9619_v57 }
0x1051   :  { %7165 = vmatprep.mubr.msk.bf16.mxu0 %vm3751_vm4, %v5011_v53  ;;  %7159 = vmatprep.subr.bf16.mxu0 %v9429_v62 }
0x1054   :  { %7160 = vmatpush3.bf16.msra.mxu0 %v9429_v62 }
0x1055   :  { %7161 = vmatprep.subr.bf16.mxu0 %v9439_v14 }
0x1058   :  { %7162 = vmatpush3.bf16.msra.mxu0 %v9439_v14 }
0x1059   :  { %7163 = vmatprep.subr.bf16.mxu0 %v9443_v18 }
0x105c   :  { %7164 = vmatpush3.bf16.msra.mxu0 %v9443_v18 }
0x105d   :  { %7169 = vmatprep.subr.bf16.mxu0 %v9447_v10 }
0x105f   :  { %7166 = vmatmul.mubr.msk.bf16.vlgmr.msra.gmra.mrb[48].mxu0 %vm3751_vm4, %v5012_v17 }
0x1060   :  { %7170 = vmatpush3.bf16.msra.mxu0 %v9447_v10  ;;  %7177 = vmatprep.mubr.msk.bf16.mxu0 %vm3751_vm4, %v5125_v27 }
0x1061   :  { %7171 = vmatprep.subr.bf16.mxu0 %v9451_v58 }
0x1064   :  { %7172 = vmatpush3.bf16.msra.mxu0 %v9451_v58 }
0x1065   :  { %7173 = vmatprep.subr.bf16.mxu0 %v9457_v15 }
0x1068   :  { %7174 = vmatpush3.bf16.msra.mxu0 %v9457_v15 }
0x1069   :  { %7175 = vmatprep.subr.bf16.mxu0 %v9461_v52 }
0x106c   :  { %7176 = vmatpush3.bf16.msra.mxu0 %v9461_v52 }
0x106d   :  { %7217 = vmatprep.subr.bf16.mxu0 %v9321_v6 }
0x106f   :  { %7178 = vmatmul.mubr.msk.bf16.vlgmr.msra.gmra.mrb[48].mxu0 %vm3751_vm4, %v5126_v41 }
0x1070   :  { %7218 = vmatpush3.bf16.msra.mxu0 %v9321_v6 }
0x1071   :  { %7219 = vmatprep.subr.bf16.mxu0 %v9397_v13 }
0x1074   :  { %7220 = vmatpush3.bf16.msra.mxu0 %v9397_v13  ;;  %v5196_v13 = vsub.f32 %v9486_v31, %v9606_v32 }
0x1075   :  { %7221 = vmatprep.subr.bf16.mxu0 %v9401_v2 }
0x1078   :  { %7222 = vmatpush3.bf16.msra.mxu0 %v9401_v2 }
0x1079   :  { %7223 = vmatprep.subr.bf16.mxu0 %v9403_v60 }
0x107c   :  { %7224 = vmatpush3.bf16.msra.mxu0 %v9403_v60 }
0x107d   :  { %7229 = vmatprep.subr.bf16.mxu0 %v9408_v34 }
0x1142   :  { %v7179_v5 = vpop.f32.mrb[48].mxu0 }
0x1143   :  { %v5188_v55 = vmul.f32 %v7179_v5, %v9476_v35  ;;  %v5167_v38 = vpop.f32.mrb[49].mxu0 }
0x1144   :  { %v5186_v6 = vmul.f32 %v9476_v35, %v5167_v38  ;;  %v7180_v16 = vpop.f32.mrb[50].mxu0 }
0x1145   :  { %v9718_v61 = vadd.f32 %v9481_v49, %v5188_v55  ;;  %v5189_v2 = vmul.f32 %v7180_v16, %v9476_v35  ;;  %v5170_v12 = vpop.f32.mrb[51].mxu0 }
0x1146   :  { %v9724_v60 = vadd.f32 %v9481_v49, %v5186_v6  ;;  %v5187_v24 = vmul.f32 %v9476_v35, %v5170_v12 }
0x1147   :  { %v5200_v45 = vadd.f32 %v5196_v13, %v9718_v61  ;;  %v9731_v54 = vadd.f32 %v9481_v49, %v5189_v2 }
0x1148   :  { %v5198_v40 = vadd.f32 %v5194_v47, %v9724_v60  ;;  %v9737_v20 = vadd.f32 %v9481_v49, %v5187_v24 }
0x1149   :  { %v5204_v19 = vadd.f32 %v5200_v45, %v9332_v8  ;;  %v5201_v21 = vadd.f32 %v5197_v46, %v9731_v54 }
0x114a   :  { %v5202_v4 = vadd.f32 %v5198_v40, %v9325_v63  ;;  %v5199_v44 = vadd.f32 %v5195_v29, %v9737_v20 }
0x114b   :  { %v5212_v23 = vrot.slane %v5204_v19, 7  ;;  %v5224_v50 = vrot.slane %v5204_v19, 1  ;;  %v5205_v0 = vadd.f32 %v5201_v21, %v9327_v28 }
0x114c   :  { %v5203_v17 = vadd.f32 %v5199_v44, %v9329_v33  ;;  %v5210_v41 = vrot.slane %v5202_v4, 7  ;;  %v5222_v30 = vrot.slane %v5202_v4, 1 }
0x114d   :  { %v5213_v36 = vrot.slane %v5205_v0, 7  ;;  %v5225_v53 = vrot.slane %v5205_v0, 1  ;;  %v5237_v27 = vpack.c.bf16 %v5205_v0, %v5204_v19  ;;  %v5220_v5 = vsel %vm309_vm0, 0.0, %v5212_v23 }
0x114e   :  { %v5236_v55 = vpack.c.bf16 %v5203_v17, %v5202_v4  ;;  %v5211_v38 = vrot.slane %v5203_v17, 7  ;;  %v5218_v6 = vsel %vm309_vm0, 0.0, %v5210_v41  ;;  %v5223_v16 = vrot.slane %v5203_v17, 1 }
0x114f   :  { %v5221_v13 = vsel %vm309_vm0, 0.0, %v5213_v36  ;;  %v5230_v2 = vsel %vm330_vm1, %v5222_v30, 0.0  ;;  %v5232_v12 = vsel %vm330_vm1, %v5224_v50, 0.0  ;;  %v5233_v47 = vsel %vm330_vm1, %v5225_v53, 0.0 }
0x1150   :  { %7189 = vmatprep.mubr.msk.bf16.mxu1 %vm3751_vm4, %v5236_v55  ;;  %v5219_v24 = vsel %vm309_vm0, 0.0, %v5211_v38  ;;  %v5235_v45 = vpack.c.bf16 %v5221_v13, %v5220_v5  ;;  %v5231_v46 = vsel %vm330_vm1, %v5223_v16, 0.0  ;;  %v5349_v40 = vpack.c.bf16 %v5233_v47, %v5232_v12 }
0x1151   :  { %7190 = vmatmul.mubr.msk.bf16.vlgmr.msra.gmra.mrb[44].mxu1 %vm3751_vm4, %v5237_v27  ;;  %v5234_v29 = vpack.c.bf16 %v5219_v24, %v5218_v6  ;;  %v5348_v19 = vpack.c.bf16 %v5231_v46, %v5230_v2 }
0x1152   :  { %7194 = vmatpush3.bf16.msra.mxu1 %v9317_v22 }
0x1153   :  { %7201 = vmatprep.mubr.msk.bf16.mxu1 %vm3751_vm4, %v5234_v29  ;;  %7195 = vmatprep.subr.bf16.mxu1 %v9339_v42 }
0x1156   :  { %7196 = vmatpush3.bf16.msra.mxu1 %v9339_v42 }
0x1157   :  { %7197 = vmatprep.subr.bf16.mxu1 %v9348_v3 }
0x115a   :  { %7198 = vmatpush3.bf16.msra.mxu1 %v9348_v3 }
0x115b   :  { %7199 = vmatprep.subr.bf16.mxu1 %v9352_v7 }
0x115e   :  { %7200 = vmatpush3.bf16.msra.mxu1 %v9352_v7 }
0x115f   :  { %7205 = vmatprep.subr.bf16.mxu1 %v9359_v48 }
0x1161   :  { %7202 = vmatmul.mubr.msk.bf16.vlgmr.msra.gmra.mrb[44].mxu1 %vm3751_vm4, %v5235_v45 }
0x1162   :  { %7206 = vmatpush3.bf16.msra.mxu1 %v9359_v48  ;;  %7213 = vmatprep.mubr.msk.bf16.mxu1 %vm3751_vm4, %v5348_v19 }
0x1163   :  { %7207 = vmatprep.subr.bf16.mxu1 %v9368_v11 }
0x1166   :  { %7208 = vmatpush3.bf16.msra.mxu1 %v9368_v11 }
0x1167   :  { %7209 = vmatprep.subr.bf16.mxu1 %v9374_v51 }
0x116a   :  { %7210 = vmatpush3.bf16.msra.mxu1 %v9374_v51 }
0x116b   :  { %7211 = vmatprep.subr.bf16.mxu1 %v9378_v1 }
0x116e   :  { %7212 = vmatpush3.bf16.msra.mxu1 %v9378_v1 }
0x116f   :  { %7253 = vmatprep.subr.bf16.mxu1 %v8070_v56 }
0x1171   :  { %7214 = vmatmul.mubr.msk.bf16.vlgmr.msra.gmra.mrb[44].mxu1 %vm3751_vm4, %v5349_v40 }
0x1172   :  { %7261 = vmatprep.mubr.msk.bf16.mxu1 %vm8071_vm5, %v8070_v56 }
0x1244   :  { %v7215_v22 = vpop.f32.mrb[44].mxu1 }
0x1245   :  { %v5411_v42 = vmul.f32 %v7215_v22, %v9412_v59  ;;  %v5390_v3 = vpop.f32.mrb[45].mxu1 }
0x1246   :  { %v5409_v7 = vmul.f32 %v9412_v59, %v5390_v3  ;;  %v7216_v48 = vpop.f32.mrb[46].mxu1  ;;  %v5633_v3 = vadd.f32 %v9737_v20, %v9619_v57 }
0x1247   :  { %v5415_v11 = vadd.f32 %v9414_v37, %v5411_v42  ;;  %v5412_v21 = vmul.f32 %v7216_v48, %v9412_v59  ;;  %v5393_v51 = vpop.f32.mrb[47].mxu1  ;;  %v5635_v42 = vadd.f32 %v9731_v54, %v9614_v9 }
0x1248   :  { %v5413_v4 = vadd.f32 %v9414_v37, %v5409_v7  ;;  %v5410_v1 = vmul.f32 %v9412_v59, %v5393_v51 }
0x1249   :  { %v5419_v44 = vmax.f32 %v5415_v11, 0.0  ;;  %v5416_v23 = vadd.f32 %v9414_v37, %v5412_v21  ;;  %v5639_v21 = vmul.f32 3.0, %v5635_v42  ;;  %v7616_v42 = vld [vmem:[#allocation29 + $0x18] sm:$0xff]  }
0x124a   :  { %v5417_v50 = vmax.f32 %v5413_v4, 0.0  ;;  %v5414_v0 = vadd.f32 %v9414_v37, %v5410_v1  ;;  %v5637_v1 = vmul.f32 3.0, %v5633_v3  ;;  %v6306_v3 = vld [vmem:[#allocation27] ss:$0 sm:$0xff] }
0x124b   :  { %v5427_v17 = vrot.slane %v5419_v44, 7  ;;  %v5439_v41 = vrot.slane %v5419_v44, 1  ;;  %v5420_v30 = vmax.f32 %v5416_v23, 0.0 }
0x124c   :  { %v5425_v36 = vrot.slane %v5417_v50, 7  ;;  %v5437_v53 = vrot.slane %v5417_v50, 1  ;;  %v5418_v27 = vmax.f32 %v5414_v0, 0.0  ;;  %v5643_v0 = vadd.f32 %v5639_v21, %v9494_v43 }
0x124d   :  { %v5435_v5 = vsel %vm309_vm0, 0.0, %v5427_v17  ;;  %v5447_v55 = vsel %vm330_vm1, %v5439_v41, 0.0  ;;  %v5428_v38 = vrot.slane %v5420_v30, 7  ;;  %v5440_v6 = vrot.slane %v5420_v30, 1 }
0x124e   :  { %v5452_v16 = vpack.c.bf16 %v5420_v30, %v5419_v44  ;;  %v5426_v59 = vrot.slane %v5418_v27, 7  ;;  %v5438_v13 = vrot.slane %v5418_v27, 1  ;;  %v5451_v2 = vpack.c.bf16 %v5418_v27, %v5417_v50 }
0x124f   :  { %v5436_v12 = vsel %vm309_vm0, 0.0, %v5428_v38  ;;  %v5448_v37 = vsel %vm330_vm1, %v5440_v6, 0.0  ;;  %v5433_v47 = vsel %vm309_vm0, 0.0, %v5425_v36  ;;  %v5445_v24 = vsel %vm330_vm1, %v5437_v53, 0.0 }
0x1250   :  { %v5450_v45 = vpack.c.bf16 %v5436_v12, %v5435_v5  ;;  %v5564_v46 = vpack.c.bf16 %v5448_v37, %v5447_v55  ;;  %7225 = vmatprep.mubr.msk.bf16.mxu0 %vm3751_vm4, %v5451_v2  ;;  %v5434_v40 = vsel %vm309_vm0, 0.0, %v5426_v59  ;;  %v5446_v29 = vsel %vm330_vm1, %v5438_v13, 0.0  ;;  %v7604_v13 = vld [vmem:[%s9946_s19 + $0x38] sm:$0xff]   ;;  %v7605_v12 = vld [vmem:[%s9946_s19 + $0x40] sm:$0xff]  }
0x1251   :  { %7226 = vmatmul.mubr.msk.bf16.vlgmr.msra.gmra.mrb[52].mxu0 %vm3751_vm4, %v5452_v16  ;;  %v5449_v19 = vpack.c.bf16 %v5434_v40, %v5433_v47  ;;  %v5563_v22 = vpack.c.bf16 %v5446_v29, %v5445_v24  ;;  %v5641_v30 = vadd.f32 %v5637_v1, %v9500_v25  ;;  %v7606_v47 = vld [vmem:[%s9946_s19 + $0x48] sm:$0xff]   ;;  %v7607_v24 = vld [vmem:[%s9946_s19 + $0x50] sm:$0xff]   ;;  %v7608_v40 = vld [vmem:[%s9946_s19 + $0x58] sm:$0xff]  }
0x1252   :  { %7230 = vmatpush3.bf16.msra.mxu0 %v9408_v34  ;;  %v7597_v34 = vld [vmem:[%s9946_s19] sm:$0xff]  }
0x1253   :  { %7237 = vmatprep.mubr.msk.bf16.mxu0 %vm3751_vm4, %v5449_v19  ;;  %7231 = vmatprep.subr.bf16.mxu0 %v9429_v62  ;;  %v7609_v19 = vld [vmem:[%s9946_s19 + $0x60] sm:$0xff]  }
0x1254   :  { %7254 = vmatpush3.bf16.msra.mxu1 %v7597_v34  ;;  %v7610_v34 = vld [vmem:[%s9946_s19 + $0x68] sm:$0xff]  }
0x1255   :  { %7255 = vmatprep.subr.bf16.mxu1 %v8070_v56 }
0x1256   :  { %7232 = vmatpush3.bf16.msra.mxu0 %v9429_v62  ;;  %v7598_v62 = vld [vmem:[%s9946_s19 + $0x8] sm:$0xff]  }
0x1257   :  { %7233 = vmatprep.subr.bf16.mxu0 %v9439_v14 }
0x1258   :  { %7256 = vmatpush3.bf16.msra.mxu1 %v7598_v62  ;;  %v7611_v62 = vld [vmem:[%s9946_s19 + $0x70] sm:$0xff]  }
0x1259   :  { %7257 = vmatprep.subr.bf16.mxu1 %v8070_v56 }
0x125a   :  { %7234 = vmatpush3.bf16.msra.mxu0 %v9439_v14  ;;  %v7599_v14 = vld [vmem:[%s9946_s19 + $0x10] sm:$0xff]  }
0x125b   :  { %7235 = vmatprep.subr.bf16.mxu0 %v9443_v18 }
0x125c   :  { %7258 = vmatpush3.bf16.msra.mxu1 %v7599_v14 }
0x125d   :  { %7259 = vmatprep.subr.bf16.mxu1 %v8070_v56 }
0x125e   :  { %7236 = vmatpush3.bf16.msra.mxu0 %v9443_v18  ;;  %v7600_v18 = vld [vmem:[%s9946_s19 + $0x18] sm:$0xff]  }
0x125f   :  { %7241 = vmatprep.subr.bf16.mxu0 %v9447_v10 }
0x1260   :  { %7260 = vmatpush3.bf16.msra.mxu1 %v7600_v18 }
0x1261   :  { %7238 = vmatmul.mubr.msk.bf16.vlgmr.msra.gmra.mrb[52].mxu0 %vm3751_vm4, %v5450_v45  ;;  %7265 = vmatprep.subr.bf16.mxu1 %v8070_v56 }
0x1262   :  { %7242 = vmatpush3.bf16.msra.mxu0 %v9447_v10  ;;  %7249 = vmatprep.mubr.msk.bf16.mxu0 %vm3751_vm4, %v5563_v22  ;;  %v7613_v10 = vld [vmem:[#allocation29] sm:$0xff]  }
0x1263   :  { %7243 = vmatprep.subr.bf16.mxu0 %v9451_v58 }
0x1266   :  { %7244 = vmatpush3.bf16.msra.mxu0 %v9451_v58  ;;  %v7614_v58 = vld [vmem:[#allocation29 + $0x8] sm:$0xff]  }
0x1267   :  { %7245 = vmatprep.subr.bf16.mxu0 %v9457_v15 }
0x126a   :  { %7246 = vmatpush3.bf16.msra.mxu0 %v9457_v15  ;;  %v5634_v15 = vadd.f32 %v9718_v61, %v9606_v32 }
0x126b   :  { %7247 = vmatprep.subr.bf16.mxu0 %v9461_v52 }
0x126c   :  { %v5638_v7 = vmul.f32 3.0, %v5634_v15 }
0x126e   :  { %7248 = vmatpush3.bf16.msra.mxu0 %v9461_v52  ;;  %v5632_v52 = vadd.f32 %v9724_v60, %v9610_v39  ;;  %v5642_v39 = vadd.f32 %v5638_v7, %v9486_v31 }
0x126f   :  { %7301 = vmatprep.subr.bf16.mxu0 %v8070_v56 }
0x1270   :  { %v5636_v48 = vmul.f32 3.0, %v5632_v52  ;;  %v7615_v52 = vld [vmem:[#allocation29 + $0x10] sm:$0xff]  }
0x1271   :  { %7250 = vmatmul.mubr.msk.bf16.vlgmr.msra.gmra.mrb[52].mxu0 %vm3751_vm4, %v5564_v46 }
0x1272   :  { %7309 = vmatprep.mubr.msk.bf16.mxu0 %vm8071_vm5, %v8070_v56  ;;  %7302 = vmatpush3.bf16.msra.mxu0 %v7613_v10  ;;  %v5640_v54 = vadd.f32 %v5636_v48, %v9490_v26  ;;  %v7612_v10 = vld [vmem:[%s9946_s19 + $0x78] sm:$0xff]  }
0x1273   :  { %7303 = vmatprep.subr.bf16.mxu0 %v8070_v56 }
0x1276   :  { %7304 = vmatpush3.bf16.msra.mxu0 %v7614_v58 }
0x1277   :  { %7305 = vmatprep.subr.bf16.mxu0 %v8070_v56 }
0x127a   :  { %7306 = vmatpush3.bf16.msra.mxu0 %v7615_v52 }
0x127b   :  { %7307 = vmatprep.subr.bf16.mxu0 %v8070_v56 }
0x127e   :  { %7308 = vmatpush3.bf16.msra.mxu0 %v7616_v42 }
0x1344   :  { %v7251_v11 = vpop.f32.mrb[52].mxu0 }
0x1345   :  { %v5626_v51 = vmul.f32 %v7251_v11, %v9476_v35  ;;  %v5605_v4 = vpop.f32.mrb[53].mxu0 }
0x1346   :  { %v5624_v44 = vmul.f32 %v9476_v35, %v5605_v4  ;;  %v7252_v32 = vpop.f32.mrb[54].mxu0 }
0x1347   :  { %v5630_v61 = vadd.f32 %v9481_v49, %v5626_v51  ;;  %v5627_v9 = vmul.f32 %v7252_v32, %v9476_v35  ;;  %v5608_v60 = vpop.f32.mrb[55].mxu0 }
0x1348   :  { %v5628_v57 = vadd.f32 %v9481_v49, %v5624_v44  ;;  %v5625_v20 = vmul.f32 %v9476_v35, %v5608_v60  ;;  %v6322_v44 = vld [vmem:[#allocation30] ss:$0 sm:$0xff] }
0x1349   :  { %v5646_v23 = vadd.f32 %v5642_v39, %v5630_v61  ;;  %v5631_v50 = vadd.f32 %v9481_v49, %v5627_v9 }
0x134a   :  { %v5644_v17 = vadd.f32 %v5640_v54, %v5628_v57  ;;  %v5629_v41 = vadd.f32 %v9481_v49, %v5625_v20 }
0x134b   :  { %v5650_v31 = vmul.f32 0.125, %v5646_v23  ;;  %v5647_v36 = vadd.f32 %v5643_v0, %v5631_v50 }
0x134c   :  { %v5648_v53 = vmul.f32 0.125, %v5644_v17  ;;  %v5645_v27 = vadd.f32 %v5641_v30, %v5629_v41 }
0x134d   :  { %v5654_v5 = vadd.f32 %v5650_v31, %v9332_v8  ;;  %v5651_v55 = vmul.f32 0.125, %v5647_v36 }
0x134e   :  { %v5652_v26 = vadd.f32 %v5648_v53, %v9325_v63  ;;  %v5649_v35 = vmul.f32 0.125, %v5645_v27  ;;  %v7601_v63 = vld [vmem:[%s9946_s19 + $0x20] sm:$0xff]  }
0x134f   :  { %5658 = vst.msk [vmem:[#allocation3 + $0x10] sm:$0xff] %vm3751_vm4, %v5654_v5  ;;  %v5655_v38 = vadd.f32 %v5651_v55, %v9327_v28  ;;  %v7602_v28 = vld [vmem:[%s9946_s19 + $0x28] sm:$0xff]  }
0x1350   :  { %5656 = vst.msk [vmem:[#allocation3] sm:$0xff] %vm3751_vm4, %v5652_v26  ;;  %v5653_v49 = vadd.f32 %v5649_v35, %v9329_v33  ;;  %v7603_v33 = vld [vmem:[%s9946_s19 + $0x30] sm:$0xff]  }
0x1351   :  { %5659 = vst.msk [vmem:[#allocation3 + $0x18] sm:$0xff] %vm3751_vm4, %v5655_v38 }
0x1352   :  { %5657 = vst.msk [vmem:[#allocation3 + $0x8] sm:$0xff] %vm3751_vm4, %v5653_v49 }
0x1359   :  { %v5661_v43 = vld [vmem:[#allocation3] ss:$8 sm:$0xf]  ;;  %v5663_v25 = vld [vmem:[#allocation3 + $0x1] ss:$8 sm:$0xf] }
0x135a   :  { %v5664_v6 = vmax.f32 %v5661_v43, %v5663_v25  ;;  %v5749_v16 = vld [vmem:[#allocation3 + $0x2] ss:$8 sm:$0xf]  ;;  %v5751_v59 = vld [vmem:[#allocation3 + $0x3] ss:$8 sm:$0xf] }
0x135b   :  { %v5752_v2 = vmax.f32 %v5749_v16, %v5751_v59  ;;  %v5831_v45 = vld [vmem:[#allocation3 + $0x4] ss:$8 sm:$0xf]  ;;  %v5833_v46 = vld [vmem:[#allocation3 + $0x5] ss:$8 sm:$0xf] }
0x135c   :  { %v5665_v8 = vpack.c.bf16 %v5664_v6, %v5664_v6  ;;  %v5834_v29 = vmax.f32 %v5831_v45, %v5833_v46  ;;  %v5913_v14 = vld [vmem:[#allocation3 + $0x6] ss:$8 sm:$0xf]  ;;  %v5915_v18 = vld [vmem:[#allocation3 + $0x7] ss:$8 sm:$0xf] }
0x135d   :  { %v5753_v37 = vpack.c.bf16 %v5752_v2, %v5752_v2  ;;  %v5916_v58 = vmax.f32 %v5913_v14, %v5915_v18 }
0x135e   :  { %7262 = vmatmul.mubr.msk.bf16.vlgmr.msra.gmra.mrb[48].mxu1 %vm3751_vm4, %v5665_v8  ;;  %v5835_v22 = vpack.c.bf16 %v5834_v29, %v5834_v29 }
0x135f   :  { %7266 = vmatpush3.bf16.msra.mxu1 %v7601_v63  ;;  %7273 = vmatprep.mubr.msk.bf16.mxu1 %vm8071_vm5, %v8070_v56  ;;  %v5917_v15 = vpack.c.bf16 %v5916_v58, %v5916_v58 }
0x1360   :  { %7267 = vmatprep.subr.bf16.mxu1 %v8070_v56 }
0x1363   :  { %7268 = vmatpush3.bf16.msra.mxu1 %v7602_v28 }
0x1364   :  { %7269 = vmatprep.subr.bf16.mxu1 %v8070_v56 }
0x1367   :  { %7270 = vmatpush3.bf16.msra.mxu1 %v7603_v33 }
0x1368   :  { %7271 = vmatprep.subr.bf16.mxu1 %v8070_v56 }
0x136b   :  { %7272 = vmatpush3.bf16.msra.mxu1 %v7604_v13 }
0x136c   :  { %7277 = vmatprep.subr.bf16.mxu1 %v8070_v56 }
0x136e   :  { %7274 = vmatmul.mubr.msk.bf16.vlgmr.msra.gmra.mrb[48].mxu1 %vm3751_vm4, %v5753_v37 }
0x136f   :  { %7278 = vmatpush3.bf16.msra.mxu1 %v7605_v12  ;;  %7285 = vmatprep.mubr.msk.bf16.mxu1 %vm8071_vm5, %v8070_v56 }
0x1370   :  { %7279 = vmatprep.subr.bf16.mxu1 %v8070_v56 }
0x1373   :  { %7280 = vmatpush3.bf16.msra.mxu1 %v7606_v47 }
0x1374   :  { %7281 = vmatprep.subr.bf16.mxu1 %v8070_v56 }
0x1377   :  { %7282 = vmatpush3.bf16.msra.mxu1 %v7607_v24 }
0x1378   :  { %7283 = vmatprep.subr.bf16.mxu1 %v8070_v56 }
0x137b   :  { %7284 = vmatpush3.bf16.msra.mxu1 %v7608_v40 }
0x137c   :  { %7289 = vmatprep.subr.bf16.mxu1 %v8070_v56 }
0x137e   :  { %7286 = vmatmul.mubr.msk.bf16.vlgmr.msra.gmra.mrb[48].mxu1 %vm3751_vm4, %v5835_v22 }
0x137f   :  { %7290 = vmatpush3.bf16.msra.mxu1 %v7609_v19  ;;  %7297 = vmatprep.mubr.msk.bf16.mxu1 %vm8071_vm5, %v8070_v56 }
0x1380   :  { %7291 = vmatprep.subr.bf16.mxu1 %v8070_v56 }
0x1383   :  { %7292 = vmatpush3.bf16.msra.mxu1 %v7610_v34 }
0x1384   :  { %7293 = vmatprep.subr.bf16.mxu1 %v8070_v56 }
0x1387   :  { %7294 = vmatpush3.bf16.msra.mxu1 %v7611_v62 }
0x1388   :  { %7295 = vmatprep.subr.bf16.mxu1 %v8070_v56 }
0x138b   :  { %7296 = vmatpush3.bf16.msra.mxu1 %v7612_v10 }
0x138e   :  { %7298 = vmatmul.mubr.msk.bf16.vlgmr.msra.gmra.mrb[48].mxu1 %vm3751_vm4, %v5917_v15 }
0x1461   :  { %v5987_v7 = vpop.f32.mrb[48].mxu1 }
0x1462   :  { %v7321_v48 = vadd.f32 %v6306_v3, %v5987_v7  ;;  %v7299_v11 = vpop.f32.mrb[49].mxu1 }
0x1463   :  { %v5990_v21 = vpop.f32.mrb[50].mxu1 }
0x1464   :  { %v5994_v51 = vmax.f32 %v7321_v48, 0.0  ;;  %v7300_v4 = vpop.f32.mrb[51].mxu1 }
0x1466   :  { %v5995_v1 = vpack.c.bf16 %v5994_v51, %v5994_v51 }
0x1468   :  { %7310 = vmatmul.mubr.msk.bf16.vlgmr.msra.gmra.mrb[56].mxu0 %vm3751_vm4, %v5995_v1 }
0x153b   :  { %v6072_v32 = vpop.f32.mrb[56].mxu0 }
0x153c   :  { %v6073_v61 = vadd.f32 %v6322_v44, %v6072_v32  ;;  %v7311_v39 = vpop.f32.mrb[57].mxu0 }
0x153d   :  { %v6075_v9 = vpop.f32.mrb[58].mxu0 }
0x153e   :  { %6079 = vst.msk [vmem:[%s9950_s23] sm:$0xf] %vm6078_vm6, %v6073_v61  ;;  %v7312_v56 = vpop.f32.mrb[59].mxu0 }
0x153f   :  { %6084 = vsyncpa [#allocation5], 1 }
0x1540   :  { %6085 = vsyncpa [#allocation7], 1 }
0x1541   :  { %6086 = vsyncpa [#allocation10], 1 }
0x1542   :  { %6087 = vsyncpa [#allocation13], 1 }
0x1543   :  { %6088 = vsyncpa [#allocation16], 1 }
0x1544   :  { %6089 = vsyncpa [#allocation19], 1 }
0x1545   :  { %6090 = vsyncpa [#allocation22], 1 }
0x1546   :  { %6091 = vsyncpa [#allocation25], 1 }
0x1547   :  { %6092 = vsyncpa [#allocation28], 1 }
0x1548   :  { %6093 = vsyncpa [#allocation31], 1 }

</bundles_post_ra>
